<compile_context>
chip_gen: v6e
topology: v6e:2x2x1
jax: 0.10.0
libtpu: 0.0.40
codegen_flags: <defaults>
</compile_context>

<pallas_src>
import functools

import jax
import jax.numpy as jnp
from jax.experimental import pallas as pl
from jax.experimental.pallas import tpu as pltpu

_GP = 128  # per-gate / per-state lane padding


def _round_up(x, m):
    return ((x + m - 1) // m) * m


# ----------------------------------------------------------------------------
# LSTM cell step (PyTorch gate order i, f, g, o), gate-aligned to 128 lanes.
# x@Wih + b is hoisted out of the loop (xw_row); Whh is read from the VMEM ref
# every step so it is never held live across the unrolled recurrence.
# ----------------------------------------------------------------------------
def _sigmoid(z):
    # single EUP tanh instead of exp + reciprocal (shorter serial EUP depth, exact)
    return 0.5 * (jnp.tanh(0.5 * z) + 1.0)


def _lstm_cell(xw_row, h, c, whh_ref):
    gates = xw_row + jnp.dot(h, whh_ref[...], preferred_element_type=jnp.float32)
    i = _sigmoid(gates[:, 0 * _GP:1 * _GP])
    f = _sigmoid(gates[:, 1 * _GP:2 * _GP])
    g = jnp.tanh(gates[:, 2 * _GP:3 * _GP])
    o = _sigmoid(gates[:, 3 * _GP:4 * _GP])
    c_new = f * c + i * g
    h_new = o * jnp.tanh(c_new)
    return h_new, c_new


# ----------------------------------------------------------------------------
# Fused CVAE kernel: encoder LSTM -> [mean|logvar] head -> reparameterize -> KL
# -> decoder h0 (register assembly) -> decoder LSTM (teacher forced)
# -> batched relu/Linear/LogSoftmax/NLL head -> packed stats row.
# ----------------------------------------------------------------------------
def cvae_kernel(xin_ref, xout_ref, h0e_ref, c0e_ref, otense_ref, c0d_ref,
                noise_ref, tgt_ref,
                ewih_ref, ewhh_ref, eb_ref, whead_ref, bhead_ref,
                dwih_ref, dwhh_ref, db_ref, wout_ref, bout_ref,
                logp_ref, stats_ref,
                hdec_sc, *, latent_size):
    L = latent_size
    T_in = xin_ref.shape[0]
    T_out = xout_ref.shape[0]

    # ---------------- encoder LSTM ----------------
    xw_e = jnp.dot(xin_ref[...], ewih_ref[...],
                   preferred_element_type=jnp.float32) + eb_ref[...]   # (T_in, 4*128)
    h = h0e_ref[...]                                                   # (1, 128) padded
    c = c0e_ref[...]
    for t in range(T_in):                      # static unroll; h/c stay in vregs
        h, c = _lstm_cell(xw_e[t:t + 1, :], h, c, ewhh_ref)

    # ------------- [mean | logvar] head (lane-aligned), reparameterize, KL -------------
    head = jnp.dot(h, whead_ref[...],
                   preferred_element_type=jnp.float32) + bhead_ref[...]  # (1, 256)
    mean = head[:, 0:_GP]                       # real values in lanes [0, L), pad = 0
    logvar = head[:, _GP:2 * _GP]
    latent = mean + noise_ref[...] * jnp.exp(0.5 * logvar)              # pad lanes stay 0

    lane = jax.lax.broadcasted_iota(jnp.int32, (1, _GP), 1)
    lmask = lane < L
    # KL_divergence exactly as written in the reference (inner sum(mean**2) broadcasts
    # over every element of exp(logvar) before the outer sum):
    s_m2 = jnp.sum(mean * mean, keepdims=True)                          # (1,1)
    kl = 0.5 * (-jnp.sum(jnp.where(lmask, logvar + 1.0, 0.0), keepdims=True)
                + jnp.sum(jnp.where(lmask, jnp.exp(logvar) + s_m2, 0.0),
                          keepdims=True))                               # (1,1)

    # ------------- decoder h0 = [latent | out_tense] assembled in registers -------------
    h = latent + otense_ref[...]        # out_tense pre-shifted to lanes [L, L+C) on host

    # ---------------- decoder LSTM (teacher forcing) ----------------
    xw_d = jnp.dot(xout_ref[...], dwih_ref[...],
                   preferred_element_type=jnp.float32) + db_ref[...]    # (T_out, 4*128)
    c = c0d_ref[...]
    for t in range(T_out):
        h, c = _lstm_cell(xw_d[t:t + 1, :], h, c, dwhh_ref)
        hdec_sc[t:t + 1, :] = h                 # full-lane (unmasked) history store

    # ---------------- batched head: relu -> Linear -> LogSoftmax -> NLL ----------------
    hs = jnp.maximum(hdec_sc[...], 0.0)                                 # (T_out, 128)
    logits = jnp.dot(hs, wout_ref[...],
                     preferred_element_type=jnp.float32) + bout_ref[...]  # (T_out, 128)
    m = jnp.max(logits, axis=1, keepdims=True)
    logp = logits - m - jnp.log(jnp.sum(jnp.exp(logits - m), axis=1, keepdims=True))
    logp_ref[...] = logp                                                # lane-dense store

    vlane = jax.lax.broadcasted_iota(jnp.int32, logits.shape, 1)
    tgt_mask = vlane == tgt_ref[...]                                    # in-kernel "one-hot"
    loss = -jnp.sum(jnp.where(tgt_mask, logp, 0.0), keepdims=True)      # NLL summed over steps

    # ---------------- packed stats row [kl, loss, 0, ...]: ONE unmasked store ----------------
    stats_ref[...] = (jnp.where(lane == 0, kl, 0.0)
                      + jnp.where(lane == 1, loss, 0.0))


# ----------------------------------------------------------------------------
# pallas_call wrapper (single launch, whole-array VMEM blocks, no grid)
# ----------------------------------------------------------------------------
_VMEM = pl.BlockSpec(memory_space=pltpu.MemorySpace.VMEM)


def run_cvae(xin, xout, h0_enc, c0_enc, otense, c0_dec, noise, tgt, params, latent_size):
    enc, dec = params["enc"], params["dec"]
    T_out = xout.shape[0]
    OP = dec["wout_t"].shape[1]                       # padded (lane-dense) output width

    out_shapes = (jax.ShapeDtypeStruct((T_out, OP), jnp.float32),   # padded log-probs
                  jax.ShapeDtypeStruct((1, _GP), jnp.float32))      # packed stats row
    kern = functools.partial(cvae_kernel, latent_size=latent_size)
    cost = pl.CostEstimate(flops=3_500_000, transcendentals=16_000,
                           bytes_accessed=1_200_000)
    return pl.pallas_call(
        kern,
        out_shape=out_shapes,
        in_specs=[_VMEM] * 18,
        out_specs=(_VMEM, _VMEM),
        scratch_shapes=[pltpu.VMEM((T_out, _GP), jnp.float32)],     # decoder hidden history
        cost_estimate=cost,
    )(xin, xout, h0_enc, c0_enc, otense, c0_dec, noise, tgt,
      enc["wih_t"], enc["whh_t"], enc["b"], enc["whead_t"], enc["bhead"],
      dec["wih_t"], dec["whh_t"], dec["b"], dec["wout_t"], dec["bout"])


# ----------------------------------------------------------------------------
# Parameters (pre-padded to gate-aligned 128-lane layout) + forward glue
# ----------------------------------------------------------------------------
def make_params(key, vocab_size, hidden_size, num_condition, condition_size,
                latent_size, output_size):
    enc_hid = hidden_size + condition_size
    dec_hid = latent_size + condition_size
    out_pad = max(128, _round_up(output_size, 128))
    ks = jax.random.split(key, 14)

    def rnd(k, shape, scale=0.1):
        return (scale * jax.random.normal(k, shape)).astype(jnp.float32)

    def pad_gate_cols(w, hid):
        # (in, 4*hid) -> (in, 4*128): gate k's real columns live at [k*128, k*128+hid)
        out = jnp.zeros((w.shape[0], 4 * _GP), jnp.float32)
        for k in range(4):
            out = out.at[:, k * _GP:k * _GP + hid].set(w[:, k * hid:(k + 1) * hid])
        return out

    def pad_rows(w):
        out = jnp.zeros((_GP, w.shape[1]), jnp.float32)
        return out.at[:w.shape[0], :].set(w)

    # encoder LSTM
    e_wih = rnd(ks[2], (hidden_size, 4 * enc_hid))
    e_whh = rnd(ks[3], (enc_hid, 4 * enc_hid))
    e_b = rnd(ks[4], (1, 4 * enc_hid))            # bias_ih + bias_hh combined
    # fused [mean | logvar] head, lane-aligned: mean -> cols [0,L), logvar -> cols [128,128+L)
    w_mean, b_mean = rnd(ks[5], (enc_hid, latent_size)), rnd(ks[6], (1, latent_size))
    w_lv, b_lv = rnd(ks[7], (enc_hid, latent_size)), rnd(ks[8], (1, latent_size))
    whead_p = jnp.zeros((_GP, 2 * _GP), jnp.float32)
    whead_p = whead_p.at[:enc_hid, 0:latent_size].set(w_mean)
    whead_p = whead_p.at[:enc_hid, _GP:_GP + latent_size].set(w_lv)
    bhead_p = jnp.zeros((1, 2 * _GP), jnp.float32)
    bhead_p = bhead_p.at[:, 0:latent_size].set(b_mean)
    bhead_p = bhead_p.at[:, _GP:_GP + latent_size].set(b_lv)

    # decoder LSTM
    d_wih = rnd(ks[9], (hidden_size, 4 * dec_hid))
    d_whh = rnd(ks[10], (dec_hid, 4 * dec_hid))
    d_b = rnd(ks[11], (1, 4 * dec_hid))

    # output head: zero weights / -1e30 bias in pad columns so the padded logits never
    # affect the max, the softmax denominator, or the NLL.
    wout = rnd(ks[12], (dec_hid, output_size))
    bout = rnd(ks[13], (1, output_size))
    wout_p = jnp.zeros((_GP, out_pad), jnp.float32).at[:dec_hid, :output_size].set(wout)
    bout_p = jnp.full((1, out_pad), -1e30, jnp.float32).at[:, :output_size].set(bout)

    return {
        "embedding": rnd(ks[0], (vocab_size, hidden_size)),
        "con_embedding": rnd(ks[1], (num_condition, condition_size)),
        "enc": {
            "wih_t": pad_gate_cols(e_wih, enc_hid),             # (hidden, 512)
            "whh_t": pad_rows(pad_gate_cols(e_whh, enc_hid)),   # (128, 512)
            "b": pad_gate_cols(e_b, enc_hid),                   # (1, 512)
            "whead_t": whead_p,                                 # (128, 256)
            "bhead": bhead_p,                                   # (1, 256)
        },
        "dec": {
            "wih_t": pad_gate_cols(d_wih, dec_hid),             # (hidden, 512)
            "whh_t": pad_rows(pad_gate_cols(d_whh, dec_hid)),   # (128, 512)
            "b": pad_gate_cols(d_b, dec_hid),                   # (1, 512)
            "wout_t": wout_p,                                   # (128, 128)
            "bout": bout_p,                                     # (1, 128)
        },
    }


def cvae_forward(params, init_hidden, input_word, output_word,
                 input_tense, output_tense, enc_noise, dec_cell, *, output_size):
    emb = params["embedding"]
    cemb = params["con_embedding"]
    L = enc_noise.shape[1]
    C = cemb.shape[1]

    # Cheap gathers / concat / lane padding kept in XLA glue; everything downstream is
    # one kernel launch.
    # TODO(synk): the tiny embedding gathers could be scalar-prefetched into the kernel
    # to shave residual dispatch glue; left in XLA for simplicity.
    xin = emb[input_word[:, 0]]                              # (T_in, hidden)
    xout = emb[output_word[:, 0]]                            # (T_out, hidden) teacher forcing
    inp_tense = cemb[input_tense[0, 0]][None, :]             # (1, condition)
    out_tense = cemb[output_tense[0, 0]][None, :]            # (1, condition)
    h_init, c_init = init_hidden                             # (1, hidden), (1, enc_hid)

    def pad128(x):
        return jnp.zeros((1, _GP), jnp.float32).at[:, :x.shape[1]].set(x)

    h0e_p = pad128(jnp.concatenate([h_init, inp_tense], axis=1))   # (1,128) [h|tense|0]
    c0e_p = pad128(c_init)
    otense_p = jnp.zeros((1, _GP), jnp.float32).at[:, L:L + C].set(out_tense)  # shifted
    c0d_p = pad128(dec_cell)
    noise_p = pad128(enc_noise)
    tgt = output_word.astype(jnp.int32)                      # (T_out, 1) NLL targets

    # TODO(synk): non-teacher-forcing greedy decode (random.random() coin flip, argmax
    # feedback through the embedding, EOS early break) and index2char string building are
    # host-side data-dependent control flow; only the teacher-forcing (training) path runs.
    logp_full, stats = run_cvae(xin, xout, h0e_p, c0e_p, otense_p,
                                c0d_p, noise_p, tgt, params, L)

    logp = logp_full[:, :output_size]
    kl = stats[0, 0]
    entropy_loss = stats[0, 1]
    return logp, entropy_loss, kl


# ----------------------------------------------------------------------------
if __name__ == "__main__":
    vocab_size, hidden_size = 28, 32
    num_condition, condition_size = 4, 8
    latent_size, output_size = 16, 28
    T_in, T_out = 8, 8
    enc_hid = hidden_size + condition_size
    dec_hid = latent_size + condition_size

    key = jax.random.PRNGKey(0)
    k_par, k1, k2, k3, k4, k5, k6, k7, k8 = jax.random.split(key, 9)

    params = make_params(k_par, vocab_size, hidden_size, num_condition,
                         condition_size, latent_size, output_size)

    input_word = jax.random.randint(k1, (T_in, 1), 0, vocab_size, dtype=jnp.int32)
    output_word = jax.random.randint(k2, (T_out, 1), 0, vocab_size, dtype=jnp.int32)
    input_tense = jax.random.randint(k3, (1, 1), 0, num_condition, dtype=jnp.int32)
    output_tense = jax.random.randint(k4, (1, 1), 0, num_condition, dtype=jnp.int32)

    # init_tensor(): (randn(1,1,hidden), randn(1,1,hidden+condition)); batch squeezed.
    init_hidden = (jax.random.normal(k5, (1, hidden_size), dtype=jnp.float32),
                   jax.random.normal(k6, (1, enc_hid), dtype=jnp.float32))
    enc_noise = jax.random.normal(k7, (1, latent_size), dtype=jnp.float32)  # reparam noise
    dec_cell = jax.random.normal(k8, (1, dec_hid), dtype=jnp.float32)       # decoder cell init

    fwd = jax.jit(cvae_forward, static_argnames=("output_size",))
    logp, entropy_loss, kl = fwd(params, init_hidden, input_word, output_word,
                                 input_tense, output_tense, enc_noise, dec_cell,
                                 output_size=output_size)
    jax.block_until_ready((logp, entropy_loss, kl))
    assert logp.shape == (T_out, output_size)
    assert bool(jnp.all(jnp.isfinite(logp)))
    assert bool(jnp.isfinite(entropy_loss)) and bool(jnp.isfinite(kl))
    print("KERNEL_OK")
</pallas_src>

<mosaic_0001>
module attributes {stable_mosaic.version = 11 : i64} {
  func.func @cvae_kernel(%arg0: memref<8x32xf32, #tpu.memory_space<vmem>>, %arg1: memref<8x32xf32, #tpu.memory_space<vmem>>, %arg2: memref<1x128xf32, #tpu.memory_space<vmem>>, %arg3: memref<1x128xf32, #tpu.memory_space<vmem>>, %arg4: memref<1x128xf32, #tpu.memory_space<vmem>>, %arg5: memref<1x128xf32, #tpu.memory_space<vmem>>, %arg6: memref<1x128xf32, #tpu.memory_space<vmem>>, %arg7: memref<8x1xi32, #tpu.memory_space<vmem>>, %arg8: memref<32x512xf32, #tpu.memory_space<vmem>>, %arg9: memref<128x512xf32, #tpu.memory_space<vmem>>, %arg10: memref<1x512xf32, #tpu.memory_space<vmem>>, %arg11: memref<128x256xf32, #tpu.memory_space<vmem>>, %arg12: memref<1x256xf32, #tpu.memory_space<vmem>>, %arg13: memref<32x512xf32, #tpu.memory_space<vmem>>, %arg14: memref<128x512xf32, #tpu.memory_space<vmem>>, %arg15: memref<1x512xf32, #tpu.memory_space<vmem>>, %arg16: memref<128x128xf32, #tpu.memory_space<vmem>>, %arg17: memref<1x128xf32, #tpu.memory_space<vmem>>, %arg18: memref<8x128xf32, #tpu.memory_space<vmem>>, %arg19: memref<1x128xf32, #tpu.memory_space<vmem>>, %arg20: memref<8x128xf32, #tpu.memory_space<vmem>>) attributes {dimension_semantics = [], scalar_prefetch = 0 : i64, scratch_operands = 1 : i64, tpu.core_type = #tpu.core_type<tc>} {
    %c0 = arith.constant 0 : index
    %c0_0 = arith.constant 0 : index
    %0 = vector.load %arg0[%c0, %c0_0] : memref<8x32xf32, #tpu.memory_space<vmem>>, vector<8x32xf32>
    %c0_1 = arith.constant 0 : index
    %c0_2 = arith.constant 0 : index
    %1 = vector.load %arg8[%c0_1, %c0_2] : memref<32x512xf32, #tpu.memory_space<vmem>>, vector<32x512xf32>
    %cst = arith.constant dense<0.000000e+00> : vector<8x512xf32>
    %2 = tpu.matmul %0, %1, %cst {dimension_numbers = #tpu.dot_dimension_numbers<[1], [0], [0], [1], [0, 0, 1, 1], [], []>} : vector<8x32xf32>, vector<32x512xf32>, vector<8x512xf32> -> vector<8x512xf32>
    %c0_3 = arith.constant 0 : index
    %c0_4 = arith.constant 0 : index
    %3 = vector.load %arg10[%c0_3, %c0_4] : memref<1x512xf32, #tpu.memory_space<vmem>>, vector<1x512xf32>
    %4 = vector.broadcast %3 : vector<1x512xf32> to vector<8x512xf32>
    %5 = arith.addf %2, %4 : vector<8x512xf32>
    %c0_5 = arith.constant 0 : index
    %c0_6 = arith.constant 0 : index
    %6 = vector.load %arg2[%c0_5, %c0_6] : memref<1x128xf32, #tpu.memory_space<vmem>>, vector<1x128xf32>
    %c0_7 = arith.constant 0 : index
    %c0_8 = arith.constant 0 : index
    %7 = vector.load %arg3[%c0_7, %c0_8] : memref<1x128xf32, #tpu.memory_space<vmem>>, vector<1x128xf32>
    %8 = vector.extract_strided_slice %5 {offsets = [0, 0], sizes = [1, 512], strides = [1, 1]} : vector<8x512xf32> to vector<1x512xf32>
    %c0_9 = arith.constant 0 : index
    %c0_10 = arith.constant 0 : index
    %9 = vector.load %arg9[%c0_9, %c0_10] : memref<128x512xf32, #tpu.memory_space<vmem>>, vector<128x512xf32>
    %cst_11 = arith.constant dense<0.000000e+00> : vector<1x512xf32>
    %10 = tpu.matmul %6, %9, %cst_11 {dimension_numbers = #tpu.dot_dimension_numbers<[1], [0], [0], [1], [0, 0, 1, 1], [], []>} : vector<1x128xf32>, vector<128x512xf32>, vector<1x512xf32> -> vector<1x512xf32>
    %11 = arith.addf %8, %10 : vector<1x512xf32>
    %12 = vector.extract_strided_slice %11 {offsets = [0, 0], sizes = [1, 128], strides = [1, 1]} : vector<1x512xf32> to vector<1x128xf32>
    %cst_12 = arith.constant 5.000000e-01 : f32
    %13 = vector.broadcast %cst_12 : f32 to vector<1x128xf32>
    %14 = arith.mulf %13, %12 : vector<1x128xf32>
    %15 = math.tanh %14 : vector<1x128xf32>
    %cst_13 = arith.constant 1.000000e+00 : f32
    %16 = vector.broadcast %cst_13 : f32 to vector<1x128xf32>
    %17 = arith.addf %15, %16 : vector<1x128xf32>
    %cst_14 = arith.constant 5.000000e-01 : f32
    %18 = vector.broadcast %cst_14 : f32 to vector<1x128xf32>
    %19 = arith.mulf %18, %17 : vector<1x128xf32>
    %20 = vector.extract_strided_slice %11 {offsets = [0, 128], sizes = [1, 128], strides = [1, 1]} : vector<1x512xf32> to vector<1x128xf32>
    %cst_15 = arith.constant 5.000000e-01 : f32
    %21 = vector.broadcast %cst_15 : f32 to vector<1x128xf32>
    %22 = arith.mulf %21, %20 : vector<1x128xf32>
    %23 = math.tanh %22 : vector<1x128xf32>
    %cst_16 = arith.constant 1.000000e+00 : f32
    %24 = vector.broadcast %cst_16 : f32 to vector<1x128xf32>
    %25 = arith.addf %23, %24 : vector<1x128xf32>
    %cst_17 = arith.constant 5.000000e-01 : f32
    %26 = vector.broadcast %cst_17 : f32 to vector<1x128xf32>
    %27 = arith.mulf %26, %25 : vector<1x128xf32>
    %28 = vector.extract_strided_slice %11 {offsets = [0, 256], sizes = [1, 128], strides = [1, 1]} : vector<1x512xf32> to vector<1x128xf32>
    %29 = math.tanh %28 : vector<1x128xf32>
    %30 = vector.extract_strided_slice %11 {offsets = [0, 384], sizes = [1, 128], strides = [1, 1]} : vector<1x512xf32> to vector<1x128xf32>
    %cst_18 = arith.constant 5.000000e-01 : f32
    %31 = vector.broadcast %cst_18 : f32 to vector<1x128xf32>
    %32 = arith.mulf %31, %30 : vector<1x128xf32>
    %33 = math.tanh %32 : vector<1x128xf32>
    %cst_19 = arith.constant 1.000000e+00 : f32
    %34 = vector.broadcast %cst_19 : f32 to vector<1x128xf32>
    %35 = arith.addf %33, %34 : vector<1x128xf32>
    %cst_20 = arith.constant 5.000000e-01 : f32
    %36 = vector.broadcast %cst_20 : f32 to vector<1x128xf32>
    %37 = arith.mulf %36, %35 : vector<1x128xf32>
    %38 = arith.mulf %27, %7 : vector<1x128xf32>
    %39 = arith.mulf %19, %29 : vector<1x128xf32>
    %40 = arith.addf %38, %39 : vector<1x128xf32>
    %41 = math.tanh %40 : vector<1x128xf32>
    %42 = arith.mulf %37, %41 : vector<1x128xf32>
    %43 = vector.extract_strided_slice %5 {offsets = [1, 0], sizes = [1, 512], strides = [1, 1]} : vector<8x512xf32> to vector<1x512xf32>
    %c0_21 = arith.constant 0 : index
    %c0_22 = arith.constant 0 : index
    %44 = vector.load %arg9[%c0_21, %c0_22] : memref<128x512xf32, #tpu.memory_space<vmem>>, vector<128x512xf32>
    %cst_23 = arith.constant dense<0.000000e+00> : vector<1x512xf32>
    %45 = tpu.matmul %42, %44, %cst_23 {dimension_numbers = #tpu.dot_dimension_numbers<[1], [0], [0], [1], [0, 0, 1, 1], [], []>} : vector<1x128xf32>, vector<128x512xf32>, vector<1x512xf32> -> vector<1x512xf32>
    %46 = arith.addf %43, %45 : vector<1x512xf32>
    %47 = vector.extract_strided_slice %46 {offsets = [0, 0], sizes = [1, 128], strides = [1, 1]} : vector<1x512xf32> to vector<1x128xf32>
    %cst_24 = arith.constant 5.000000e-01 : f32
    %48 = vector.broadcast %cst_24 : f32 to vector<1x128xf32>
    %49 = arith.mulf %48, %47 : vector<1x128xf32>
    %50 = math.tanh %49 : vector<1x128xf32>
    %cst_25 = arith.constant 1.000000e+00 : f32
    %51 = vector.broadcast %cst_25 : f32 to vector<1x128xf32>
    %52 = arith.addf %50, %51 : vector<1x128xf32>
    %cst_26 = arith.constant 5.000000e-01 : f32
    %53 = vector.broadcast %cst_26 : f32 to vector<1x128xf32>
    %54 = arith.mulf %53, %52 : vector<1x128xf32>
    %55 = vector.extract_strided_slice %46 {offsets = [0, 128], sizes = [1, 128], strides = [1, 1]} : vector<1x512xf32> to vector<1x128xf32>
    %cst_27 = arith.constant 5.000000e-01 : f32
    %56 = vector.broadcast %cst_27 : f32 to vector<1x128xf32>
    %57 = arith.mulf %56, %55 : vector<1x128xf32>
    %58 = math.tanh %57 : vector<1x128xf32>
    %cst_28 = arith.constant 1.000000e+00 : f32
    %59 = vector.broadcast %cst_28 : f32 to vector<1x128xf32>
    %60 = arith.addf %58, %59 : vector<1x128xf32>
    %cst_29 = arith.constant 5.000000e-01 : f32
    %61 = vector.broadcast %cst_29 : f32 to vector<1x128xf32>
    %62 = arith.mulf %61, %60 : vector<1x128xf32>
    %63 = vector.extract_strided_slice %46 {offsets = [0, 256], sizes = [1, 128], strides = [1, 1]} : vector<1x512xf32> to vector<1x128xf32>
    %64 = math.tanh %63 : vector<1x128xf32>
    %65 = vector.extract_strided_slice %46 {offsets = [0, 384], sizes = [1, 128], strides = [1, 1]} : vector<1x512xf32> to vector<1x128xf32>
    %cst_30 = arith.constant 5.000000e-01 : f32
    %66 = vector.broadcast %cst_30 : f32 to vector<1x128xf32>
    %67 = arith.mulf %66, %65 : vector<1x128xf32>
    %68 = math.tanh %67 : vector<1x128xf32>
    %cst_31 = arith.constant 1.000000e+00 : f32
    %69 = vector.broadcast %cst_31 : f32 to vector<1x128xf32>
    %70 = arith.addf %68, %69 : vector<1x128xf32>
    %cst_32 = arith.constant 5.000000e-01 : f32
    %71 = vector.broadcast %cst_32 : f32 to vector<1x128xf32>
    %72 = arith.mulf %71, %70 : vector<1x128xf32>
    %73 = arith.mulf %62, %40 : vector<1x128xf32>
    %74 = arith.mulf %54, %64 : vector<1x128xf32>
    %75 = arith.addf %73, %74 : vector<1x128xf32>
    %76 = math.tanh %75 : vector<1x128xf32>
    %77 = arith.mulf %72, %76 : vector<1x128xf32>
    %78 = vector.extract_strided_slice %5 {offsets = [2, 0], sizes = [1, 512], strides = [1, 1]} : vector<8x512xf32> to vector<1x512xf32>
    %c0_33 = arith.constant 0 : index
    %c0_34 = arith.constant 0 : index
    %79 = vector.load %arg9[%c0_33, %c0_34] : memref<128x512xf32, #tpu.memory_space<vmem>>, vector<128x512xf32>
    %cst_35 = arith.constant dense<0.000000e+00> : vector<1x512xf32>
    %80 = tpu.matmul %77, %79, %cst_35 {dimension_numbers = #tpu.dot_dimension_numbers<[1], [0], [0], [1], [0, 0, 1, 1], [], []>} : vector<1x128xf32>, vector<128x512xf32>, vector<1x512xf32> -> vector<1x512xf32>
    %81 = arith.addf %78, %80 : vector<1x512xf32>
    %82 = vector.extract_strided_slice %81 {offsets = [0, 0], sizes = [1, 128], strides = [1, 1]} : vector<1x512xf32> to vector<1x128xf32>
    %cst_36 = arith.constant 5.000000e-01 : f32
    %83 = vector.broadcast %cst_36 : f32 to vector<1x128xf32>
    %84 = arith.mulf %83, %82 : vector<1x128xf32>
    %85 = math.tanh %84 : vector<1x128xf32>
    %cst_37 = arith.constant 1.000000e+00 : f32
    %86 = vector.broadcast %cst_37 : f32 to vector<1x128xf32>
    %87 = arith.addf %85, %86 : vector<1x128xf32>
    %cst_38 = arith.constant 5.000000e-01 : f32
    %88 = vector.broadcast %cst_38 : f32 to vector<1x128xf32>
    %89 = arith.mulf %88, %87 : vector<1x128xf32>
    %90 = vector.extract_strided_slice %81 {offsets = [0, 128], sizes = [1, 128], strides = [1, 1]} : vector<1x512xf32> to vector<1x128xf32>
    %cst_39 = arith.constant 5.000000e-01 : f32
    %91 = vector.broadcast %cst_39 : f32 to vector<1x128xf32>
    %92 = arith.mulf %91, %90 : vector<1x128xf32>
    %93 = math.tanh %92 : vector<1x128xf32>
    %cst_40 = arith.constant 1.000000e+00 : f32
    %94 = vector.broadcast %cst_40 : f32 to vector<1x128xf32>
    %95 = arith.addf %93, %94 : vector<1x128xf32>
    %cst_41 = arith.constant 5.000000e-01 : f32
    %96 = vector.broadcast %cst_41 : f32 to vector<1x128xf32>
    %97 = arith.mulf %96, %95 : vector<1x128xf32>
    %98 = vector.extract_strided_slice %81 {offsets = [0, 256], sizes = [1, 128], strides = [1, 1]} : vector<1x512xf32> to vector<1x128xf32>
    %99 = math.tanh %98 : vector<1x128xf32>
    %100 = vector.extract_strided_slice %81 {offsets = [0, 384], sizes = [1, 128], strides = [1, 1]} : vector<1x512xf32> to vector<1x128xf32>
    %cst_42 = arith.constant 5.000000e-01 : f32
    %101 = vector.broadcast %cst_42 : f32 to vector<1x128xf32>
    %102 = arith.mulf %101, %100 : vector<1x128xf32>
    %103 = math.tanh %102 : vector<1x128xf32>
    %cst_43 = arith.constant 1.000000e+00 : f32
    %104 = vector.broadcast %cst_43 : f32 to vector<1x128xf32>
    %105 = arith.addf %103, %104 : vector<1x128xf32>
    %cst_44 = arith.constant 5.000000e-01 : f32
    %106 = vector.broadcast %cst_44 : f32 to vector<1x128xf32>
    %107 = arith.mulf %106, %105 : vector<1x128xf32>
    %108 = arith.mulf %97, %75 : vector<1x128xf32>
    %109 = arith.mulf %89, %99 : vector<1x128xf32>
    %110 = arith.addf %108, %109 : vector<1x128xf32>
    %111 = math.tanh %110 : vector<1x128xf32>
    %112 = arith.mulf %107, %111 : vector<1x128xf32>
    %113 = vector.extract_strided_slice %5 {offsets = [3, 0], sizes = [1, 512], strides = [1, 1]} : vector<8x512xf32> to vector<1x512xf32>
    %c0_45 = arith.constant 0 : index
    %c0_46 = arith.constant 0 : index
    %114 = vector.load %arg9[%c0_45, %c0_46] : memref<128x512xf32, #tpu.memory_space<vmem>>, vector<128x512xf32>
    %cst_47 = arith.constant dense<0.000000e+00> : vector<1x512xf32>
    %115 = tpu.matmul %112, %114, %cst_47 {dimension_numbers = #tpu.dot_dimension_numbers<[1], [0], [0], [1], [0, 0, 1, 1], [], []>} : vector<1x128xf32>, vector<128x512xf32>, vector<1x512xf32> -> vector<1x512xf32>
    %116 = arith.addf %113, %115 : vector<1x512xf32>
    %117 = vector.extract_strided_slice %116 {offsets = [0, 0], sizes = [1, 128], strides = [1, 1]} : vector<1x512xf32> to vector<1x128xf32>
    %cst_48 = arith.constant 5.000000e-01 : f32
    %118 = vector.broadcast %cst_48 : f32 to vector<1x128xf32>
    %119 = arith.mulf %118, %117 : vector<1x128xf32>
    %120 = math.tanh %119 : vector<1x128xf32>
    %cst_49 = arith.constant 1.000000e+00 : f32
    %121 = vector.broadcast %cst_49 : f32 to vector<1x128xf32>
    %122 = arith.addf %120, %121 : vector<1x128xf32>
    %cst_50 = arith.constant 5.000000e-01 : f32
    %123 = vector.broadcast %cst_50 : f32 to vector<1x128xf32>
    %124 = arith.mulf %123, %122 : vector<1x128xf32>
    %125 = vector.extract_strided_slice %116 {offsets = [0, 128], sizes = [1, 128], strides = [1, 1]} : vector<1x512xf32> to vector<1x128xf32>
    %cst_51 = arith.constant 5.000000e-01 : f32
    %126 = vector.broadcast %cst_51 : f32 to vector<1x128xf32>
    %127 = arith.mulf %126, %125 : vector<1x128xf32>
    %128 = math.tanh %127 : vector<1x128xf32>
    %cst_52 = arith.constant 1.000000e+00 : f32
    %129 = vector.broadcast %cst_52 : f32 to vector<1x128xf32>
    %130 = arith.addf %128, %129 : vector<1x128xf32>
    %cst_53 = arith.constant 5.000000e-01 : f32
    %131 = vector.broadcast %cst_53 : f32 to vector<1x128xf32>
    %132 = arith.mulf %131, %130 : vector<1x128xf32>
    %133 = vector.extract_strided_slice %116 {offsets = [0, 256], sizes = [1, 128], strides = [1, 1]} : vector<1x512xf32> to vector<1x128xf32>
    %134 = math.tanh %133 : vector<1x128xf32>
    %135 = vector.extract_strided_slice %116 {offsets = [0, 384], sizes = [1, 128], strides = [1, 1]} : vector<1x512xf32> to vector<1x128xf32>
    %cst_54 = arith.constant 5.000000e-01 : f32
    %136 = vector.broadcast %cst_54 : f32 to vector<1x128xf32>
    %137 = arith.mulf %136, %135 : vector<1x128xf32>
    %138 = math.tanh %137 : vector<1x128xf32>
    %cst_55 = arith.constant 1.000000e+00 : f32
    %139 = vector.broadcast %cst_55 : f32 to vector<1x128xf32>
    %140 = arith.addf %138, %139 : vector<1x128xf32>
    %cst_56 = arith.constant 5.000000e-01 : f32
    %141 = vector.broadcast %cst_56 : f32 to vector<1x128xf32>
    %142 = arith.mulf %141, %140 : vector<1x128xf32>
    %143 = arith.mulf %132, %110 : vector<1x128xf32>
    %144 = arith.mulf %124, %134 : vector<1x128xf32>
    %145 = arith.addf %143, %144 : vector<1x128xf32>
    %146 = math.tanh %145 : vector<1x128xf32>
    %147 = arith.mulf %142, %146 : vector<1x128xf32>
    %148 = vector.extract_strided_slice %5 {offsets = [4, 0], sizes = [1, 512], strides = [1, 1]} : vector<8x512xf32> to vector<1x512xf32>
    %c0_57 = arith.constant 0 : index
    %c0_58 = arith.constant 0 : index
    %149 = vector.load %arg9[%c0_57, %c0_58] : memref<128x512xf32, #tpu.memory_space<vmem>>, vector<128x512xf32>
    %cst_59 = arith.constant dense<0.000000e+00> : vector<1x512xf32>
    %150 = tpu.matmul %147, %149, %cst_59 {dimension_numbers = #tpu.dot_dimension_numbers<[1], [0], [0], [1], [0, 0, 1, 1], [], []>} : vector<1x128xf32>, vector<128x512xf32>, vector<1x512xf32> -> vector<1x512xf32>
    %151 = arith.addf %148, %150 : vector<1x512xf32>
    %152 = vector.extract_strided_slice %151 {offsets = [0, 0], sizes = [1, 128], strides = [1, 1]} : vector<1x512xf32> to vector<1x128xf32>
    %cst_60 = arith.constant 5.000000e-01 : f32
    %153 = vector.broadcast %cst_60 : f32 to vector<1x128xf32>
    %154 = arith.mulf %153, %152 : vector<1x128xf32>
    %155 = math.tanh %154 : vector<1x128xf32>
    %cst_61 = arith.constant 1.000000e+00 : f32
    %156 = vector.broadcast %cst_61 : f32 to vector<1x128xf32>
    %157 = arith.addf %155, %156 : vector<1x128xf32>
    %cst_62 = arith.constant 5.000000e-01 : f32
    %158 = vector.broadcast %cst_62 : f32 to vector<1x128xf32>
    %159 = arith.mulf %158, %157 : vector<1x128xf32>
    %160 = vector.extract_strided_slice %151 {offsets = [0, 128], sizes = [1, 128], strides = [1, 1]} : vector<1x512xf32> to vector<1x128xf32>
    %cst_63 = arith.constant 5.000000e-01 : f32
    %161 = vector.broadcast %cst_63 : f32 to vector<1x128xf32>
    %162 = arith.mulf %161, %160 : vector<1x128xf32>
    %163 = math.tanh %162 : vector<1x128xf32>
    %cst_64 = arith.constant 1.000000e+00 : f32
    %164 = vector.broadcast %cst_64 : f32 to vector<1x128xf32>
    %165 = arith.addf %163, %164 : vector<1x128xf32>
    %cst_65 = arith.constant 5.000000e-01 : f32
    %166 = vector.broadcast %cst_65 : f32 to vector<1x128xf32>
    %167 = arith.mulf %166, %165 : vector<1x128xf32>
    %168 = vector.extract_strided_slice %151 {offsets = [0, 256], sizes = [1, 128], strides = [1, 1]} : vector<1x512xf32> to vector<1x128xf32>
    %169 = math.tanh %168 : vector<1x128xf32>
    %170 = vector.extract_strided_slice %151 {offsets = [0, 384], sizes = [1, 128], strides = [1, 1]} : vector<1x512xf32> to vector<1x128xf32>
    %cst_66 = arith.constant 5.000000e-01 : f32
    %171 = vector.broadcast %cst_66 : f32 to vector<1x128xf32>
    %172 = arith.mulf %171, %170 : vector<1x128xf32>
    %173 = math.tanh %172 : vector<1x128xf32>
    %cst_67 = arith.constant 1.000000e+00 : f32
    %174 = vector.broadcast %cst_67 : f32 to vector<1x128xf32>
    %175 = arith.addf %173, %174 : vector<1x128xf32>
    %cst_68 = arith.constant 5.000000e-01 : f32
    %176 = vector.broadcast %cst_68 : f32 to vector<1x128xf32>
    %177 = arith.mulf %176, %175 : vector<1x128xf32>
    %178 = arith.mulf %167, %145 : vector<1x128xf32>
    %179 = arith.mulf %159, %169 : vector<1x128xf32>
    %180 = arith.addf %178, %179 : vector<1x128xf32>
    %181 = math.tanh %180 : vector<1x128xf32>
    %182 = arith.mulf %177, %181 : vector<1x128xf32>
    %183 = vector.extract_strided_slice %5 {offsets = [5, 0], sizes = [1, 512], strides = [1, 1]} : vector<8x512xf32> to vector<1x512xf32>
    %c0_69 = arith.constant 0 : index
    %c0_70 = arith.constant 0 : index
    %184 = vector.load %arg9[%c0_69, %c0_70] : memref<128x512xf32, #tpu.memory_space<vmem>>, vector<128x512xf32>
    %cst_71 = arith.constant dense<0.000000e+00> : vector<1x512xf32>
    %185 = tpu.matmul %182, %184, %cst_71 {dimension_numbers = #tpu.dot_dimension_numbers<[1], [0], [0], [1], [0, 0, 1, 1], [], []>} : vector<1x128xf32>, vector<128x512xf32>, vector<1x512xf32> -> vector<1x512xf32>
    %186 = arith.addf %183, %185 : vector<1x512xf32>
    %187 = vector.extract_strided_slice %186 {offsets = [0, 0], sizes = [1, 128], strides = [1, 1]} : vector<1x512xf32> to vector<1x128xf32>
    %cst_72 = arith.constant 5.000000e-01 : f32
    %188 = vector.broadcast %cst_72 : f32 to vector<1x128xf32>
    %189 = arith.mulf %188, %187 : vector<1x128xf32>
    %190 = math.tanh %189 : vector<1x128xf32>
    %cst_73 = arith.constant 1.000000e+00 : f32
    %191 = vector.broadcast %cst_73 : f32 to vector<1x128xf32>
    %192 = arith.addf %190, %191 : vector<1x128xf32>
    %cst_74 = arith.constant 5.000000e-01 : f32
    %193 = vector.broadcast %cst_74 : f32 to vector<1x128xf32>
    %194 = arith.mulf %193, %192 : vector<1x128xf32>
    %195 = vector.extract_strided_slice %186 {offsets = [0, 128], sizes = [1, 128], strides = [1, 1]} : vector<1x512xf32> to vector<1x128xf32>
    %cst_75 = arith.constant 5.000000e-01 : f32
    %196 = vector.broadcast %cst_75 : f32 to vector<1x128xf32>
    %197 = arith.mulf %196, %195 : vector<1x128xf32>
    %198 = math.tanh %197 : vector<1x128xf32>
    %cst_76 = arith.constant 1.000000e+00 : f32
    %199 = vector.broadcast %cst_76 : f32 to vector<1x128xf32>
    %200 = arith.addf %198, %199 : vector<1x128xf32>
    %cst_77 = arith.constant 5.000000e-01 : f32
    %201 = vector.broadcast %cst_77 : f32 to vector<1x128xf32>
    %202 = arith.mulf %201, %200 : vector<1x128xf32>
    %203 = vector.extract_strided_slice %186 {offsets = [0, 256], sizes = [1, 128], strides = [1, 1]} : vector<1x512xf32> to vector<1x128xf32>
    %204 = math.tanh %203 : vector<1x128xf32>
    %205 = vector.extract_strided_slice %186 {offsets = [0, 384], sizes = [1, 128], strides = [1, 1]} : vector<1x512xf32> to vector<1x128xf32>
    %cst_78 = arith.constant 5.000000e-01 : f32
    %206 = vector.broadcast %cst_78 : f32 to vector<1x128xf32>
    %207 = arith.mulf %206, %205 : vector<1x128xf32>
    %208 = math.tanh %207 : vector<1x128xf32>
    %cst_79 = arith.constant 1.000000e+00 : f32
    %209 = vector.broadcast %cst_79 : f32 to vector<1x128xf32>
    %210 = arith.addf %208, %209 : vector<1x128xf32>
    %cst_80 = arith.constant 5.000000e-01 : f32
    %211 = vector.broadcast %cst_80 : f32 to vector<1x128xf32>
    %212 = arith.mulf %211, %210 : vector<1x128xf32>
    %213 = arith.mulf %202, %180 : vector<1x128xf32>
    %214 = arith.mulf %194, %204 : vector<1x128xf32>
    %215 = arith.addf %213, %214 : vector<1x128xf32>
    %216 = math.tanh %215 : vector<1x128xf32>
    %217 = arith.mulf %212, %216 : vector<1x128xf32>
    %218 = vector.extract_strided_slice %5 {offsets = [6, 0], sizes = [1, 512], strides = [1, 1]} : vector<8x512xf32> to vector<1x512xf32>
    %c0_81 = arith.constant 0 : index
    %c0_82 = arith.constant 0 : index
    %219 = vector.load %arg9[%c0_81, %c0_82] : memref<128x512xf32, #tpu.memory_space<vmem>>, vector<128x512xf32>
    %cst_83 = arith.constant dense<0.000000e+00> : vector<1x512xf32>
    %220 = tpu.matmul %217, %219, %cst_83 {dimension_numbers = #tpu.dot_dimension_numbers<[1], [0], [0], [1], [0, 0, 1, 1], [], []>} : vector<1x128xf32>, vector<128x512xf32>, vector<1x512xf32> -> vector<1x512xf32>
    %221 = arith.addf %218, %220 : vector<1x512xf32>
    %222 = vector.extract_strided_slice %221 {offsets = [0, 0], sizes = [1, 128], strides = [1, 1]} : vector<1x512xf32> to vector<1x128xf32>
    %cst_84 = arith.constant 5.000000e-01 : f32
    %223 = vector.broadcast %cst_84 : f32 to vector<1x128xf32>
    %224 = arith.mulf %223, %222 : vector<1x128xf32>
    %225 = math.tanh %224 : vector<1x128xf32>
    %cst_85 = arith.constant 1.000000e+00 : f32
    %226 = vector.broadcast %cst_85 : f32 to vector<1x128xf32>
    %227 = arith.addf %225, %226 : vector<1x128xf32>
    %cst_86 = arith.constant 5.000000e-01 : f32
    %228 = vector.broadcast %cst_86 : f32 to vector<1x128xf32>
    %229 = arith.mulf %228, %227 : vector<1x128xf32>
    %230 = vector.extract_strided_slice %221 {offsets = [0, 128], sizes = [1, 128], strides = [1, 1]} : vector<1x512xf32> to vector<1x128xf32>
    %cst_87 = arith.constant 5.000000e-01 : f32
    %231 = vector.broadcast %cst_87 : f32 to vector<1x128xf32>
    %232 = arith.mulf %231, %230 : vector<1x128xf32>
    %233 = math.tanh %232 : vector<1x128xf32>
    %cst_88 = arith.constant 1.000000e+00 : f32
    %234 = vector.broadcast %cst_88 : f32 to vector<1x128xf32>
    %235 = arith.addf %233, %234 : vector<1x128xf32>
    %cst_89 = arith.constant 5.000000e-01 : f32
    %236 = vector.broadcast %cst_89 : f32 to vector<1x128xf32>
    %237 = arith.mulf %236, %235 : vector<1x128xf32>
    %238 = vector.extract_strided_slice %221 {offsets = [0, 256], sizes = [1, 128], strides = [1, 1]} : vector<1x512xf32> to vector<1x128xf32>
    %239 = math.tanh %238 : vector<1x128xf32>
    %240 = vector.extract_strided_slice %221 {offsets = [0, 384], sizes = [1, 128], strides = [1, 1]} : vector<1x512xf32> to vector<1x128xf32>
    %cst_90 = arith.constant 5.000000e-01 : f32
    %241 = vector.broadcast %cst_90 : f32 to vector<1x128xf32>
    %242 = arith.mulf %241, %240 : vector<1x128xf32>
    %243 = math.tanh %242 : vector<1x128xf32>
    %cst_91 = arith.constant 1.000000e+00 : f32
    %244 = vector.broadcast %cst_91 : f32 to vector<1x128xf32>
    %245 = arith.addf %243, %244 : vector<1x128xf32>
    %cst_92 = arith.constant 5.000000e-01 : f32
    %246 = vector.broadcast %cst_92 : f32 to vector<1x128xf32>
    %247 = arith.mulf %246, %245 : vector<1x128xf32>
    %248 = arith.mulf %237, %215 : vector<1x128xf32>
    %249 = arith.mulf %229, %239 : vector<1x128xf32>
    %250 = arith.addf %248, %249 : vector<1x128xf32>
    %251 = math.tanh %250 : vector<1x128xf32>
    %252 = arith.mulf %247, %251 : vector<1x128xf32>
    %253 = vector.extract_strided_slice %5 {offsets = [7, 0], sizes = [1, 512], strides = [1, 1]} : vector<8x512xf32> to vector<1x512xf32>
    %c0_93 = arith.constant 0 : index
    %c0_94 = arith.constant 0 : index
    %254 = vector.load %arg9[%c0_93, %c0_94] : memref<128x512xf32, #tpu.memory_space<vmem>>, vector<128x512xf32>
    %cst_95 = arith.constant dense<0.000000e+00> : vector<1x512xf32>
    %255 = tpu.matmul %252, %254, %cst_95 {dimension_numbers = #tpu.dot_dimension_numbers<[1], [0], [0], [1], [0, 0, 1, 1], [], []>} : vector<1x128xf32>, vector<128x512xf32>, vector<1x512xf32> -> vector<1x512xf32>
    %256 = arith.addf %253, %255 : vector<1x512xf32>
    %257 = vector.extract_strided_slice %256 {offsets = [0, 0], sizes = [1, 128], strides = [1, 1]} : vector<1x512xf32> to vector<1x128xf32>
    %cst_96 = arith.constant 5.000000e-01 : f32
    %258 = vector.broadcast %cst_96 : f32 to vector<1x128xf32>
    %259 = arith.mulf %258, %257 : vector<1x128xf32>
    %260 = math.tanh %259 : vector<1x128xf32>
    %cst_97 = arith.constant 1.000000e+00 : f32
    %261 = vector.broadcast %cst_97 : f32 to vector<1x128xf32>
    %262 = arith.addf %260, %261 : vector<1x128xf32>
    %cst_98 = arith.constant 5.000000e-01 : f32
    %263 = vector.broadcast %cst_98 : f32 to vector<1x128xf32>
    %264 = arith.mulf %263, %262 : vector<1x128xf32>
    %265 = vector.extract_strided_slice %256 {offsets = [0, 128], sizes = [1, 128], strides = [1, 1]} : vector<1x512xf32> to vector<1x128xf32>
    %cst_99 = arith.constant 5.000000e-01 : f32
    %266 = vector.broadcast %cst_99 : f32 to vector<1x128xf32>
    %267 = arith.mulf %266, %265 : vector<1x128xf32>
    %268 = math.tanh %267 : vector<1x128xf32>
    %cst_100 = arith.constant 1.000000e+00 : f32
    %269 = vector.broadcast %cst_100 : f32 to vector<1x128xf32>
    %270 = arith.addf %268, %269 : vector<1x128xf32>
    %cst_101 = arith.constant 5.000000e-01 : f32
    %271 = vector.broadcast %cst_101 : f32 to vector<1x128xf32>
    %272 = arith.mulf %271, %270 : vector<1x128xf32>
    %273 = vector.extract_strided_slice %256 {offsets = [0, 256], sizes = [1, 128], strides = [1, 1]} : vector<1x512xf32> to vector<1x128xf32>
    %274 = math.tanh %273 : vector<1x128xf32>
    %275 = vector.extract_strided_slice %256 {offsets = [0, 384], sizes = [1, 128], strides = [1, 1]} : vector<1x512xf32> to vector<1x128xf32>
    %cst_102 = arith.constant 5.000000e-01 : f32
    %276 = vector.broadcast %cst_102 : f32 to vector<1x128xf32>
    %277 = arith.mulf %276, %275 : vector<1x128xf32>
    %278 = math.tanh %277 : vector<1x128xf32>
    %cst_103 = arith.constant 1.000000e+00 : f32
    %279 = vector.broadcast %cst_103 : f32 to vector<1x128xf32>
    %280 = arith.addf %278, %279 : vector<1x128xf32>
    %cst_104 = arith.constant 5.000000e-01 : f32
    %281 = vector.broadcast %cst_104 : f32 to vector<1x128xf32>
    %282 = arith.mulf %281, %280 : vector<1x128xf32>
    %283 = arith.mulf %272, %250 : vector<1x128xf32>
    %284 = arith.mulf %264, %274 : vector<1x128xf32>
    %285 = arith.addf %283, %284 : vector<1x128xf32>
    %286 = math.tanh %285 : vector<1x128xf32>
    %287 = arith.mulf %282, %286 : vector<1x128xf32>
    %c0_105 = arith.constant 0 : index
    %c0_106 = arith.constant 0 : index
    %288 = vector.load %arg11[%c0_105, %c0_106] : memref<128x256xf32, #tpu.memory_space<vmem>>, vector<128x256xf32>
    %cst_107 = arith.constant dense<0.000000e+00> : vector<1x256xf32>
    %289 = tpu.matmul %287, %288, %cst_107 {dimension_numbers = #tpu.dot_dimension_numbers<[1], [0], [0], [1], [0, 0, 1, 1], [], []>} : vector<1x128xf32>, vector<128x256xf32>, vector<1x256xf32> -> vector<1x256xf32>
    %c0_108 = arith.constant 0 : index
    %c0_109 = arith.constant 0 : index
    %290 = vector.load %arg12[%c0_108, %c0_109] : memref<1x256xf32, #tpu.memory_space<vmem>>, vector<1x256xf32>
    %291 = arith.addf %289, %290 : vector<1x256xf32>
    %292 = vector.extract_strided_slice %291 {offsets = [0, 0], sizes = [1, 128], strides = [1, 1]} : vector<1x256xf32> to vector<1x128xf32>
    %293 = vector.extract_strided_slice %291 {offsets = [0, 128], sizes = [1, 128], strides = [1, 1]} : vector<1x256xf32> to vector<1x128xf32>
    %c0_110 = arith.constant 0 : index
    %c0_111 = arith.constant 0 : index
    %294 = vector.load %arg6[%c0_110, %c0_111] : memref<1x128xf32, #tpu.memory_space<vmem>>, vector<1x128xf32>
    %cst_112 = arith.constant 5.000000e-01 : f32
    %295 = vector.broadcast %cst_112 : f32 to vector<1x128xf32>
    %296 = arith.mulf %295, %293 : vector<1x128xf32>
    %297 = math.exp %296 : vector<1x128xf32>
    %298 = arith.mulf %294, %297 : vector<1x128xf32>
    %299 = arith.addf %292, %298 : vector<1x128xf32>
    %300 = tpu.iota {dimensions = array<i32: 1>} : vector<1x128xi32>
    %c16_i32 = arith.constant 16 : i32
    %301 = vector.broadcast %c16_i32 : i32 to vector<1x128xi32>
    %302 = arith.cmpi slt, %300, %301 : vector<1x128xi32>
    %303 = arith.mulf %292, %292 : vector<1x128xf32>
    %304 = vector.shape_cast %303 : vector<1x128xf32> to vector<1x1x128xf32>
    %cst_113 = arith.constant dense<0.000000e+00> : vector<1xf32>
    %305 = vector.multi_reduction <add>, %304, %cst_113 [1, 2] : vector<1x1x128xf32> to vector<1xf32>
    %306 = vector.shape_cast %305 : vector<1xf32> to vector<1x1x1xf32>
    %307 = vector.extract %306[0, 0, 0] : f32 from vector<1x1x1xf32>
    %308 = vector.broadcast %307 : f32 to vector<1x1xf32>
    %cst_114 = arith.constant 1.000000e+00 : f32
    %309 = vector.broadcast %cst_114 : f32 to vector<1x128xf32>
    %310 = arith.addf %293, %309 : vector<1x128xf32>
    %cst_115 = arith.constant 0.000000e+00 : f32
    %311 = vector.broadcast %cst_115 : f32 to vector<1x128xf32>
    %312 = arith.select %302, %310, %311 : vector<1x128xi1>, vector<1x128xf32>
    %313 = vector.shape_cast %312 : vector<1x128xf32> to vector<1x1x128xf32>
    %cst_116 = arith.constant dense<0.000000e+00> : vector<1xf32>
    %314 = vector.multi_reduction <add>, %313, %cst_116 [1, 2] : vector<1x1x128xf32> to vector<1xf32>
    %315 = vector.shape_cast %314 : vector<1xf32> to vector<1x1x1xf32>
    %316 = vector.extract %315[0, 0, 0] : f32 from vector<1x1x1xf32>
    %317 = vector.broadcast %316 : f32 to vector<1x1xf32>
    %cst_117 = arith.constant 0.000000e+00 : f32
    %318 = vector.broadcast %cst_117 : f32 to vector<1x1xf32>
    %319 = arith.subf %318, %317 : vector<1x1xf32>
    %320 = math.exp %293 : vector<1x128xf32>
    %321 = vector.broadcast %308 : vector<1x1xf32> to vector<1x128xf32>
    %322 = arith.addf %320, %321 : vector<1x128xf32>
    %cst_118 = arith.constant 0.000000e+00 : f32
    %323 = vector.broadcast %cst_118 : f32 to vector<1x128xf32>
    %324 = arith.select %302, %322, %323 : vector<1x128xi1>, vector<1x128xf32>
    %325 = vector.shape_cast %324 : vector<1x128xf32> to vector<1x1x128xf32>
    %cst_119 = arith.constant dense<0.000000e+00> : vector<1xf32>
    %326 = vector.multi_reduction <add>, %325, %cst_119 [1, 2] : vector<1x1x128xf32> to vector<1xf32>
    %327 = vector.shape_cast %326 : vector<1xf32> to vector<1x1x1xf32>
    %328 = vector.extract %327[0, 0, 0] : f32 from vector<1x1x1xf32>
    %329 = vector.broadcast %328 : f32 to vector<1x1xf32>
    %330 = arith.addf %319, %329 : vector<1x1xf32>
    %cst_120 = arith.constant 5.000000e-01 : f32
    %331 = vector.broadcast %cst_120 : f32 to vector<1x1xf32>
    %332 = arith.mulf %331, %330 : vector<1x1xf32>
    %c0_121 = arith.constant 0 : index
    %c0_122 = arith.constant 0 : index
    %333 = vector.load %arg4[%c0_121, %c0_122] : memref<1x128xf32, #tpu.memory_space<vmem>>, vector<1x128xf32>
    %334 = arith.addf %299, %333 : vector<1x128xf32>
    %c0_123 = arith.constant 0 : index
    %c0_124 = arith.constant 0 : index
    %335 = vector.load %arg1[%c0_123, %c0_124] : memref<8x32xf32, #tpu.memory_space<vmem>>, vector<8x32xf32>
    %c0_125 = arith.constant 0 : index
    %c0_126 = arith.constant 0 : index
    %336 = vector.load %arg13[%c0_125, %c0_126] : memref<32x512xf32, #tpu.memory_space<vmem>>, vector<32x512xf32>
    %cst_127 = arith.constant dense<0.000000e+00> : vector<8x512xf32>
    %337 = tpu.matmul %335, %336, %cst_127 {dimension_numbers = #tpu.dot_dimension_numbers<[1], [0], [0], [1], [0, 0, 1, 1], [], []>} : vector<8x32xf32>, vector<32x512xf32>, vector<8x512xf32> -> vector<8x512xf32>
    %c0_128 = arith.constant 0 : index
    %c0_129 = arith.constant 0 : index
    %338 = vector.load %arg15[%c0_128, %c0_129] : memref<1x512xf32, #tpu.memory_space<vmem>>, vector<1x512xf32>
    %339 = vector.broadcast %338 : vector<1x512xf32> to vector<8x512xf32>
    %340 = arith.addf %337, %339 : vector<8x512xf32>
    %c0_130 = arith.constant 0 : index
    %c0_131 = arith.constant 0 : index
    %341 = vector.load %arg5[%c0_130, %c0_131] : memref<1x128xf32, #tpu.memory_space<vmem>>, vector<1x128xf32>
    %342 = vector.extract_strided_slice %340 {offsets = [0, 0], sizes = [1, 512], strides = [1, 1]} : vector<8x512xf32> to vector<1x512xf32>
    %c0_132 = arith.constant 0 : index
    %c0_133 = arith.constant 0 : index
    %343 = vector.load %arg14[%c0_132, %c0_133] : memref<128x512xf32, #tpu.memory_space<vmem>>, vector<128x512xf32>
    %cst_134 = arith.constant dense<0.000000e+00> : vector<1x512xf32>
    %344 = tpu.matmul %334, %343, %cst_134 {dimension_numbers = #tpu.dot_dimension_numbers<[1], [0], [0], [1], [0, 0, 1, 1], [], []>} : vector<1x128xf32>, vector<128x512xf32>, vector<1x512xf32> -> vector<1x512xf32>
    %345 = arith.addf %342, %344 : vector<1x512xf32>
    %346 = vector.extract_strided_slice %345 {offsets = [0, 0], sizes = [1, 128], strides = [1, 1]} : vector<1x512xf32> to vector<1x128xf32>
    %cst_135 = arith.constant 5.000000e-01 : f32
    %347 = vector.broadcast %cst_135 : f32 to vector<1x128xf32>
    %348 = arith.mulf %347, %346 : vector<1x128xf32>
    %349 = math.tanh %348 : vector<1x128xf32>
    %cst_136 = arith.constant 1.000000e+00 : f32
    %350 = vector.broadcast %cst_136 : f32 to vector<1x128xf32>
    %351 = arith.addf %349, %350 : vector<1x128xf32>
    %cst_137 = arith.constant 5.000000e-01 : f32
    %352 = vector.broadcast %cst_137 : f32 to vector<1x128xf32>
    %353 = arith.mulf %352, %351 : vector<1x128xf32>
    %354 = vector.extract_strided_slice %345 {offsets = [0, 128], sizes = [1, 128], strides = [1, 1]} : vector<1x512xf32> to vector<1x128xf32>
    %cst_138 = arith.constant 5.000000e-01 : f32
    %355 = vector.broadcast %cst_138 : f32 to vector<1x128xf32>
    %356 = arith.mulf %355, %354 : vector<1x128xf32>
    %357 = math.tanh %356 : vector<1x128xf32>
    %cst_139 = arith.constant 1.000000e+00 : f32
    %358 = vector.broadcast %cst_139 : f32 to vector<1x128xf32>
    %359 = arith.addf %357, %358 : vector<1x128xf32>
    %cst_140 = arith.constant 5.000000e-01 : f32
    %360 = vector.broadcast %cst_140 : f32 to vector<1x128xf32>
    %361 = arith.mulf %360, %359 : vector<1x128xf32>
    %362 = vector.extract_strided_slice %345 {offsets = [0, 256], sizes = [1, 128], strides = [1, 1]} : vector<1x512xf32> to vector<1x128xf32>
    %363 = math.tanh %362 : vector<1x128xf32>
    %364 = vector.extract_strided_slice %345 {offsets = [0, 384], sizes = [1, 128], strides = [1, 1]} : vector<1x512xf32> to vector<1x128xf32>
    %cst_141 = arith.constant 5.000000e-01 : f32
    %365 = vector.broadcast %cst_141 : f32 to vector<1x128xf32>
    %366 = arith.mulf %365, %364 : vector<1x128xf32>
    %367 = math.tanh %366 : vector<1x128xf32>
    %cst_142 = arith.constant 1.000000e+00 : f32
    %368 = vector.broadcast %cst_142 : f32 to vector<1x128xf32>
    %369 = arith.addf %367, %368 : vector<1x128xf32>
    %cst_143 = arith.constant 5.000000e-01 : f32
    %370 = vector.broadcast %cst_143 : f32 to vector<1x128xf32>
    %371 = arith.mulf %370, %369 : vector<1x128xf32>
    %372 = arith.mulf %361, %341 : vector<1x128xf32>
    %373 = arith.mulf %353, %363 : vector<1x128xf32>
    %374 = arith.addf %372, %373 : vector<1x128xf32>
    %375 = math.tanh %374 : vector<1x128xf32>
    %376 = arith.mulf %371, %375 : vector<1x128xf32>
    %c0_144 = arith.constant 0 : index
    %c0_145 = arith.constant 0 : index
    %377 = vector.load %arg20[%c0_144, %c0_145] : memref<8x128xf32, #tpu.memory_space<vmem>>, vector<1x128xf32>
    tpu.vector_store %arg20[%c0_144, %c0_145], %376 {strides = array<i32>} : memref<8x128xf32, #tpu.memory_space<vmem>>, vector<1x128xf32>,
    %378 = vector.extract_strided_slice %340 {offsets = [1, 0], sizes = [1, 512], strides = [1, 1]} : vector<8x512xf32> to vector<1x512xf32>
    %c0_146 = arith.constant 0 : index
    %c0_147 = arith.constant 0 : index
    %379 = vector.load %arg14[%c0_146, %c0_147] : memref<128x512xf32, #tpu.memory_space<vmem>>, vector<128x512xf32>
    %cst_148 = arith.constant dense<0.000000e+00> : vector<1x512xf32>
    %380 = tpu.matmul %376, %379, %cst_148 {dimension_numbers = #tpu.dot_dimension_numbers<[1], [0], [0], [1], [0, 0, 1, 1], [], []>} : vector<1x128xf32>, vector<128x512xf32>, vector<1x512xf32> -> vector<1x512xf32>
    %381 = arith.addf %378, %380 : vector<1x512xf32>
    %382 = vector.extract_strided_slice %381 {offsets = [0, 0], sizes = [1, 128], strides = [1, 1]} : vector<1x512xf32> to vector<1x128xf32>
    %cst_149 = arith.constant 5.000000e-01 : f32
    %383 = vector.broadcast %cst_149 : f32 to vector<1x128xf32>
    %384 = arith.mulf %383, %382 : vector<1x128xf32>
    %385 = math.tanh %384 : vector<1x128xf32>
    %cst_150 = arith.constant 1.000000e+00 : f32
    %386 = vector.broadcast %cst_150 : f32 to vector<1x128xf32>
    %387 = arith.addf %385, %386 : vector<1x128xf32>
    %cst_151 = arith.constant 5.000000e-01 : f32
    %388 = vector.broadcast %cst_151 : f32 to vector<1x128xf32>
    %389 = arith.mulf %388, %387 : vector<1x128xf32>
    %390 = vector.extract_strided_slice %381 {offsets = [0, 128], sizes = [1, 128], strides = [1, 1]} : vector<1x512xf32> to vector<1x128xf32>
    %cst_152 = arith.constant 5.000000e-01 : f32
    %391 = vector.broadcast %cst_152 : f32 to vector<1x128xf32>
    %392 = arith.mulf %391, %390 : vector<1x128xf32>
    %393 = math.tanh %392 : vector<1x128xf32>
    %cst_153 = arith.constant 1.000000e+00 : f32
    %394 = vector.broadcast %cst_153 : f32 to vector<1x128xf32>
    %395 = arith.addf %393, %394 : vector<1x128xf32>
    %cst_154 = arith.constant 5.000000e-01 : f32
    %396 = vector.broadcast %cst_154 : f32 to vector<1x128xf32>
    %397 = arith.mulf %396, %395 : vector<1x128xf32>
    %398 = vector.extract_strided_slice %381 {offsets = [0, 256], sizes = [1, 128], strides = [1, 1]} : vector<1x512xf32> to vector<1x128xf32>
    %399 = math.tanh %398 : vector<1x128xf32>
    %400 = vector.extract_strided_slice %381 {offsets = [0, 384], sizes = [1, 128], strides = [1, 1]} : vector<1x512xf32> to vector<1x128xf32>
    %cst_155 = arith.constant 5.000000e-01 : f32
    %401 = vector.broadcast %cst_155 : f32 to vector<1x128xf32>
    %402 = arith.mulf %401, %400 : vector<1x128xf32>
    %403 = math.tanh %402 : vector<1x128xf32>
    %cst_156 = arith.constant 1.000000e+00 : f32
    %404 = vector.broadcast %cst_156 : f32 to vector<1x128xf32>
    %405 = arith.addf %403, %404 : vector<1x128xf32>
    %cst_157 = arith.constant 5.000000e-01 : f32
    %406 = vector.broadcast %cst_157 : f32 to vector<1x128xf32>
    %407 = arith.mulf %406, %405 : vector<1x128xf32>
    %408 = arith.mulf %397, %374 : vector<1x128xf32>
    %409 = arith.mulf %389, %399 : vector<1x128xf32>
    %410 = arith.addf %408, %409 : vector<1x128xf32>
    %411 = math.tanh %410 : vector<1x128xf32>
    %412 = arith.mulf %407, %411 : vector<1x128xf32>
    %c1 = arith.constant 1 : index
    %c0_158 = arith.constant 0 : index
    %413 = vector.load %arg20[%c1, %c0_158] : memref<8x128xf32, #tpu.memory_space<vmem>>, vector<1x128xf32>
    tpu.vector_store %arg20[%c1, %c0_158], %412 {strides = array<i32>} : memref<8x128xf32, #tpu.memory_space<vmem>>, vector<1x128xf32>,
    %414 = vector.extract_strided_slice %340 {offsets = [2, 0], sizes = [1, 512], strides = [1, 1]} : vector<8x512xf32> to vector<1x512xf32>
    %c0_159 = arith.constant 0 : index
    %c0_160 = arith.constant 0 : index
    %415 = vector.load %arg14[%c0_159, %c0_160] : memref<128x512xf32, #tpu.memory_space<vmem>>, vector<128x512xf32>
    %cst_161 = arith.constant dense<0.000000e+00> : vector<1x512xf32>
    %416 = tpu.matmul %412, %415, %cst_161 {dimension_numbers = #tpu.dot_dimension_numbers<[1], [0], [0], [1], [0, 0, 1, 1], [], []>} : vector<1x128xf32>, vector<128x512xf32>, vector<1x512xf32> -> vector<1x512xf32>
    %417 = arith.addf %414, %416 : vector<1x512xf32>
    %418 = vector.extract_strided_slice %417 {offsets = [0, 0], sizes = [1, 128], strides = [1, 1]} : vector<1x512xf32> to vector<1x128xf32>
    %cst_162 = arith.constant 5.000000e-01 : f32
    %419 = vector.broadcast %cst_162 : f32 to vector<1x128xf32>
    %420 = arith.mulf %419, %418 : vector<1x128xf32>
    %421 = math.tanh %420 : vector<1x128xf32>
    %cst_163 = arith.constant 1.000000e+00 : f32
    %422 = vector.broadcast %cst_163 : f32 to vector<1x128xf32>
    %423 = arith.addf %421, %422 : vector<1x128xf32>
    %cst_164 = arith.constant 5.000000e-01 : f32
    %424 = vector.broadcast %cst_164 : f32 to vector<1x128xf32>
    %425 = arith.mulf %424, %423 : vector<1x128xf32>
    %426 = vector.extract_strided_slice %417 {offsets = [0, 128], sizes = [1, 128], strides = [1, 1]} : vector<1x512xf32> to vector<1x128xf32>
    %cst_165 = arith.constant 5.000000e-01 : f32
    %427 = vector.broadcast %cst_165 : f32 to vector<1x128xf32>
    %428 = arith.mulf %427, %426 : vector<1x128xf32>
    %429 = math.tanh %428 : vector<1x128xf32>
    %cst_166 = arith.constant 1.000000e+00 : f32
    %430 = vector.broadcast %cst_166 : f32 to vector<1x128xf32>
    %431 = arith.addf %429, %430 : vector<1x128xf32>
    %cst_167 = arith.constant 5.000000e-01 : f32
    %432 = vector.broadcast %cst_167 : f32 to vector<1x128xf32>
    %433 = arith.mulf %432, %431 : vector<1x128xf32>
    %434 = vector.extract_strided_slice %417 {offsets = [0, 256], sizes = [1, 128], strides = [1, 1]} : vector<1x512xf32> to vector<1x128xf32>
    %435 = math.tanh %434 : vector<1x128xf32>
    %436 = vector.extract_strided_slice %417 {offsets = [0, 384], sizes = [1, 128], strides = [1, 1]} : vector<1x512xf32> to vector<1x128xf32>
    %cst_168 = arith.constant 5.000000e-01 : f32
    %437 = vector.broadcast %cst_168 : f32 to vector<1x128xf32>
    %438 = arith.mulf %437, %436 : vector<1x128xf32>
    %439 = math.tanh %438 : vector<1x128xf32>
    %cst_169 = arith.constant 1.000000e+00 : f32
    %440 = vector.broadcast %cst_169 : f32 to vector<1x128xf32>
    %441 = arith.addf %439, %440 : vector<1x128xf32>
    %cst_170 = arith.constant 5.000000e-01 : f32
    %442 = vector.broadcast %cst_170 : f32 to vector<1x128xf32>
    %443 = arith.mulf %442, %441 : vector<1x128xf32>
    %444 = arith.mulf %433, %410 : vector<1x128xf32>
    %445 = arith.mulf %425, %435 : vector<1x128xf32>
    %446 = arith.addf %444, %445 : vector<1x128xf32>
    %447 = math.tanh %446 : vector<1x128xf32>
    %448 = arith.mulf %443, %447 : vector<1x128xf32>
    %c2 = arith.constant 2 : index
    %c0_171 = arith.constant 0 : index
    %449 = vector.load %arg20[%c2, %c0_171] : memref<8x128xf32, #tpu.memory_space<vmem>>, vector<1x128xf32>
    tpu.vector_store %arg20[%c2, %c0_171], %448 {strides = array<i32>} : memref<8x128xf32, #tpu.memory_space<vmem>>, vector<1x128xf32>,
    %450 = vector.extract_strided_slice %340 {offsets = [3, 0], sizes = [1, 512], strides = [1, 1]} : vector<8x512xf32> to vector<1x512xf32>
    %c0_172 = arith.constant 0 : index
    %c0_173 = arith.constant 0 : index
    %451 = vector.load %arg14[%c0_172, %c0_173] : memref<128x512xf32, #tpu.memory_space<vmem>>, vector<128x512xf32>
    %cst_174 = arith.constant dense<0.000000e+00> : vector<1x512xf32>
    %452 = tpu.matmul %448, %451, %cst_174 {dimension_numbers = #tpu.dot_dimension_numbers<[1], [0], [0], [1], [0, 0, 1, 1], [], []>} : vector<1x128xf32>, vector<128x512xf32>, vector<1x512xf32> -> vector<1x512xf32>
    %453 = arith.addf %450, %452 : vector<1x512xf32>
    %454 = vector.extract_strided_slice %453 {offsets = [0, 0], sizes = [1, 128], strides = [1, 1]} : vector<1x512xf32> to vector<1x128xf32>
    %cst_175 = arith.constant 5.000000e-01 : f32
    %455 = vector.broadcast %cst_175 : f32 to vector<1x128xf32>
    %456 = arith.mulf %455, %454 : vector<1x128xf32>
    %457 = math.tanh %456 : vector<1x128xf32>
    %cst_176 = arith.constant 1.000000e+00 : f32
    %458 = vector.broadcast %cst_176 : f32 to vector<1x128xf32>
    %459 = arith.addf %457, %458 : vector<1x128xf32>
    %cst_177 = arith.constant 5.000000e-01 : f32
    %460 = vector.broadcast %cst_177 : f32 to vector<1x128xf32>
    %461 = arith.mulf %460, %459 : vector<1x128xf32>
    %462 = vector.extract_strided_slice %453 {offsets = [0, 128], sizes = [1, 128], strides = [1, 1]} : vector<1x512xf32> to vector<1x128xf32>
    %cst_178 = arith.constant 5.000000e-01 : f32
    %463 = vector.broadcast %cst_178 : f32 to vector<1x128xf32>
    %464 = arith.mulf %463, %462 : vector<1x128xf32>
    %465 = math.tanh %464 : vector<1x128xf32>
    %cst_179 = arith.constant 1.000000e+00 : f32
    %466 = vector.broadcast %cst_179 : f32 to vector<1x128xf32>
    %467 = arith.addf %465, %466 : vector<1x128xf32>
    %cst_180 = arith.constant 5.000000e-01 : f32
    %468 = vector.broadcast %cst_180 : f32 to vector<1x128xf32>
    %469 = arith.mulf %468, %467 : vector<1x128xf32>
    %470 = vector.extract_strided_slice %453 {offsets = [0, 256], sizes = [1, 128], strides = [1, 1]} : vector<1x512xf32> to vector<1x128xf32>
    %471 = math.tanh %470 : vector<1x128xf32>
    %472 = vector.extract_strided_slice %453 {offsets = [0, 384], sizes = [1, 128], strides = [1, 1]} : vector<1x512xf32> to vector<1x128xf32>
    %cst_181 = arith.constant 5.000000e-01 : f32
    %473 = vector.broadcast %cst_181 : f32 to vector<1x128xf32>
    %474 = arith.mulf %473, %472 : vector<1x128xf32>
    %475 = math.tanh %474 : vector<1x128xf32>
    %cst_182 = arith.constant 1.000000e+00 : f32
    %476 = vector.broadcast %cst_182 : f32 to vector<1x128xf32>
    %477 = arith.addf %475, %476 : vector<1x128xf32>
    %cst_183 = arith.constant 5.000000e-01 : f32
    %478 = vector.broadcast %cst_183 : f32 to vector<1x128xf32>
    %479 = arith.mulf %478, %477 : vector<1x128xf32>
    %480 = arith.mulf %469, %446 : vector<1x128xf32>
    %481 = arith.mulf %461, %471 : vector<1x128xf32>
    %482 = arith.addf %480, %481 : vector<1x128xf32>
    %483 = math.tanh %482 : vector<1x128xf32>
    %484 = arith.mulf %479, %483 : vector<1x128xf32>
    %c3 = arith.constant 3 : index
    %c0_184 = arith.constant 0 : index
    %485 = vector.load %arg20[%c3, %c0_184] : memref<8x128xf32, #tpu.memory_space<vmem>>, vector<1x128xf32>
    tpu.vector_store %arg20[%c3, %c0_184], %484 {strides = array<i32>} : memref<8x128xf32, #tpu.memory_space<vmem>>, vector<1x128xf32>,
    %486 = vector.extract_strided_slice %340 {offsets = [4, 0], sizes = [1, 512], strides = [1, 1]} : vector<8x512xf32> to vector<1x512xf32>
    %c0_185 = arith.constant 0 : index
    %c0_186 = arith.constant 0 : index
    %487 = vector.load %arg14[%c0_185, %c0_186] : memref<128x512xf32, #tpu.memory_space<vmem>>, vector<128x512xf32>
    %cst_187 = arith.constant dense<0.000000e+00> : vector<1x512xf32>
    %488 = tpu.matmul %484, %487, %cst_187 {dimension_numbers = #tpu.dot_dimension_numbers<[1], [0], [0], [1], [0, 0, 1, 1], [], []>} : vector<1x128xf32>, vector<128x512xf32>, vector<1x512xf32> -> vector<1x512xf32>
    %489 = arith.addf %486, %488 : vector<1x512xf32>
    %490 = vector.extract_strided_slice %489 {offsets = [0, 0], sizes = [1, 128], strides = [1, 1]} : vector<1x512xf32> to vector<1x128xf32>
    %cst_188 = arith.constant 5.000000e-01 : f32
    %491 = vector.broadcast %cst_188 : f32 to vector<1x128xf32>
    %492 = arith.mulf %491, %490 : vector<1x128xf32>
    %493 = math.tanh %492 : vector<1x128xf32>
    %cst_189 = arith.constant 1.000000e+00 : f32
    %494 = vector.broadcast %cst_189 : f32 to vector<1x128xf32>
    %495 = arith.addf %493, %494 : vector<1x128xf32>
    %cst_190 = arith.constant 5.000000e-01 : f32
    %496 = vector.broadcast %cst_190 : f32 to vector<1x128xf32>
    %497 = arith.mulf %496, %495 : vector<1x128xf32>
    %498 = vector.extract_strided_slice %489 {offsets = [0, 128], sizes = [1, 128], strides = [1, 1]} : vector<1x512xf32> to vector<1x128xf32>
    %cst_191 = arith.constant 5.000000e-01 : f32
    %499 = vector.broadcast %cst_191 : f32 to vector<1x128xf32>
    %500 = arith.mulf %499, %498 : vector<1x128xf32>
    %501 = math.tanh %500 : vector<1x128xf32>
    %cst_192 = arith.constant 1.000000e+00 : f32
    %502 = vector.broadcast %cst_192 : f32 to vector<1x128xf32>
    %503 = arith.addf %501, %502 : vector<1x128xf32>
    %cst_193 = arith.constant 5.000000e-01 : f32
    %504 = vector.broadcast %cst_193 : f32 to vector<1x128xf32>
    %505 = arith.mulf %504, %503 : vector<1x128xf32>
    %506 = vector.extract_strided_slice %489 {offsets = [0, 256], sizes = [1, 128], strides = [1, 1]} : vector<1x512xf32> to vector<1x128xf32>
    %507 = math.tanh %506 : vector<1x128xf32>
    %508 = vector.extract_strided_slice %489 {offsets = [0, 384], sizes = [1, 128], strides = [1, 1]} : vector<1x512xf32> to vector<1x128xf32>
    %cst_194 = arith.constant 5.000000e-01 : f32
    %509 = vector.broadcast %cst_194 : f32 to vector<1x128xf32>
    %510 = arith.mulf %509, %508 : vector<1x128xf32>
    %511 = math.tanh %510 : vector<1x128xf32>
    %cst_195 = arith.constant 1.000000e+00 : f32
    %512 = vector.broadcast %cst_195 : f32 to vector<1x128xf32>
    %513 = arith.addf %511, %512 : vector<1x128xf32>
    %cst_196 = arith.constant 5.000000e-01 : f32
    %514 = vector.broadcast %cst_196 : f32 to vector<1x128xf32>
    %515 = arith.mulf %514, %513 : vector<1x128xf32>
    %516 = arith.mulf %505, %482 : vector<1x128xf32>
    %517 = arith.mulf %497, %507 : vector<1x128xf32>
    %518 = arith.addf %516, %517 : vector<1x128xf32>
    %519 = math.tanh %518 : vector<1x128xf32>
    %520 = arith.mulf %515, %519 : vector<1x128xf32>
    %c4 = arith.constant 4 : index
    %c0_197 = arith.constant 0 : index
    %521 = vector.load %arg20[%c4, %c0_197] : memref<8x128xf32, #tpu.memory_space<vmem>>, vector<1x128xf32>
    tpu.vector_store %arg20[%c4, %c0_197], %520 {strides = array<i32>} : memref<8x128xf32, #tpu.memory_space<vmem>>, vector<1x128xf32>,
    %522 = vector.extract_strided_slice %340 {offsets = [5, 0], sizes = [1, 512], strides = [1, 1]} : vector<8x512xf32> to vector<1x512xf32>
    %c0_198 = arith.constant 0 : index
    %c0_199 = arith.constant 0 : index
    %523 = vector.load %arg14[%c0_198, %c0_199] : memref<128x512xf32, #tpu.memory_space<vmem>>, vector<128x512xf32>
    %cst_200 = arith.constant dense<0.000000e+00> : vector<1x512xf32>
    %524 = tpu.matmul %520, %523, %cst_200 {dimension_numbers = #tpu.dot_dimension_numbers<[1], [0], [0], [1], [0, 0, 1, 1], [], []>} : vector<1x128xf32>, vector<128x512xf32>, vector<1x512xf32> -> vector<1x512xf32>
    %525 = arith.addf %522, %524 : vector<1x512xf32>
    %526 = vector.extract_strided_slice %525 {offsets = [0, 0], sizes = [1, 128], strides = [1, 1]} : vector<1x512xf32> to vector<1x128xf32>
    %cst_201 = arith.constant 5.000000e-01 : f32
    %527 = vector.broadcast %cst_201 : f32 to vector<1x128xf32>
    %528 = arith.mulf %527, %526 : vector<1x128xf32>
    %529 = math.tanh %528 : vector<1x128xf32>
    %cst_202 = arith.constant 1.000000e+00 : f32
    %530 = vector.broadcast %cst_202 : f32 to vector<1x128xf32>
    %531 = arith.addf %529, %530 : vector<1x128xf32>
    %cst_203 = arith.constant 5.000000e-01 : f32
    %532 = vector.broadcast %cst_203 : f32 to vector<1x128xf32>
    %533 = arith.mulf %532, %531 : vector<1x128xf32>
    %534 = vector.extract_strided_slice %525 {offsets = [0, 128], sizes = [1, 128], strides = [1, 1]} : vector<1x512xf32> to vector<1x128xf32>
    %cst_204 = arith.constant 5.000000e-01 : f32
    %535 = vector.broadcast %cst_204 : f32 to vector<1x128xf32>
    %536 = arith.mulf %535, %534 : vector<1x128xf32>
    %537 = math.tanh %536 : vector<1x128xf32>
    %cst_205 = arith.constant 1.000000e+00 : f32
    %538 = vector.broadcast %cst_205 : f32 to vector<1x128xf32>
    %539 = arith.addf %537, %538 : vector<1x128xf32>
    %cst_206 = arith.constant 5.000000e-01 : f32
    %540 = vector.broadcast %cst_206 : f32 to vector<1x128xf32>
    %541 = arith.mulf %540, %539 : vector<1x128xf32>
    %542 = vector.extract_strided_slice %525 {offsets = [0, 256], sizes = [1, 128], strides = [1, 1]} : vector<1x512xf32> to vector<1x128xf32>
    %543 = math.tanh %542 : vector<1x128xf32>
    %544 = vector.extract_strided_slice %525 {offsets = [0, 384], sizes = [1, 128], strides = [1, 1]} : vector<1x512xf32> to vector<1x128xf32>
    %cst_207 = arith.constant 5.000000e-01 : f32
    %545 = vector.broadcast %cst_207 : f32 to vector<1x128xf32>
    %546 = arith.mulf %545, %544 : vector<1x128xf32>
    %547 = math.tanh %546 : vector<1x128xf32>
    %cst_208 = arith.constant 1.000000e+00 : f32
    %548 = vector.broadcast %cst_208 : f32 to vector<1x128xf32>
    %549 = arith.addf %547, %548 : vector<1x128xf32>
    %cst_209 = arith.constant 5.000000e-01 : f32
    %550 = vector.broadcast %cst_209 : f32 to vector<1x128xf32>
    %551 = arith.mulf %550, %549 : vector<1x128xf32>
    %552 = arith.mulf %541, %518 : vector<1x128xf32>
    %553 = arith.mulf %533, %543 : vector<1x128xf32>
    %554 = arith.addf %552, %553 : vector<1x128xf32>
    %555 = math.tanh %554 : vector<1x128xf32>
    %556 = arith.mulf %551, %555 : vector<1x128xf32>
    %c5 = arith.constant 5 : index
    %c0_210 = arith.constant 0 : index
    %557 = vector.load %arg20[%c5, %c0_210] : memref<8x128xf32, #tpu.memory_space<vmem>>, vector<1x128xf32>
    tpu.vector_store %arg20[%c5, %c0_210], %556 {strides = array<i32>} : memref<8x128xf32, #tpu.memory_space<vmem>>, vector<1x128xf32>,
    %558 = vector.extract_strided_slice %340 {offsets = [6, 0], sizes = [1, 512], strides = [1, 1]} : vector<8x512xf32> to vector<1x512xf32>
    %c0_211 = arith.constant 0 : index
    %c0_212 = arith.constant 0 : index
    %559 = vector.load %arg14[%c0_211, %c0_212] : memref<128x512xf32, #tpu.memory_space<vmem>>, vector<128x512xf32>
    %cst_213 = arith.constant dense<0.000000e+00> : vector<1x512xf32>
    %560 = tpu.matmul %556, %559, %cst_213 {dimension_numbers = #tpu.dot_dimension_numbers<[1], [0], [0], [1], [0, 0, 1, 1], [], []>} : vector<1x128xf32>, vector<128x512xf32>, vector<1x512xf32> -> vector<1x512xf32>
    %561 = arith.addf %558, %560 : vector<1x512xf32>
    %562 = vector.extract_strided_slice %561 {offsets = [0, 0], sizes = [1, 128], strides = [1, 1]} : vector<1x512xf32> to vector<1x128xf32>
    %cst_214 = arith.constant 5.000000e-01 : f32
    %563 = vector.broadcast %cst_214 : f32 to vector<1x128xf32>
    %564 = arith.mulf %563, %562 : vector<1x128xf32>
    %565 = math.tanh %564 : vector<1x128xf32>
    %cst_215 = arith.constant 1.000000e+00 : f32
    %566 = vector.broadcast %cst_215 : f32 to vector<1x128xf32>
    %567 = arith.addf %565, %566 : vector<1x128xf32>
    %cst_216 = arith.constant 5.000000e-01 : f32
    %568 = vector.broadcast %cst_216 : f32 to vector<1x128xf32>
    %569 = arith.mulf %568, %567 : vector<1x128xf32>
    %570 = vector.extract_strided_slice %561 {offsets = [0, 128], sizes = [1, 128], strides = [1, 1]} : vector<1x512xf32> to vector<1x128xf32>
    %cst_217 = arith.constant 5.000000e-01 : f32
    %571 = vector.broadcast %cst_217 : f32 to vector<1x128xf32>
    %572 = arith.mulf %571, %570 : vector<1x128xf32>
    %573 = math.tanh %572 : vector<1x128xf32>
    %cst_218 = arith.constant 1.000000e+00 : f32
    %574 = vector.broadcast %cst_218 : f32 to vector<1x128xf32>
    %575 = arith.addf %573, %574 : vector<1x128xf32>
    %cst_219 = arith.constant 5.000000e-01 : f32
    %576 = vector.broadcast %cst_219 : f32 to vector<1x128xf32>
    %577 = arith.mulf %576, %575 : vector<1x128xf32>
    %578 = vector.extract_strided_slice %561 {offsets = [0, 256], sizes = [1, 128], strides = [1, 1]} : vector<1x512xf32> to vector<1x128xf32>
    %579 = math.tanh %578 : vector<1x128xf32>
    %580 = vector.extract_strided_slice %561 {offsets = [0, 384], sizes = [1, 128], strides = [1, 1]} : vector<1x512xf32> to vector<1x128xf32>
    %cst_220 = arith.constant 5.000000e-01 : f32
    %581 = vector.broadcast %cst_220 : f32 to vector<1x128xf32>
    %582 = arith.mulf %581, %580 : vector<1x128xf32>
    %583 = math.tanh %582 : vector<1x128xf32>
    %cst_221 = arith.constant 1.000000e+00 : f32
    %584 = vector.broadcast %cst_221 : f32 to vector<1x128xf32>
    %585 = arith.addf %583, %584 : vector<1x128xf32>
    %cst_222 = arith.constant 5.000000e-01 : f32
    %586 = vector.broadcast %cst_222 : f32 to vector<1x128xf32>
    %587 = arith.mulf %586, %585 : vector<1x128xf32>
    %588 = arith.mulf %577, %554 : vector<1x128xf32>
    %589 = arith.mulf %569, %579 : vector<1x128xf32>
    %590 = arith.addf %588, %589 : vector<1x128xf32>
    %591 = math.tanh %590 : vector<1x128xf32>
    %592 = arith.mulf %587, %591 : vector<1x128xf32>
    %c6 = arith.constant 6 : index
    %c0_223 = arith.constant 0 : index
    %593 = vector.load %arg20[%c6, %c0_223] : memref<8x128xf32, #tpu.memory_space<vmem>>, vector<1x128xf32>
    tpu.vector_store %arg20[%c6, %c0_223], %592 {strides = array<i32>} : memref<8x128xf32, #tpu.memory_space<vmem>>, vector<1x128xf32>,
    %594 = vector.extract_strided_slice %340 {offsets = [7, 0], sizes = [1, 512], strides = [1, 1]} : vector<8x512xf32> to vector<1x512xf32>
    %c0_224 = arith.constant 0 : index
    %c0_225 = arith.constant 0 : index
    %595 = vector.load %arg14[%c0_224, %c0_225] : memref<128x512xf32, #tpu.memory_space<vmem>>, vector<128x512xf32>
    %cst_226 = arith.constant dense<0.000000e+00> : vector<1x512xf32>
    %596 = tpu.matmul %592, %595, %cst_226 {dimension_numbers = #tpu.dot_dimension_numbers<[1], [0], [0], [1], [0, 0, 1, 1], [], []>} : vector<1x128xf32>, vector<128x512xf32>, vector<1x512xf32> -> vector<1x512xf32>
    %597 = arith.addf %594, %596 : vector<1x512xf32>
    %598 = vector.extract_strided_slice %597 {offsets = [0, 0], sizes = [1, 128], strides = [1, 1]} : vector<1x512xf32> to vector<1x128xf32>
    %cst_227 = arith.constant 5.000000e-01 : f32
    %599 = vector.broadcast %cst_227 : f32 to vector<1x128xf32>
    %600 = arith.mulf %599, %598 : vector<1x128xf32>
    %601 = math.tanh %600 : vector<1x128xf32>
    %cst_228 = arith.constant 1.000000e+00 : f32
    %602 = vector.broadcast %cst_228 : f32 to vector<1x128xf32>
    %603 = arith.addf %601, %602 : vector<1x128xf32>
    %cst_229 = arith.constant 5.000000e-01 : f32
    %604 = vector.broadcast %cst_229 : f32 to vector<1x128xf32>
    %605 = arith.mulf %604, %603 : vector<1x128xf32>
    %606 = vector.extract_strided_slice %597 {offsets = [0, 128], sizes = [1, 128], strides = [1, 1]} : vector<1x512xf32> to vector<1x128xf32>
    %cst_230 = arith.constant 5.000000e-01 : f32
    %607 = vector.broadcast %cst_230 : f32 to vector<1x128xf32>
    %608 = arith.mulf %607, %606 : vector<1x128xf32>
    %609 = math.tanh %608 : vector<1x128xf32>
    %cst_231 = arith.constant 1.000000e+00 : f32
    %610 = vector.broadcast %cst_231 : f32 to vector<1x128xf32>
    %611 = arith.addf %609, %610 : vector<1x128xf32>
    %cst_232 = arith.constant 5.000000e-01 : f32
    %612 = vector.broadcast %cst_232 : f32 to vector<1x128xf32>
    %613 = arith.mulf %612, %611 : vector<1x128xf32>
    %614 = vector.extract_strided_slice %597 {offsets = [0, 256], sizes = [1, 128], strides = [1, 1]} : vector<1x512xf32> to vector<1x128xf32>
    %615 = math.tanh %614 : vector<1x128xf32>
    %616 = vector.extract_strided_slice %597 {offsets = [0, 384], sizes = [1, 128], strides = [1, 1]} : vector<1x512xf32> to vector<1x128xf32>
    %cst_233 = arith.constant 5.000000e-01 : f32
    %617 = vector.broadcast %cst_233 : f32 to vector<1x128xf32>
    %618 = arith.mulf %617, %616 : vector<1x128xf32>
    %619 = math.tanh %618 : vector<1x128xf32>
    %cst_234 = arith.constant 1.000000e+00 : f32
    %620 = vector.broadcast %cst_234 : f32 to vector<1x128xf32>
    %621 = arith.addf %619, %620 : vector<1x128xf32>
    %cst_235 = arith.constant 5.000000e-01 : f32
    %622 = vector.broadcast %cst_235 : f32 to vector<1x128xf32>
    %623 = arith.mulf %622, %621 : vector<1x128xf32>
    %624 = arith.mulf %613, %590 : vector<1x128xf32>
    %625 = arith.mulf %605, %615 : vector<1x128xf32>
    %626 = arith.addf %624, %625 : vector<1x128xf32>
    %627 = math.tanh %626 : vector<1x128xf32>
    %628 = arith.mulf %623, %627 : vector<1x128xf32>
    %c7 = arith.constant 7 : index
    %c0_236 = arith.constant 0 : index
    %629 = vector.load %arg20[%c7, %c0_236] : memref<8x128xf32, #tpu.memory_space<vmem>>, vector<1x128xf32>
    tpu.vector_store %arg20[%c7, %c0_236], %628 {strides = array<i32>} : memref<8x128xf32, #tpu.memory_space<vmem>>, vector<1x128xf32>,
    %c0_237 = arith.constant 0 : index
    %c0_238 = arith.constant 0 : index
    %630 = vector.load %arg20[%c0_237, %c0_238] : memref<8x128xf32, #tpu.memory_space<vmem>>, vector<8x128xf32>
    %cst_239 = arith.constant 0.000000e+00 : f32
    %631 = vector.broadcast %cst_239 : f32 to vector<8x128xf32>
    %632 = arith.maximumf %630, %631 : vector<8x128xf32>
    %c0_240 = arith.constant 0 : index
    %c0_241 = arith.constant 0 : index
    %633 = vector.load %arg16[%c0_240, %c0_241] : memref<128x128xf32, #tpu.memory_space<vmem>>, vector<128x128xf32>
    %cst_242 = arith.constant dense<0.000000e+00> : vector<8x128xf32>
    %634 = tpu.matmul %632, %633, %cst_242 {dimension_numbers = #tpu.dot_dimension_numbers<[1], [0], [0], [1], [0, 0, 1, 1], [], []>} : vector<8x128xf32>, vector<128x128xf32>, vector<8x128xf32> -> vector<8x128xf32>
    %c0_243 = arith.constant 0 : index
    %c0_244 = arith.constant 0 : index
    %635 = vector.load %arg17[%c0_243, %c0_244] : memref<1x128xf32, #tpu.memory_space<vmem>>, vector<1x128xf32>
    %636 = vector.broadcast %635 : vector<1x128xf32> to vector<8x128xf32>
    %637 = arith.addf %634, %636 : vector<8x128xf32>
    %cst_245 = arith.constant dense<0xFF800000> : vector<8xf32>
    %638 = vector.multi_reduction <maximumf>, %637, %cst_245 [1] : vector<8x128xf32> to vector<8xf32>
    %639 = vector.shape_cast %638 : vector<8xf32> to vector<8x1xf32>
    %640 = vector.broadcast %639 : vector<8x1xf32> to vector<8x128xf32>
    %641 = arith.subf %637, %640 : vector<8x128xf32>
    %642 = vector.broadcast %639 : vector<8x1xf32> to vector<8x128xf32>
    %643 = arith.subf %637, %642 : vector<8x128xf32>
    %644 = math.exp %643 : vector<8x128xf32>
    %cst_246 = arith.constant dense<0.000000e+00> : vector<8xf32>
    %645 = vector.multi_reduction <add>, %644, %cst_246 [1] : vector<8x128xf32> to vector<8xf32>
    %646 = vector.shape_cast %645 : vector<8xf32> to vector<8x1xf32>
    %647 = math.log %646 : vector<8x1xf32>
    %648 = vector.broadcast %647 : vector<8x1xf32> to vector<8x128xf32>
    %649 = arith.subf %641, %648 : vector<8x128xf32>
    %c0_247 = arith.constant 0 : index
    %c0_248 = arith.constant 0 : index
    %650 = vector.load %arg18[%c0_247, %c0_248] : memref<8x128xf32, #tpu.memory_space<vmem>>, vector<8x128xf32>
    tpu.vector_store %arg18[%c0_247, %c0_248], %649 {strides = array<i32>} : memref<8x128xf32, #tpu.memory_space<vmem>>, vector<8x128xf32>,
    %651 = tpu.iota {dimensions = array<i32: 1>} : vector<8x128xi32>
    %c0_249 = arith.constant 0 : index
    %c0_250 = arith.constant 0 : index
    %652 = vector.load %arg7[%c0_249, %c0_250] : memref<8x1xi32, #tpu.memory_space<vmem>>, vector<8x1xi32>
    %653 = vector.broadcast %652 : vector<8x1xi32> to vector<8x128xi32>
    %654 = arith.cmpi eq, %651, %653 : vector<8x128xi32>
    %cst_251 = arith.constant 0.000000e+00 : f32
    %655 = vector.broadcast %cst_251 : f32 to vector<8x128xf32>
    %656 = arith.select %654, %649, %655 : vector<8x128xi1>, vector<8x128xf32>
    %657 = vector.shape_cast %656 : vector<8x128xf32> to vector<1x8x128xf32>
    %cst_252 = arith.constant dense<0.000000e+00> : vector<1xf32>
    %658 = vector.multi_reduction <add>, %657, %cst_252 [1, 2] : vector<1x8x128xf32> to vector<1xf32>
    %659 = vector.shape_cast %658 : vector<1xf32> to vector<1x1x1xf32>
    %660 = vector.extract %659[0, 0, 0] : f32 from vector<1x1x1xf32>
    %661 = vector.broadcast %660 : f32 to vector<1x1xf32>
    %cst_253 = arith.constant 0.000000e+00 : f32
    %662 = vector.broadcast %cst_253 : f32 to vector<1x1xf32>
    %663 = arith.subf %662, %661 : vector<1x1xf32>
    %c0_i32 = arith.constant 0 : i32
    %664 = vector.broadcast %c0_i32 : i32 to vector<1x128xi32>
    %665 = arith.cmpi eq, %300, %664 : vector<1x128xi32>
    %cst_254 = arith.constant 0.000000e+00 : f32
    %666 = vector.shape_cast %332 : vector<1x1xf32> to vector<1x1xf32>
    %667 = vector.broadcast %666 : vector<1x1xf32> to vector<1x128xf32>
    %668 = vector.broadcast %cst_254 : f32 to vector<1x128xf32>
    %669 = arith.select %665, %667, %668 : vector<1x128xi1>, vector<1x128xf32>
    %c1_i32 = arith.constant 1 : i32
    %670 = vector.broadcast %c1_i32 : i32 to vector<1x128xi32>
    %671 = arith.cmpi eq, %300, %670 : vector<1x128xi32>
    %cst_255 = arith.constant 0.000000e+00 : f32
    %672 = vector.shape_cast %663 : vector<1x1xf32> to vector<1x1xf32>
    %673 = vector.broadcast %672 : vector<1x1xf32> to vector<1x128xf32>
    %674 = vector.broadcast %cst_255 : f32 to vector<1x128xf32>
    %675 = arith.select %671, %673, %674 : vector<1x128xi1>, vector<1x128xf32>
    %676 = arith.addf %669, %675 : vector<1x128xf32>
    %c0_256 = arith.constant 0 : index
    %c0_257 = arith.constant 0 : index
    %677 = vector.load %arg19[%c0_256, %c0_257] : memref<1x128xf32, #tpu.memory_space<vmem>>, vector<1x128xf32>
    tpu.vector_store %arg19[%c0_256, %c0_257], %676 {strides = array<i32>} : memref<1x128xf32, #tpu.memory_space<vmem>>, vector<1x128xf32>,
    return
  }
}

</mosaic_0001>

<bundles_post_ra>
// kernel: cvae_forward.1
= control target key start
LH: loop header
LB: loop body
LE: loop exit
PB: predicated region body
PF: predicated region fallthrough
CT: control target
= control target key end

     0   :  { %s6766_s0 = inlined_call_operand.vmem [shape: f32[8,32], index: 0, kind: input, shape index: {}]   ;;  %s6767_s1 = inlined_call_operand.vmem [shape: f32[8,32], index: 1, kind: input, shape index: {}]   ;;  %s6768_s2 = inlined_call_operand.vmem [shape: f32[1,128], index: 2, kind: input, shape index: {}]   ;;  %s6769_s3 = inlined_call_operand.vmem [shape: f32[1,128], index: 3, kind: input, shape index: {}]   ;;  %s6770_s4 = inlined_call_operand.vmem [shape: f32[1,128], index: 4, kind: input, shape index: {}]   ;;  %s6771_s5 = inlined_call_operand.vmem [shape: f32[1,128], index: 5, kind: input, shape index: {}]   ;;  %s6772_s6 = inlined_call_operand.vmem [shape: f32[1,128], index: 6, kind: input, shape index: {}]   ;;  %s6773_s7 = inlined_call_operand.vmem [shape: s32[8,1], index: 7, kind: input, shape index: {}]   ;;  %s6774_s8 = inlined_call_operand.hbm [shape: f32[32,512], index: 8, kind: input, shape index: {}]   ;;  %s6775_s9 = inlined_call_operand.hbm [shape: f32[128,512], index: 9, kind: input, shape index: {}]   ;;  %s6776_s10 = inlined_call_operand.vmem [shape: f32[1,512], index: 10, kind: input, shape index: {}]   ;;  %s6777_s11 = inlined_call_operand.vmem [shape: f32[128,256], index: 11, kind: input, shape index: {}]   ;;  %s6778_s12 = inlined_call_operand.vmem [shape: f32[1,256], index: 12, kind: input, shape index: {}]   ;;  %s6779_s13 = inlined_call_operand.hbm [shape: f32[32,512], index: 13, kind: input, shape index: {}]   ;;  %s6780_s14 = inlined_call_operand.hbm [shape: f32[128,512], index: 14, kind: input, shape index: {}]   ;;  %s6781_s15 = inlined_call_operand.vmem [shape: f32[1,512], index: 15, kind: input, shape index: {}]   ;;  %s6782_s16 = inlined_call_operand.hbm [shape: f32[128,128], index: 16, kind: input, shape index: {}]   ;;  %s6783_s17 = inlined_call_operand.vmem [shape: f32[1,128], index: 17, kind: input, shape index: {}]   ;;  %s6784_s18 = inlined_call_operand.hbm [shape: f32[8,128], index: 18, kind: output, shape index: {0}]   ;;  %s6785_s19 = inlined_call_operand.vmem [shape: f32[1,128], index: 19, kind: output, shape index: {1}]  }
   0x1   :  { %6969 = sst [smem:[#allocation45_spill]] %s6766_s0 }
   0x2   :  { %6970 = sst [smem:[#allocation46_spill]] %s6767_s1 }
   0x3   :  { %6971 = sst [smem:[#allocation47_spill]] %s6768_s2 }
   0x4   :  { %6972 = sst [smem:[#allocation48_spill]] %s6769_s3 }
   0x5   :  { %25 = vsyncpa [#allocation4], 0 }
   0x6   :  { %26 = vsyncpa [#allocation7], 0 }
   0x7   :  { %27 = vsyncpa [#allocation10], 0 }
   0x8   :  { %28 = vsyncpa [#allocation5], 0  ;;  %s4719_s0 = smov [#allocation6]   ;;  %s4720_s20 = smov [#allocation9]  }
   0x9   :  { %s62_s30 = sshll.u32 %s4719_s0, 4  ;;  %s92_s21 = sshll.u32 %s4720_s20, 4  ;;  %s63_s30 = int_to_ptr.vmem [resolvable:$true] %s62_s30  ;;  %s93_s21 = int_to_ptr.vmem [resolvable:$true] %s92_s21 }
   0xa   :  { %s4599_s1 = scalar_lea.vmem %s63_s30, 8192  ;;  %p4604_p1 = scmp.lt.s32.totalorder %s63_s30, %s63_s30 }
   0xb   :  { %p4600_p0 = scmp.ne.s32.totalorder %s63_s30, %s4599_s1  ;;  %p4605_p2 = scmp.lt.s32.totalorder %s4599_s1, %s4599_s1 }
   0xd   :  { %p4606_p3 = por %p4605_p2, %p4604_p1 }
   0xf   :  { %p4607_p4 = pnand %p4606_p3, %p4600_p0 }
  0x11   :  { %4610 = shalt.err (!%p4607_p4)
}
  0x12   :  { %s4721_s22 = smov 512   ;;  %s4722_s2 = smov 32  }
  0x13   :  { %68 = dma.hbm_to_vmem [thread:$0]  %s6775_s9, 8192, %s63_s30, [#allocation7], %s4721_s22, %s4721_s22, %s4722_s2  }
  0x14   :  { %s4619_s25 = scalar_lea.vmem %s93_s21, 8192  ;;  %p4624_p6 = scmp.lt.s32.totalorder %s93_s21, %s93_s21 }
  0x15   :  { %p4620_p5 = scmp.ne.s32.totalorder %s93_s21, %s4619_s25  ;;  %p4625_p7 = scmp.lt.s32.totalorder %s4619_s25, %s4619_s25 }
  0x17   :  { %p4626_p8 = por %p4625_p7, %p4624_p6 }
  0x19   :  { %p4627_p9 = pnand %p4626_p8, %p4620_p5 }
  0x1b   :  { %4630 = shalt.err (!%p4627_p9)
}
  0x1c   :  { %98 = dma.hbm_to_vmem [thread:$0]  %s6780_s14, 8192, %s93_s21, [#allocation10], %s4721_s22, %s4721_s22, %s4722_s2  }
  0x1d   :  { %s4723_s27 = smov [#allocation3]   ;;  %s4724_s29 = smov [#allocation8]  }
  0x1e   :  { %s50_s28 = sshll.u32 %s4723_s27, 4  ;;  %s80_s0 = sshll.u32 %s4724_s29, 4  ;;  %s51_s28 = int_to_ptr.vmem [resolvable:$true] %s50_s28  ;;  %s81_s0 = int_to_ptr.vmem [resolvable:$true] %s80_s0 }
  0x1f   :  { %s4639_s9 = scalar_lea.vmem %s51_s28, 2048  ;;  %p4644_p11 = scmp.lt.s32.totalorder %s51_s28, %s51_s28 }
  0x20   :  { %p4640_p10 = scmp.ne.s32.totalorder %s51_s28, %s4639_s9  ;;  %p4645_p12 = scmp.lt.s32.totalorder %s4639_s9, %s4639_s9 }
  0x22   :  { %p4646_p13 = por %p4645_p12, %p4644_p11 }
  0x24   :  { %p4647_p0 = pnand %p4646_p13, %p4640_p10 }
  0x26   :  { %4650 = shalt.err (!%p4647_p0)
}
  0x27   :  { %56 = dma.hbm_to_vmem [thread:$0]  %s6774_s8, 2048, %s51_s28, [#allocation4], %s4721_s22, %s4721_s22, %s4722_s2  }
  0x28   :  { %s4659_s14 = scalar_lea.vmem %s81_s0, 2048  ;;  %p4664_p2 = scmp.lt.s32.totalorder %s81_s0, %s81_s0 }
  0x29   :  { %p4660_p1 = scmp.ne.s32.totalorder %s81_s0, %s4659_s14  ;;  %p4665_p3 = scmp.lt.s32.totalorder %s4659_s14, %s4659_s14 }
  0x2b   :  { %p4666_p4 = por %p4665_p3, %p4664_p2 }
  0x2d   :  { %p4667_p5 = pnand %p4666_p4, %p4660_p1 }
  0x2f   :  { %4670 = shalt.err (!%p4667_p5)
}
  0x30   :  { %86 = dma.hbm_to_vmem [thread:$0]  %s6779_s13, 2048, %s81_s0, [#allocation7], %s4721_s22, %s4721_s22, %s4722_s2  }
  0x31   :  { %s4725_s23 = smov [#allocation11]  }
  0x32   :  { %s106_s24 = sshll.u32 %s4725_s23, 4  ;;  %s107_s24 = int_to_ptr.vmem [resolvable:$true] %s106_s24 }
  0x33   :  { %s4679_s25 = scalar_lea.vmem %s107_s24, 2048  ;;  %p4684_p7 = scmp.lt.s32.totalorder %s107_s24, %s107_s24 }
  0x34   :  { %p4680_p6 = scmp.ne.s32.totalorder %s107_s24, %s4679_s25  ;;  %p4685_p8 = scmp.lt.s32.totalorder %s4679_s25, %s4679_s25 }
  0x36   :  { %p4686_p9 = por %p4685_p8, %p4684_p7 }
  0x38   :  { %p4687_p10 = pnand %p4686_p9, %p4680_p6 }
  0x3a   :  { %4690 = shalt.err (!%p4687_p10)
}
  0x3b   :  { %s4726_s8 = smov 128   ;;  %s4727_s3 = smov 8  }
  0x3c   :  { %112 = dma.hbm_to_vmem [thread:$0]  %s6782_s16, 2048, %s107_s24, [#allocation10], %s4726_s8, %s4726_s8, %s4727_s3  }
  0x3d   :  { %4711 = dma.done.wait [#allocation4], 2048  }
  0x3e   :  { %4712 = vsyncadd [#allocation4], 4294965248 }
  0x3f   :  { %4713 = dma.done.wait [#allocation7], 10240  }
  0x40   :  { %4714 = vsyncadd [#allocation7], 4294957056 }
  0x41   :  { %4715 = dma.done.wait [#allocation10], 10240  }
  0x42   :  { %4716 = vsyncadd [#allocation10], 4294957056  ;;  %v6786_v0 = vmov 0.0   ;;  %v144_v1 = vld [vmem:[#allocation3 + $0x68] sm:$0xff]  ;;  %v4861_v2 = vld [vmem:[#allocation6 + $0x1f8] sm:$0xff]  ;;  %s6975_s22 = sld [smem:[#allocation45_spill]] }
  0x43   :  { %237 = vmatprep.mubr.f32.mxu0 %v6786_v0  ;;  %516 = vmatprep.mubr.f32.mxu1 %v6786_v0  ;;  %6973 = vst [vmem:[#allocation17_spill] sm:$0xff] %v4861_v2  ;;  %v143_v3 = vld [vmem:[#allocation3 + $0x60] sm:$0xff]  ;;  %v4864_v4 = vld [vmem:[#allocation6 + $0x1f0] sm:$0xff]  ;;  %v140_v5 = vld [vmem:[#allocation3 + $0x48] sm:$0xff]  ;;  %vm169_vm0 = vcmask 261120   ;;  %s6987_s29 = sld [smem:[#allocation47_spill]] }
  0x44   :  { %197 = vmatprep.subr.mxu0 %v144_v1  ;;  %452 = vmatprep.subr.mxu1 %v4861_v2  ;;  %v4866_v6 = vld [vmem:[#allocation6 + $0x1d8] sm:$0xff]  ;;  %v139_v7 = vld [vmem:[#allocation3 + $0x40] sm:$0xff]  ;;  %v4869_v8 = vld [vmem:[#allocation6 + $0x1d0] sm:$0xff]  ;;  %s7004_s20 = sld [smem:[#allocation48_spill]]  ;;  %vm4729_vm1 = vmmov 0   ;;  %vm1944_vm2 = vcmask 1040384  }
  0x45   :  { %198 = vmatpush1.msra.mxu0 %v143_v3  ;;  %453 = vmatpush1.msra.mxu1 %v4864_v4  ;;  %v136_v9 = vld [vmem:[#allocation3 + $0x28] sm:$0xff]  ;;  %v4872_v10 = vld [vmem:[#allocation6 + $0x1b8] sm:$0xff]  ;;  %v135_v11 = vld [vmem:[#allocation3 + $0x20] sm:$0xff] }
  0x46   :  { %199 = vmatprep.subr.mxu0 %v140_v5  ;;  %454 = vmatprep.subr.mxu1 %v4866_v6  ;;  %v4874_v12 = vld [vmem:[#allocation6 + $0x1b0] sm:$0xff]  ;;  %v132_v13 = vld [vmem:[#allocation3 + $0x8] sm:$0xff]  ;;  %v4877_v14 = vld [vmem:[#allocation6 + $0x198] sm:$0xff] }
  0x47   :  { %6974 = vst [vmem:[#allocation18_spill] sm:$0xff] %v4874_v12  ;;  %200 = vmatpush1.msra.mxu0 %v139_v7  ;;  %455 = vmatpush1.msra.mxu1 %v4869_v8  ;;  %v131_v15 = vld [vmem:[#allocation3] sm:$0xff]  ;;  %v4880_v16 = vld [vmem:[#allocation6 + $0x190] sm:$0xff]  ;;  %v146_v18 = vld [vmem:[#allocation3 + $0x78] sm:$0xff] }
  0x48   :  { %201 = vmatprep.subr.mxu0 %v136_v9  ;;  %456 = vmatprep.subr.mxu1 %v4872_v10  ;;  %v130_v17 = vld [vmem:[%s6975_s22] sm:$0xff]  ;;  %v145_v20 = vld [vmem:[#allocation3 + $0x70] sm:$0xff]  ;;  %v4911_v34 = vld [vmem:[#allocation6 + $0x1e8] sm:$0xff] }
  0x49   :  { %202 = vmatpush1.msra.mxu0 %v135_v11  ;;  %457 = vmatpush1.msra.mxu1 %v4874_v12  ;;  %v4887_v19 = vld [vmem:[#allocation6 + $0x178] sm:$0xff]  ;;  %v4890_v21 = vld [vmem:[#allocation6 + $0x170] sm:$0xff]  ;;  %6976 = vst [vmem:[#allocation19_spill] sm:$0xff] %v4911_v34  ;;  %v4916_v36 = vld [vmem:[#allocation6 + $0x1e0] sm:$0xff] }
  0x4a   :  { %203 = vmatprep.subr.mxu0 %v132_v13  ;;  %458 = vmatprep.subr.mxu1 %v4877_v14  ;;  %v142_v22 = vld [vmem:[#allocation3 + $0x58] sm:$0xff]  ;;  %v141_v24 = vld [vmem:[#allocation3 + $0x50] sm:$0xff]  ;;  %v4922_v38 = vld [vmem:[#allocation6 + $0x1c8] sm:$0xff] }
  0x4b   :  { %204 = vmatpush1.msra.mxu0 %v131_v15  ;;  %459 = vmatpush1.msra.mxu1 %v4880_v16  ;;  %v4893_v23 = vld [vmem:[#allocation6 + $0x158] sm:$0xff]  ;;  %v4896_v25 = vld [vmem:[#allocation6 + $0x150] sm:$0xff]  ;;  %v4928_v40 = vld [vmem:[#allocation6 + $0x1c0] sm:$0xff] }
  0x4c   :  { %4279 = vmatmul.mubr.msk.f32.vlgmr.msra.gmra.mxu0 %vm169_vm0, %v130_v17  ;;  %268 = vmatprep.subr.mxu0 %v146_v18  ;;  %v138_v26 = vld [vmem:[#allocation3 + $0x38] sm:$0xff]  ;;  %v137_v28 = vld [vmem:[#allocation3 + $0x30] sm:$0xff]  ;;  %v4934_v42 = vld [vmem:[#allocation6 + $0x1a8] sm:$0xff] }
  0x4d   :  { %460 = vmatprep.subr.mxu1 %v4887_v19  ;;  %269 = vmatpush1.msra.mxu0 %v145_v20  ;;  %v4899_v27 = vld [vmem:[#allocation6 + $0x138] sm:$0xff]  ;;  %v4902_v29 = vld [vmem:[#allocation6 + $0x130] sm:$0xff]  ;;  %v4940_v44 = vld [vmem:[#allocation6 + $0x1a0] sm:$0xff] }
  0x4e   :  { %461 = vmatpush1.msra.mxu1 %v4890_v21  ;;  %270 = vmatprep.subr.mxu0 %v142_v22  ;;  %v134_v30 = vld [vmem:[#allocation3 + $0x18] sm:$0xff]  ;;  %v133_v32 = vld [vmem:[#allocation3 + $0x10] sm:$0xff]  ;;  %v4946_v46 = vld [vmem:[#allocation6 + $0x188] sm:$0xff] }
  0x4f   :  { %462 = vmatprep.subr.mxu1 %v4893_v23  ;;  %271 = vmatpush1.msra.mxu0 %v141_v24  ;;  %v4905_v31 = vld [vmem:[#allocation6 + $0x118] sm:$0xff]  ;;  %v4908_v33 = vld [vmem:[#allocation6 + $0x110] sm:$0xff]  ;;  %v4952_v48 = vld [vmem:[#allocation6 + $0x180] sm:$0xff] }
  0x50   :  { %463 = vmatpush1.msra.mxu1 %v4896_v25  ;;  %272 = vmatprep.subr.mxu0 %v138_v26  ;;  %v4914_v35 = vld [vmem:[#allocation6 + $0xf8] sm:$0xff]  ;;  %v4920_v37 = vld [vmem:[#allocation6 + $0xf0] sm:$0xff]  ;;  %v4958_v50 = vld [vmem:[#allocation6 + $0x168] sm:$0xff] }
  0x51   :  { %464 = vmatprep.subr.mxu1 %v4899_v27  ;;  %273 = vmatpush1.msra.mxu0 %v137_v28  ;;  %v4926_v39 = vld [vmem:[#allocation6 + $0xd8] sm:$0xff]  ;;  %v4932_v41 = vld [vmem:[#allocation6 + $0xd0] sm:$0xff]  ;;  %v4964_v52 = vld [vmem:[#allocation6 + $0x160] sm:$0xff] }
  0x52   :  { %465 = vmatpush1.msra.mxu1 %v4902_v29  ;;  %274 = vmatprep.subr.mxu0 %v134_v30  ;;  %v4938_v43 = vld [vmem:[#allocation6 + $0xb8] sm:$0xff]  ;;  %v4944_v45 = vld [vmem:[#allocation6 + $0xb0] sm:$0xff]  ;;  %v4970_v54 = vld [vmem:[#allocation6 + $0x148] sm:$0xff] }
  0x53   :  { %466 = vmatprep.subr.mxu1 %v4905_v31  ;;  %275 = vmatpush1.msra.mxu0 %v133_v32  ;;  %v4950_v47 = vld [vmem:[#allocation6 + $0x98] sm:$0xff]  ;;  %v4956_v49 = vld [vmem:[#allocation6 + $0x90] sm:$0xff]  ;;  %v4976_v56 = vld [vmem:[#allocation6 + $0x140] sm:$0xff] }
  0x54   :  { %308 = vmatprep.mubr.f32.mxu0 %v6786_v0  ;;  %467 = vmatpush1.msra.mxu1 %v4908_v33  ;;  %6977 = vst [vmem:[#allocation20_spill] sm:$0xff] %v4950_v47  ;;  %6978 = vst [vmem:[#allocation21_spill] sm:$0xff] %v4956_v49  ;;  %v4962_v51 = vld [vmem:[#allocation6 + $0x78] sm:$0xff]  ;;  %v4968_v53 = vld [vmem:[#allocation6 + $0x70] sm:$0xff] }
  0x55   :  { %4280 = vmatmul.mubr.msk.f32.vlgmr.msra.gmra.mxu0 %vm169_vm0, %v130_v17  ;;  %381 = vmatprep.subr.mxu0 %v4911_v34  ;;  %6979 = vst [vmem:[#allocation22_spill] sm:$0xff] %v4962_v51  ;;  %6980 = vst [vmem:[#allocation23_spill] sm:$0xff] %v4968_v53  ;;  %v4974_v55 = vld [vmem:[#allocation6 + $0x58] sm:$0xff]  ;;  %v4980_v57 = vld [vmem:[#allocation6 + $0x50] sm:$0xff] }
  0x56   :  { %468 = vmatprep.subr.mxu1 %v4914_v35  ;;  %382 = vmatpush1.msra.mxu0 %v4916_v36  ;;  %6981 = vst [vmem:[#allocation24_spill] sm:$0xff] %v4974_v55  ;;  %6982 = vst [vmem:[#allocation25_spill] sm:$0xff] %v4980_v57  ;;  %v4982_v58 = vld [vmem:[#allocation6 + $0x128] sm:$0xff]  ;;  %v4986_v59 = vld [vmem:[#allocation6 + $0x38] sm:$0xff] }
  0x57   :  { %469 = vmatpush1.msra.mxu1 %v4920_v37  ;;  %383 = vmatprep.subr.mxu0 %v4922_v38  ;;  %6983 = vst [vmem:[#allocation26_spill] sm:$0xff] %v4986_v59  ;;  %v4988_v60 = vld [vmem:[#allocation6 + $0x120] sm:$0xff]  ;;  %v4992_v61 = vld [vmem:[#allocation6 + $0x30] sm:$0xff]  ;;  %v4994_v62 = vld [vmem:[#allocation6 + $0x108] sm:$0xff] }
  0x58   :  { %470 = vmatprep.subr.mxu1 %v4926_v39  ;;  %384 = vmatpush1.msra.mxu0 %v4928_v40  ;;  %6984 = vst [vmem:[#allocation27_spill] sm:$0xff] %v4992_v61  ;;  %v4998_v63 = vld [vmem:[#allocation6 + $0x18] sm:$0xff]  ;;  %v5000_v1 = vld [vmem:[#allocation6 + $0x100] sm:$0xff]  ;;  %v5004_v3 = vld [vmem:[#allocation6 + $0x10] sm:$0xff] }
  0x59   :  { %471 = vmatpush1.msra.mxu1 %v4932_v41  ;;  %385 = vmatprep.subr.mxu0 %v4934_v42  ;;  %6985 = vst [vmem:[#allocation28_spill] sm:$0xff] %v4998_v63  ;;  %6986 = vst [vmem:[#allocation29_spill] sm:$0xff] %v5004_v3  ;;  %v5006_v5 = vld [vmem:[#allocation6 + $0xe8] sm:$0xff]  ;;  %v315_v7 = vld [vmem:[%s6987_s29] sm:$0x1] }
  0x5a   :  { %472 = vmatprep.subr.mxu1 %v4938_v43  ;;  %386 = vmatpush1.msra.mxu0 %v4940_v44  ;;  %v5013_v9 = vld [vmem:[#allocation6 + $0xe0] sm:$0xff]  ;;  %v5017_v11 = vld [vmem:[#allocation6 + $0xc8] sm:$0xff] }
  0x5b   :  { %473 = vmatpush1.msra.mxu1 %v4944_v45  ;;  %387 = vmatprep.subr.mxu0 %v4946_v46  ;;  %v5021_v13 = vld [vmem:[#allocation6 + $0xc0] sm:$0xff]  ;;  %v5024_v15 = vld [vmem:[#allocation6 + $0xa8] sm:$0xff] }
  0x5c   :  { %474 = vmatprep.subr.mxu1 %v4950_v47  ;;  %388 = vmatpush1.msra.mxu0 %v4952_v48  ;;  %v5027_v17 = vld [vmem:[#allocation6 + $0xa0] sm:$0xff]  ;;  %v5031_v18 = vld [vmem:[#allocation6 + $0x88] sm:$0xff] }
  0x5d   :  { %475 = vmatpush1.msra.mxu1 %v4956_v49  ;;  %389 = vmatprep.subr.mxu0 %v4958_v50  ;;  %6988 = vst [vmem:[#allocation30_spill] sm:$0xff] %v5031_v18  ;;  %v5035_v20 = vld [vmem:[#allocation6 + $0x80] sm:$0xff]  ;;  %v5039_v22 = vld [vmem:[#allocation6 + $0x68] sm:$0xff] }
  0x5e   :  { %476 = vmatprep.subr.mxu1 %v4962_v51  ;;  %390 = vmatpush1.msra.mxu0 %v4964_v52  ;;  %6989 = vst [vmem:[#allocation31_spill] sm:$0xff] %v5035_v20  ;;  %6990 = vst [vmem:[#allocation32_spill] sm:$0xff] %v5039_v22  ;;  %v5043_v24 = vld [vmem:[#allocation6 + $0x60] sm:$0xff]  ;;  %v5047_v26 = vld [vmem:[#allocation6 + $0x48] sm:$0xff] }
  0x5f   :  { %477 = vmatpush1.msra.mxu1 %v4968_v53  ;;  %391 = vmatprep.subr.mxu0 %v4970_v54  ;;  %6991 = vst [vmem:[#allocation33_spill] sm:$0xff] %v5043_v24  ;;  %6992 = vst [vmem:[#allocation34_spill] sm:$0xff] %v5047_v26  ;;  %v5051_v28 = vld [vmem:[#allocation6 + $0x40] sm:$0xff]  ;;  %v5055_v30 = vld [vmem:[#allocation6 + $0x28] sm:$0xff] }
  0x60   :  { %478 = vmatprep.subr.mxu1 %v4974_v55  ;;  %392 = vmatpush1.msra.mxu0 %v4976_v56  ;;  %6993 = vst [vmem:[#allocation35_spill] sm:$0xff] %v5051_v28  ;;  %6994 = vst [vmem:[#allocation36_spill] sm:$0xff] %v5055_v30  ;;  %v5059_v32 = vld [vmem:[#allocation6 + $0x20] sm:$0xff] }
  0x61   :  { %479 = vmatpush1.msra.mxu1 %v4980_v57  ;;  %393 = vmatprep.subr.mxu0 %v4982_v58  ;;  %6995 = vst [vmem:[#allocation37_spill] sm:$0xff] %v5059_v32 }
  0x62   :  { %480 = vmatprep.subr.mxu1 %v4986_v59  ;;  %394 = vmatpush1.msra.mxu0 %v4988_v60 }
  0x63   :  { %481 = vmatpush1.msra.mxu1 %v4992_v61  ;;  %395 = vmatprep.subr.mxu0 %v4994_v62 }
  0x64   :  { %482 = vmatprep.subr.mxu1 %v4998_v63  ;;  %396 = vmatpush1.msra.mxu0 %v5000_v1 }
  0x65   :  { %483 = vmatpush1.msra.mxu1 %v5004_v3  ;;  %397 = vmatprep.subr.mxu0 %v5006_v5 }
  0x66   :  { %517 = vmatmul.mubr.f32.vlgmr.msra.gmra.mxu1 %v315_v7  ;;  %398 = vmatpush1.msra.mxu0 %v5013_v9 }
  0x67   :  { %399 = vmatprep.subr.mxu0 %v5017_v11  ;;  %445 = vmatprep.mubr.f32.mxu0 %v6786_v0  ;;  %v5063_v0 = vld [vmem:[#allocation6 + $0x8] sm:$0xff] }
  0x68   :  { %400 = vmatpush1.msra.mxu0 %v5021_v13  ;;  %616 = vmatprep.subr.mxu1 %v4861_v2  ;;  %6996 = vst [vmem:[#allocation38_spill] sm:$0xff] %v5063_v0 }
  0x69   :  { %401 = vmatprep.subr.mxu0 %v5024_v15  ;;  %617 = vmatpush1.msra.mxu1 %v4864_v4 }
  0x6a   :  { %402 = vmatpush1.msra.mxu0 %v5027_v17  ;;  %618 = vmatprep.subr.mxu1 %v4866_v6 }
  0x6b   :  { %403 = vmatprep.subr.mxu0 %v5031_v18  ;;  %619 = vmatpush1.msra.mxu1 %v4869_v8 }
  0x6c   :  { %404 = vmatpush1.msra.mxu0 %v5035_v20  ;;  %620 = vmatprep.subr.mxu1 %v4872_v10 }
  0x6d   :  { %405 = vmatprep.subr.mxu0 %v5039_v22  ;;  %621 = vmatpush1.msra.mxu1 %v4874_v12  ;;  %v5067_v12 = vld [vmem:[#allocation6] sm:$0xff] }
  0x6e   :  { %406 = vmatpush1.msra.mxu0 %v5043_v24  ;;  %622 = vmatprep.subr.mxu1 %v4877_v14  ;;  %6997 = vst [vmem:[#allocation39_spill] sm:$0xff] %v5067_v12 }
  0x6f   :  { %407 = vmatprep.subr.mxu0 %v5047_v26  ;;  %623 = vmatpush1.msra.mxu1 %v4880_v16 }
  0x70   :  { %408 = vmatpush1.msra.mxu0 %v5051_v28  ;;  %624 = vmatprep.subr.mxu1 %v4887_v19 }
  0x71   :  { %409 = vmatprep.subr.mxu0 %v5055_v30  ;;  %625 = vmatpush1.msra.mxu1 %v4890_v21 }
  0x72   :  { %410 = vmatpush1.msra.mxu0 %v5059_v32  ;;  %626 = vmatprep.subr.mxu1 %v4893_v23 }
  0x73   :  { %411 = vmatprep.subr.mxu0 %v5063_v0  ;;  %627 = vmatpush1.msra.mxu1 %v4896_v25 }
  0x74   :  { %412 = vmatpush1.msra.mxu0 %v5067_v12  ;;  %628 = vmatprep.subr.mxu1 %v4899_v27 }
  0x75   :  { %446 = vmatmul.mubr.f32.vlgmr.msra.gmra.mxu0 %v315_v7  ;;  %545 = vmatprep.subr.mxu0 %v4911_v34  ;;  %v6998_v7 = vmov 0.0  }
  0x76   :  { %546 = vmatpush1.msra.mxu0 %v4916_v36  ;;  %629 = vmatpush1.msra.mxu1 %v4902_v29 }
  0x77   :  { %547 = vmatprep.subr.mxu0 %v4922_v38  ;;  %630 = vmatprep.subr.mxu1 %v4905_v31 }
  0x78   :  { %548 = vmatpush1.msra.mxu0 %v4928_v40  ;;  %631 = vmatpush1.msra.mxu1 %v4908_v33 }
  0x79   :  { %549 = vmatprep.subr.mxu0 %v4934_v42  ;;  %632 = vmatprep.subr.mxu1 %v4914_v35 }
  0x7a   :  { %550 = vmatpush1.msra.mxu0 %v4940_v44  ;;  %633 = vmatpush1.msra.mxu1 %v4920_v37 }
  0x7b   :  { %551 = vmatprep.subr.mxu0 %v4946_v46  ;;  %634 = vmatprep.subr.mxu1 %v4926_v39 }
  0x7c   :  { %552 = vmatpush1.msra.mxu0 %v4952_v48  ;;  %635 = vmatpush1.msra.mxu1 %v4932_v41 }
  0x7d   :  { %553 = vmatprep.subr.mxu0 %v4958_v50  ;;  %636 = vmatprep.subr.mxu1 %v4938_v43 }
  0x7e   :  { %554 = vmatpush1.msra.mxu0 %v4964_v52  ;;  %637 = vmatpush1.msra.mxu1 %v4944_v45 }
  0x7f   :  { %555 = vmatprep.subr.mxu0 %v4970_v54  ;;  %638 = vmatprep.subr.mxu1 %v4950_v47 }
  0x80   :  { %556 = vmatpush1.msra.mxu0 %v4976_v56  ;;  %639 = vmatpush1.msra.mxu1 %v4956_v49 }
  0x81   :  { %557 = vmatprep.subr.mxu0 %v4982_v58  ;;  %640 = vmatprep.subr.mxu1 %v4962_v51 }
  0x82   :  { %558 = vmatpush1.msra.mxu0 %v4988_v60  ;;  %641 = vmatpush1.msra.mxu1 %v4968_v53 }
  0x83   :  { %559 = vmatprep.subr.mxu0 %v4994_v62  ;;  %642 = vmatprep.subr.mxu1 %v4974_v55 }
  0x84   :  { %560 = vmatpush1.msra.mxu0 %v5000_v1  ;;  %643 = vmatpush1.msra.mxu1 %v4980_v57 }
  0x85   :  { %561 = vmatprep.subr.mxu0 %v5006_v5  ;;  %644 = vmatprep.subr.mxu1 %v4986_v59 }
  0x86   :  { %562 = vmatpush1.msra.mxu0 %v5013_v9  ;;  %645 = vmatpush1.msra.mxu1 %v4992_v61  ;;  %v147_v61 = vld [vmem:[%s6776_s10] sm:$0xf] }
  0x87   :  { %563 = vmatprep.subr.mxu0 %v5017_v11  ;;  %646 = vmatprep.subr.mxu1 %v4998_v63 }
  0x88   :  { %564 = vmatpush1.msra.mxu0 %v5021_v13  ;;  %609 = vmatprep.mubr.f32.mxu0 %v6998_v7 }
  0x89   :  { %565 = vmatprep.subr.mxu0 %v5024_v15  ;;  %647 = vmatpush1.msra.mxu1 %v5004_v3 }
  0x8a   :  { %566 = vmatpush1.msra.mxu0 %v5027_v17  ;;  %680 = vmatprep.mubr.f32.mxu1 %v6998_v7 }
  0x8b   :  { %567 = vmatprep.subr.mxu0 %v5031_v18  ;;  %798 = vmatprep.subr.mxu1 %v4861_v2  ;;  %v6809_v2 = vlaneseq }
  0x8c   :  { %568 = vmatpush1.msra.mxu0 %v5035_v20 }
  0x8d   :  { %569 = vmatprep.subr.mxu0 %v5039_v22  ;;  %v5132_v3 = vshrl.u32 %v6809_v2, 7 }
  0x8e   :  { %570 = vmatpush1.msra.mxu0 %v5043_v24 }
  0x8f   :  { %571 = vmatprep.subr.mxu0 %v5047_v26  ;;  %6999 = vst [vmem:[#allocation40_spill] sm:$0xff] %v5132_v3  ;;  %v5135_v63 = vsub.s32 0, %v5132_v3  ;;  %v6834_v2 = vsub.s32 2, %v5132_v3  ;;  %v6839_v51 = vsub.s32 3, %v5132_v3 }
  0x90   :  { %572 = vmatpush1.msra.mxu0 %v5051_v28 }
  0x91   :  { %573 = vmatprep.subr.mxu0 %v5055_v30  ;;  %7000 = vst [vmem:[#allocation41_spill] sm:$0xff] %v5135_v63  ;;  %v160_v26 = vrot.slane %v147_v61, %v6834_v2 }
  0x92   :  { %574 = vmatpush1.msra.mxu0 %v5059_v32  ;;  %v5141_v32 = vsub.s32 1, %v5132_v3  ;;  %v7021_v3 = vld [vmem:[#allocation39_spill] sm:$0xff] }
  0x93   :  { %575 = vmatprep.subr.mxu0 %v5063_v0 }
  0x94   :  { %576 = vmatpush1.msra.mxu0 %v5067_v12  ;;  %7001 = vst [vmem:[#allocation42_spill] sm:$0xff] %v5141_v32  ;;  %v152_v12 = vrot.slane %v147_v61, %v5135_v63 }
  0x95   :  { %727 = vmatprep.subr.mxu0 %v4911_v34  ;;  %v156_v34 = vrot.slane %v147_v61, %v5141_v32 }
 0x10c   :  { %v239_v7 = vpop.f32.mrf.mxu0 }
 0x10d   :  { %v5146_v57 = vadd.f32 %v239_v7, %v152_v12 }
 0x10e   :  { %v241_v59 = vpop.f32.mrf.mxu0 }
 0x10f   :  { %7002 = vst [vmem:[#allocation43_spill] sm:$0xff] %v5146_v57  ;;  %v5148_v55 = vadd.f32 %v241_v59, %v156_v34  ;;  %v164_v34 = vrot.slane %v147_v61, %v6839_v51  ;;  %v316_v61 = vld [vmem:[%s7004_s20] sm:$0x1]  ;;  %v7020_v51 = vld [vmem:[#allocation28_spill] sm:$0xff] }
 0x111   :  { %7003 = vst [vmem:[#allocation44_spill] sm:$0xff] %v5148_v55 }
 0x115   :  { %v310_v0 = vpop.f32.mrf.mxu0 }
 0x116   :  { %v5155_v49 = vadd.f32 %v310_v0, %v160_v26 }
 0x117   :  { %v312_v30 = vpop.f32.mrf.mxu0 }
 0x118   :  { %v5160_v2 = vadd.f32 %v312_v30, %v164_v34 }
 0x126   :  { %v518_v32 = vpop.f32.mrf.mxu1 }
 0x127   :  { %v525_v59 = vadd.f32 %v518_v32, %v5155_v49 }
 0x128   :  { %v520_v7 = vpop.f32.mrf.mxu1 }
 0x135   :  { %v447_v28 = vpop.f32.mrf.mxu0 }
 0x136   :  { %v523_v53 = vadd.f32 %v447_v28, %v5146_v57  ;;  %v526_v28 = vadd.f32 %v520_v7, %v5160_v2 }
 0x137   :  { %v449_v24 = vpop.f32.mrf.mxu0 }
 0x138   :  { %v527_v22 = vmul.f32 0.5, %v523_v53  ;;  %v524_v63 = vadd.f32 %v449_v24, %v5148_v55  ;;  %v536_v53 = vmul.f32 0.5, %v526_v28 }
 0x13a   :  { %4359 = vtanh.f32 %v527_v22  ;;  %v531_v12 = vmul.f32 0.5, %v524_v63 }
 0x13c   :  { %4361 = vtanh.f32 %v531_v12 }
 0x13d   :  { %4363 = vtanh.f32 %v525_v59 }
 0x13e   :  { %4365 = vtanh.f32 %v536_v53  ;;  %v7006_v53 = vld [vmem:[#allocation21_spill] sm:$0xff] }
 0x147   :  { %v4360_v57 = vpop.eup %4359 }
 0x148   :  { %v529_v24 = vadd.f32 1.0, %v4360_v57 }
 0x149   :  { %v4362_v55 = vpop.eup %4361 }
 0x14a   :  { %v530_v0 = vmul.f32 0.5, %v529_v24  ;;  %v533_v22 = vadd.f32 1.0, %v4362_v55  ;;  %v4364_v26 = vpop.eup %4363  ;;  %v7005_v55 = vld [vmem:[#allocation18_spill] sm:$0xff]  ;;  %v7007_v24 = vld [vmem:[#allocation32_spill] sm:$0xff] }
 0x14b   :  { %v4366_v34 = vpop.eup %4365 }
 0x14c   :  { %v534_v63 = vmul.f32 0.5, %v533_v22  ;;  %v541_v32 = vmul.f32 %v4364_v26, %v530_v0  ;;  %v538_v59 = vadd.f32 1.0, %v4366_v34  ;;  %v7008_v0 = vld [vmem:[#allocation22_spill] sm:$0xff]  ;;  %v7009_v22 = vld [vmem:[#allocation33_spill] sm:$0xff]  ;;  %v7012_v26 = vld [vmem:[#allocation24_spill] sm:$0xff] }
 0x14d   :  { %v7015_v34 = vld [vmem:[#allocation36_spill] sm:$0xff] }
 0x14e   :  { %v540_v12 = vmul.f32 %v534_v63, %v316_v61  ;;  %v539_v7 = vmul.f32 0.5, %v538_v59  ;;  %v7010_v61 = vld [vmem:[#allocation23_spill] sm:$0xff]  ;;  %v7011_v63 = vld [vmem:[#allocation34_spill] sm:$0xff] }
 0x14f   :  { %v7016_v59 = vld [vmem:[#allocation26_spill] sm:$0xff] }
 0x150   :  { %v5166_v30 = vadd.f32 %v541_v32, %v540_v12  ;;  %v7013_v32 = vld [vmem:[#allocation35_spill] sm:$0xff]  ;;  %v7014_v12 = vld [vmem:[#allocation25_spill] sm:$0xff] }
 0x152   :  { %4367 = vtanh.f32 %v5166_v30 }
 0x15f   :  { %v4368_v57 = vpop.eup %4367 }
 0x160   :  { %v544_v28 = vmul.f32 %v4368_v57, %v539_v7  ;;  %v7017_v7 = vld [vmem:[#allocation37_spill] sm:$0xff]  ;;  %v7018_v57 = vld [vmem:[#allocation27_spill] sm:$0xff] }
 0x162   :  { %610 = vmatmul.mubr.f32.vlgmr.msra.gmra.mxu0 %v544_v28  ;;  %681 = vmatmul.mubr.f32.vlgmr.msra.gmra.mxu1 %v544_v28  ;;  %v7019_v28 = vld [vmem:[#allocation38_spill] sm:$0xff] }
 0x163   :  { %728 = vmatpush1.msra.mxu0 %v4916_v36  ;;  %799 = vmatpush1.msra.mxu1 %v4864_v4 }
 0x164   :  { %729 = vmatprep.subr.mxu0 %v4922_v38  ;;  %800 = vmatprep.subr.mxu1 %v4866_v6 }
 0x165   :  { %730 = vmatpush1.msra.mxu0 %v4928_v40  ;;  %801 = vmatpush1.msra.mxu1 %v4869_v8 }
 0x166   :  { %731 = vmatprep.subr.mxu0 %v4934_v42  ;;  %802 = vmatprep.subr.mxu1 %v4872_v10 }
 0x167   :  { %732 = vmatpush1.msra.mxu0 %v4940_v44  ;;  %803 = vmatpush1.msra.mxu1 %v7005_v55 }
 0x168   :  { %733 = vmatprep.subr.mxu0 %v4946_v46  ;;  %804 = vmatprep.subr.mxu1 %v4877_v14 }
 0x169   :  { %734 = vmatpush1.msra.mxu0 %v4952_v48  ;;  %805 = vmatpush1.msra.mxu1 %v4880_v16 }
 0x16a   :  { %735 = vmatprep.subr.mxu0 %v4958_v50  ;;  %806 = vmatprep.subr.mxu1 %v4887_v19 }
 0x16b   :  { %736 = vmatpush1.msra.mxu0 %v4964_v52  ;;  %807 = vmatpush1.msra.mxu1 %v4890_v21 }
 0x16c   :  { %737 = vmatprep.subr.mxu0 %v4970_v54  ;;  %808 = vmatprep.subr.mxu1 %v4893_v23 }
 0x16d   :  { %738 = vmatpush1.msra.mxu0 %v4976_v56  ;;  %809 = vmatpush1.msra.mxu1 %v4896_v25 }
 0x16e   :  { %739 = vmatprep.subr.mxu0 %v4982_v58  ;;  %810 = vmatprep.subr.mxu1 %v4899_v27 }
 0x16f   :  { %740 = vmatpush1.msra.mxu0 %v4988_v60  ;;  %811 = vmatpush1.msra.mxu1 %v4902_v29 }
 0x170   :  { %741 = vmatprep.subr.mxu0 %v4994_v62  ;;  %812 = vmatprep.subr.mxu1 %v4905_v31 }
 0x171   :  { %742 = vmatpush1.msra.mxu0 %v5000_v1  ;;  %813 = vmatpush1.msra.mxu1 %v4908_v33 }
 0x172   :  { %743 = vmatprep.subr.mxu0 %v5006_v5  ;;  %814 = vmatprep.subr.mxu1 %v4914_v35 }
 0x173   :  { %744 = vmatpush1.msra.mxu0 %v5013_v9  ;;  %815 = vmatpush1.msra.mxu1 %v4920_v37 }
 0x174   :  { %745 = vmatprep.subr.mxu0 %v5017_v11  ;;  %816 = vmatprep.subr.mxu1 %v4926_v39 }
 0x175   :  { %746 = vmatpush1.msra.mxu0 %v5021_v13  ;;  %817 = vmatpush1.msra.mxu1 %v4932_v41 }
 0x176   :  { %747 = vmatprep.subr.mxu0 %v5024_v15  ;;  %818 = vmatprep.subr.mxu1 %v4938_v43 }
 0x177   :  { %748 = vmatpush1.msra.mxu0 %v5027_v17  ;;  %819 = vmatpush1.msra.mxu1 %v4944_v45 }
 0x178   :  { %749 = vmatprep.subr.mxu0 %v5031_v18  ;;  %820 = vmatprep.subr.mxu1 %v4950_v47 }
 0x179   :  { %750 = vmatpush1.msra.mxu0 %v5035_v20  ;;  %821 = vmatpush1.msra.mxu1 %v7006_v53 }
 0x17a   :  { %751 = vmatprep.subr.mxu0 %v7007_v24  ;;  %822 = vmatprep.subr.mxu1 %v7008_v0 }
 0x17b   :  { %752 = vmatpush1.msra.mxu0 %v7009_v22  ;;  %823 = vmatpush1.msra.mxu1 %v7010_v61  ;;  %v7026_v61 = vld [vmem:[#allocation43_spill] sm:$0xff] }
 0x17c   :  { %753 = vmatprep.subr.mxu0 %v7011_v63  ;;  %824 = vmatprep.subr.mxu1 %v7012_v26  ;;  %v7022_v63 = vmov 0.0   ;;  %v7023_v26 = vld [vmem:[#allocation29_spill] sm:$0xff] }
 0x17d   :  { %754 = vmatpush1.msra.mxu0 %v7013_v32  ;;  %825 = vmatpush1.msra.mxu1 %v7014_v12  ;;  %v7024_v12 = vld [vmem:[#allocation19_spill] sm:$0xff] }
 0x17e   :  { %755 = vmatprep.subr.mxu0 %v7015_v34  ;;  %826 = vmatprep.subr.mxu1 %v7016_v59  ;;  %v7025_v34 = vld [vmem:[#allocation17_spill] sm:$0xff] }
 0x17f   :  { %756 = vmatpush1.msra.mxu0 %v7017_v7  ;;  %827 = vmatpush1.msra.mxu1 %v7018_v57 }
 0x180   :  { %757 = vmatprep.subr.mxu0 %v7019_v28  ;;  %828 = vmatprep.subr.mxu1 %v7020_v51 }
 0x181   :  { %758 = vmatpush1.msra.mxu0 %v7021_v3  ;;  %791 = vmatprep.mubr.f32.mxu0 %v7022_v63  ;;  %v7027_v3 = vld [vmem:[#allocation44_spill] sm:$0xff] }
 0x182   :  { %829 = vmatpush1.msra.mxu1 %v7023_v26  ;;  %862 = vmatprep.mubr.f32.mxu1 %v7022_v63 }
 0x183   :  { %909 = vmatprep.subr.mxu0 %v7024_v12  ;;  %980 = vmatprep.subr.mxu1 %v7025_v34 }
 0x222   :  { %v611_v59 = vpop.f32.mrf.mxu0  ;;  %v682_v32 = vpop.f32.mrf.mxu1 }
 0x223   :  { %v691_v7 = vrot.slane %v611_v59, 7  ;;  %v693_v0 = vrot.slane %v682_v32, 7 }
 0x224   :  { %v613_v57 = vpop.f32.mrf.mxu0  ;;  %v684_v26 = vpop.f32.mrf.mxu1 }
 0x225   :  { %v699_v28 = vadd.f32 %v691_v7, %v7026_v61  ;;  %v692_v22 = vrot.slane %v613_v57, 7  ;;  %v701_v63 = vadd.f32 %v693_v0, %v5155_v49  ;;  %v694_v12 = vrot.slane %v684_v26, 7 }
 0x227   :  { %v703_v51 = vmul.f32 0.5, %v699_v28  ;;  %v700_v24 = vadd.f32 %v692_v22, %v7027_v3  ;;  %v702_v34 = vadd.f32 %v694_v12, %v5160_v2  ;;  %v717_v22 = vrot.slane %v5166_v30, 7  ;;  %v7030_v30 = vld [vmem:[#allocation31_spill] sm:$0xff] }
 0x229   :  { %4369 = vtanh.f32 %v703_v51  ;;  %v707_v53 = vmul.f32 0.5, %v700_v24  ;;  %v712_v59 = vmul.f32 0.5, %v702_v34  ;;  %v7031_v34 = vld [vmem:[#allocation21_spill] sm:$0xff] }
 0x22b   :  { %4371 = vtanh.f32 %v707_v53 }
 0x22c   :  { %4373 = vtanh.f32 %v701_v63 }
 0x22d   :  { %4375 = vtanh.f32 %v712_v59  ;;  %v7032_v59 = vld [vmem:[#allocation32_spill] sm:$0xff] }
 0x236   :  { %v4370_v20 = vpop.eup %4369 }
 0x237   :  { %v705_v47 = vadd.f32 1.0, %v4370_v20 }
 0x238   :  { %v4372_v18 = vpop.eup %4371 }
 0x239   :  { %v706_v7 = vmul.f32 0.5, %v705_v47  ;;  %v709_v57 = vadd.f32 1.0, %v4372_v18  ;;  %v4374_v51 = vpop.eup %4373  ;;  %v7028_v47 = vld [vmem:[#allocation30_spill] sm:$0xff]  ;;  %v7029_v18 = vld [vmem:[#allocation20_spill] sm:$0xff] }
 0x23a   :  { %v4376_v53 = vpop.eup %4375 }
 0x23b   :  { %v710_v32 = vmul.f32 0.5, %v709_v57  ;;  %v720_v28 = vmul.f32 %v4374_v51, %v706_v7  ;;  %v714_v0 = vadd.f32 1.0, %v4376_v53  ;;  %v7033_v7 = vld [vmem:[#allocation22_spill] sm:$0xff]  ;;  %v7034_v57 = vld [vmem:[#allocation33_spill] sm:$0xff]  ;;  %v7037_v51 = vld [vmem:[#allocation24_spill] sm:$0xff] }
 0x23c   :  { %v7040_v53 = vld [vmem:[#allocation36_spill] sm:$0xff] }
 0x23d   :  { %v719_v24 = vmul.f32 %v717_v22, %v710_v32  ;;  %v715_v63 = vmul.f32 0.5, %v714_v0  ;;  %v7035_v32 = vld [vmem:[#allocation23_spill] sm:$0xff]  ;;  %v7036_v22 = vld [vmem:[#allocation34_spill] sm:$0xff] }
 0x23e   :  { %v7041_v0 = vld [vmem:[#allocation26_spill] sm:$0xff] }
 0x23f   :  { %v5240_v3 = vadd.f32 %v720_v28, %v719_v24  ;;  %v7038_v24 = vld [vmem:[#allocation35_spill] sm:$0xff]  ;;  %v7039_v28 = vld [vmem:[#allocation25_spill] sm:$0xff] }
 0x241   :  { %4377 = vtanh.f32 %v5240_v3 }
 0x24e   :  { %v4378_v26 = vpop.eup %4377 }
 0x24f   :  { %v723_v12 = vmul.f32 %v4378_v26, %v715_v63  ;;  %v7042_v63 = vld [vmem:[#allocation37_spill] sm:$0xff]  ;;  %v7043_v26 = vld [vmem:[#allocation27_spill] sm:$0xff] }
 0x251   :  { %v725_v20 = vrot.slane %v723_v12, 1  ;;  %v7044_v12 = vld [vmem:[#allocation38_spill] sm:$0xff] }
 0x253   :  { %792 = vmatmul.mubr.f32.vlgmr.msra.gmra.mxu0 %v725_v20  ;;  %863 = vmatmul.mubr.f32.vlgmr.msra.gmra.mxu1 %v725_v20  ;;  %v7045_v20 = vld [vmem:[#allocation28_spill] sm:$0xff] }
 0x254   :  { %910 = vmatpush1.msra.mxu0 %v4916_v36  ;;  %981 = vmatpush1.msra.mxu1 %v4864_v4 }
 0x255   :  { %911 = vmatprep.subr.mxu0 %v4922_v38  ;;  %982 = vmatprep.subr.mxu1 %v4866_v6 }
 0x256   :  { %912 = vmatpush1.msra.mxu0 %v4928_v40  ;;  %983 = vmatpush1.msra.mxu1 %v4869_v8 }
 0x257   :  { %913 = vmatprep.subr.mxu0 %v4934_v42  ;;  %984 = vmatprep.subr.mxu1 %v4872_v10 }
 0x258   :  { %914 = vmatpush1.msra.mxu0 %v4940_v44  ;;  %985 = vmatpush1.msra.mxu1 %v7005_v55 }
 0x259   :  { %915 = vmatprep.subr.mxu0 %v4946_v46  ;;  %986 = vmatprep.subr.mxu1 %v4877_v14 }
 0x25a   :  { %916 = vmatpush1.msra.mxu0 %v4952_v48  ;;  %987 = vmatpush1.msra.mxu1 %v4880_v16 }
 0x25b   :  { %917 = vmatprep.subr.mxu0 %v4958_v50  ;;  %988 = vmatprep.subr.mxu1 %v4887_v19 }
 0x25c   :  { %918 = vmatpush1.msra.mxu0 %v4964_v52  ;;  %989 = vmatpush1.msra.mxu1 %v4890_v21 }
 0x25d   :  { %919 = vmatprep.subr.mxu0 %v4970_v54  ;;  %990 = vmatprep.subr.mxu1 %v4893_v23 }
 0x25e   :  { %920 = vmatpush1.msra.mxu0 %v4976_v56  ;;  %991 = vmatpush1.msra.mxu1 %v4896_v25 }
 0x25f   :  { %921 = vmatprep.subr.mxu0 %v4982_v58  ;;  %992 = vmatprep.subr.mxu1 %v4899_v27 }
 0x260   :  { %922 = vmatpush1.msra.mxu0 %v4988_v60  ;;  %993 = vmatpush1.msra.mxu1 %v4902_v29 }
 0x261   :  { %923 = vmatprep.subr.mxu0 %v4994_v62  ;;  %994 = vmatprep.subr.mxu1 %v4905_v31 }
 0x262   :  { %924 = vmatpush1.msra.mxu0 %v5000_v1  ;;  %995 = vmatpush1.msra.mxu1 %v4908_v33 }
 0x263   :  { %925 = vmatprep.subr.mxu0 %v5006_v5  ;;  %996 = vmatprep.subr.mxu1 %v4914_v35 }
 0x264   :  { %926 = vmatpush1.msra.mxu0 %v5013_v9  ;;  %997 = vmatpush1.msra.mxu1 %v4920_v37 }
 0x265   :  { %927 = vmatprep.subr.mxu0 %v5017_v11  ;;  %998 = vmatprep.subr.mxu1 %v4926_v39 }
 0x266   :  { %928 = vmatpush1.msra.mxu0 %v5021_v13  ;;  %999 = vmatpush1.msra.mxu1 %v4932_v41 }
 0x267   :  { %929 = vmatprep.subr.mxu0 %v5024_v15  ;;  %1000 = vmatprep.subr.mxu1 %v4938_v43 }
 0x268   :  { %930 = vmatpush1.msra.mxu0 %v5027_v17  ;;  %1001 = vmatpush1.msra.mxu1 %v4944_v45 }
 0x269   :  { %931 = vmatprep.subr.mxu0 %v7028_v47  ;;  %1002 = vmatprep.subr.mxu1 %v7029_v18 }
 0x26a   :  { %932 = vmatpush1.msra.mxu0 %v7030_v30  ;;  %1003 = vmatpush1.msra.mxu1 %v7031_v34 }
 0x26b   :  { %933 = vmatprep.subr.mxu0 %v7032_v59  ;;  %1004 = vmatprep.subr.mxu1 %v7033_v7 }
 0x26c   :  { %934 = vmatpush1.msra.mxu0 %v7034_v57  ;;  %1005 = vmatpush1.msra.mxu1 %v7035_v32  ;;  %v7046_v32 = vld [vmem:[#allocation39_spill] sm:$0xff] }
 0x26d   :  { %935 = vmatprep.subr.mxu0 %v7036_v22  ;;  %1006 = vmatprep.subr.mxu1 %v7037_v51  ;;  %v7047_v22 = vmov 0.0   ;;  %v7048_v51 = vld [vmem:[#allocation29_spill] sm:$0xff] }
 0x26e   :  { %936 = vmatpush1.msra.mxu0 %v7038_v24  ;;  %1007 = vmatpush1.msra.mxu1 %v7039_v28  ;;  %v7049_v28 = vld [vmem:[#allocation19_spill] sm:$0xff] }
 0x26f   :  { %937 = vmatprep.subr.mxu0 %v7040_v53  ;;  %1008 = vmatprep.subr.mxu1 %v7041_v0  ;;  %v7050_v53 = vld [vmem:[#allocation17_spill] sm:$0xff] }
 0x270   :  { %938 = vmatpush1.msra.mxu0 %v7042_v63  ;;  %1009 = vmatpush1.msra.mxu1 %v7043_v26 }
 0x271   :  { %939 = vmatprep.subr.mxu0 %v7044_v12  ;;  %1010 = vmatprep.subr.mxu1 %v7045_v20 }
 0x272   :  { %940 = vmatpush1.msra.mxu0 %v7046_v32  ;;  %973 = vmatprep.mubr.f32.mxu0 %v7047_v22  ;;  %v7051_v32 = vld [vmem:[#allocation44_spill] sm:$0xff] }
 0x273   :  { %1011 = vmatpush1.msra.mxu1 %v7048_v51  ;;  %1044 = vmatprep.mubr.f32.mxu1 %v7047_v22 }
 0x274   :  { %1091 = vmatprep.subr.mxu0 %v7049_v28  ;;  %1162 = vmatprep.subr.mxu1 %v7050_v53 }
 0x313   :  { %v793_v0 = vpop.f32.mrf.mxu0  ;;  %v864_v24 = vpop.f32.mrf.mxu1 }
 0x314   :  { %v873_v63 = vrot.slane %v793_v0, 6  ;;  %v875_v7 = vrot.slane %v864_v24, 6 }
 0x315   :  { %v795_v26 = vpop.f32.mrf.mxu0  ;;  %v866_v51 = vpop.f32.mrf.mxu1 }
 0x316   :  { %v881_v12 = vadd.f32 %v873_v63, %v7026_v61  ;;  %v874_v57 = vrot.slane %v795_v26, 6  ;;  %v883_v22 = vadd.f32 %v875_v7, %v5155_v49  ;;  %v876_v28 = vrot.slane %v866_v51, 6 }
 0x318   :  { %v885_v20 = vmul.f32 0.5, %v881_v12  ;;  %v882_v59 = vadd.f32 %v874_v57, %v7051_v32  ;;  %v884_v53 = vadd.f32 %v876_v28, %v5160_v2  ;;  %v899_v57 = vrot.slane %v5240_v3, 7 }
 0x31a   :  { %4379 = vtanh.f32 %v885_v20  ;;  %v889_v34 = vmul.f32 0.5, %v882_v59  ;;  %v894_v0 = vmul.f32 0.5, %v884_v53 }
 0x31c   :  { %4381 = vtanh.f32 %v889_v34 }
 0x31d   :  { %4383 = vtanh.f32 %v883_v22 }
 0x31e   :  { %4385 = vtanh.f32 %v894_v0 }
 0x327   :  { %v4380_v30 = vpop.eup %4379 }
 0x328   :  { %v887_v18 = vadd.f32 1.0, %v4380_v30 }
 0x329   :  { %v4382_v47 = vpop.eup %4381 }
 0x32a   :  { %v888_v63 = vmul.f32 0.5, %v887_v18  ;;  %v891_v26 = vadd.f32 1.0, %v4382_v47  ;;  %v4384_v12 = vpop.eup %4383 }
 0x32b   :  { %v4386_v34 = vpop.eup %4385 }
 0x32c   :  { %v892_v24 = vmul.f32 0.5, %v891_v26  ;;  %v902_v20 = vmul.f32 %v4384_v12, %v888_v63  ;;  %v896_v7 = vadd.f32 1.0, %v4386_v34 }
 0x32e   :  { %v901_v59 = vmul.f32 %v899_v57, %v892_v24  ;;  %v897_v22 = vmul.f32 0.5, %v896_v7 }
 0x330   :  { %v5314_v32 = vadd.f32 %v902_v20, %v901_v59 }
 0x332   :  { %4387 = vtanh.f32 %v5314_v32  ;;  %v1081_v20 = vrot.slane %v5314_v32, 7  ;;  %v5396_v32 = vld [vmem:[#allocation6 + $0x1f0] sm:$0xff] }
 0x33f   :  { %v4388_v51 = vpop.eup %4387 }
 0x340   :  { %v905_v28 = vmul.f32 %v4388_v51, %v897_v22 }
 0x342   :  { %v907_v30 = vrot.slane %v905_v28, 2 }
 0x344   :  { %974 = vmatmul.mubr.f32.vlgmr.msra.gmra.mxu0 %v907_v30  ;;  %1045 = vmatmul.mubr.f32.vlgmr.msra.gmra.mxu1 %v907_v30 }
 0x345   :  { %1092 = vmatpush1.msra.mxu0 %v4916_v36  ;;  %1163 = vmatpush1.msra.mxu1 %v4864_v4  ;;  %v7052_v4 = vld [vmem:[#allocation30_spill] sm:$0xff]  ;;  %v7067_v36 = vld [vmem:[#allocation27_spill] sm:$0xff] }
 0x346   :  { %1093 = vmatprep.subr.mxu0 %v4922_v38  ;;  %1164 = vmatprep.subr.mxu1 %v4866_v6  ;;  %v7053_v6 = vld [vmem:[#allocation20_spill] sm:$0xff] }
 0x347   :  { %1094 = vmatpush1.msra.mxu0 %v4928_v40  ;;  %1165 = vmatpush1.msra.mxu1 %v4869_v8  ;;  %v7054_v8 = vld [vmem:[#allocation31_spill] sm:$0xff]  ;;  %v7069_v38 = vld [vmem:[#allocation28_spill] sm:$0xff]  ;;  %v7071_v40 = vmov 0.0  }
 0x348   :  { %1095 = vmatprep.subr.mxu0 %v4934_v42  ;;  %1166 = vmatprep.subr.mxu1 %v4872_v10  ;;  %v7055_v10 = vld [vmem:[#allocation21_spill] sm:$0xff]  ;;  %v7073_v42 = vld [vmem:[#allocation19_spill] sm:$0xff] }
 0x349   :  { %1096 = vmatpush1.msra.mxu0 %v4940_v44  ;;  %1167 = vmatpush1.msra.mxu1 %v7005_v55 }
 0x34a   :  { %1097 = vmatprep.subr.mxu0 %v4946_v46  ;;  %1168 = vmatprep.subr.mxu1 %v4877_v14  ;;  %v7056_v14 = vld [vmem:[#allocation32_spill] sm:$0xff] }
 0x34b   :  { %1098 = vmatpush1.msra.mxu0 %v4952_v48  ;;  %1169 = vmatpush1.msra.mxu1 %v4880_v16  ;;  %v7057_v16 = vld [vmem:[#allocation22_spill] sm:$0xff] }
 0x34c   :  { %1099 = vmatprep.subr.mxu0 %v4958_v50  ;;  %1170 = vmatprep.subr.mxu1 %v4887_v19  ;;  %v7058_v19 = vld [vmem:[#allocation33_spill] sm:$0xff] }
 0x34d   :  { %1100 = vmatpush1.msra.mxu0 %v4964_v52  ;;  %1171 = vmatpush1.msra.mxu1 %v4890_v21  ;;  %v7059_v21 = vld [vmem:[#allocation23_spill] sm:$0xff] }
 0x34e   :  { %1101 = vmatprep.subr.mxu0 %v4970_v54  ;;  %1172 = vmatprep.subr.mxu1 %v4893_v23  ;;  %v7060_v23 = vld [vmem:[#allocation34_spill] sm:$0xff] }
 0x34f   :  { %1102 = vmatpush1.msra.mxu0 %v4976_v56  ;;  %1173 = vmatpush1.msra.mxu1 %v4896_v25  ;;  %v7061_v25 = vld [vmem:[#allocation24_spill] sm:$0xff] }
 0x350   :  { %1103 = vmatprep.subr.mxu0 %v4982_v58  ;;  %1174 = vmatprep.subr.mxu1 %v4899_v27  ;;  %v7062_v27 = vld [vmem:[#allocation35_spill] sm:$0xff]  ;;  %v7075_v58 = vld [vmem:[#allocation44_spill] sm:$0xff] }
 0x351   :  { %1104 = vmatpush1.msra.mxu0 %v4988_v60  ;;  %1175 = vmatpush1.msra.mxu1 %v4902_v29  ;;  %v7063_v29 = vld [vmem:[#allocation25_spill] sm:$0xff] }
 0x352   :  { %1105 = vmatprep.subr.mxu0 %v4994_v62  ;;  %1176 = vmatprep.subr.mxu1 %v4905_v31  ;;  %v7064_v31 = vld [vmem:[#allocation36_spill] sm:$0xff] }
 0x353   :  { %1106 = vmatpush1.msra.mxu0 %v5000_v1  ;;  %1177 = vmatpush1.msra.mxu1 %v4908_v33  ;;  %v7065_v33 = vld [vmem:[#allocation26_spill] sm:$0xff] }
 0x354   :  { %1107 = vmatprep.subr.mxu0 %v5006_v5  ;;  %1178 = vmatprep.subr.mxu1 %v4914_v35  ;;  %v7066_v35 = vld [vmem:[#allocation37_spill] sm:$0xff] }
 0x355   :  { %1108 = vmatpush1.msra.mxu0 %v5013_v9  ;;  %1179 = vmatpush1.msra.mxu1 %v4920_v37  ;;  %v7068_v37 = vld [vmem:[#allocation38_spill] sm:$0xff] }
 0x356   :  { %1109 = vmatprep.subr.mxu0 %v5017_v11  ;;  %1180 = vmatprep.subr.mxu1 %v4926_v39  ;;  %v7070_v39 = vld [vmem:[#allocation39_spill] sm:$0xff] }
 0x357   :  { %1110 = vmatpush1.msra.mxu0 %v5021_v13  ;;  %1181 = vmatpush1.msra.mxu1 %v4932_v41  ;;  %v7072_v41 = vld [vmem:[#allocation29_spill] sm:$0xff] }
 0x358   :  { %1111 = vmatprep.subr.mxu0 %v5024_v15  ;;  %1182 = vmatprep.subr.mxu1 %v4938_v43  ;;  %v5382_v43 = vld [vmem:[#allocation6 + $0x1f8] sm:$0xff] }
 0x359   :  { %1112 = vmatpush1.msra.mxu0 %v5027_v17  ;;  %1183 = vmatpush1.msra.mxu1 %v4944_v45  ;;  %7074 = vst [vmem:[#allocation18_spill] sm:$0xff] %v5382_v43 }
 0x35a   :  { %1113 = vmatprep.subr.mxu0 %v7052_v4  ;;  %1184 = vmatprep.subr.mxu1 %v7053_v6 }
 0x35b   :  { %1114 = vmatpush1.msra.mxu0 %v7054_v8  ;;  %1185 = vmatpush1.msra.mxu1 %v7055_v10 }
 0x35c   :  { %1115 = vmatprep.subr.mxu0 %v7056_v14  ;;  %1186 = vmatprep.subr.mxu1 %v7057_v16 }
 0x35d   :  { %1116 = vmatpush1.msra.mxu0 %v7058_v19  ;;  %1187 = vmatpush1.msra.mxu1 %v7059_v21 }
 0x35e   :  { %1117 = vmatprep.subr.mxu0 %v7060_v23  ;;  %1188 = vmatprep.subr.mxu1 %v7061_v25  ;;  %v5393_v25 = vld [vmem:[#allocation6 + $0x1e0] sm:$0xff] }
 0x35f   :  { %1118 = vmatpush1.msra.mxu0 %v7062_v27  ;;  %1189 = vmatpush1.msra.mxu1 %v7063_v29  ;;  %v5399_v29 = vld [vmem:[#allocation6 + $0x1c8] sm:$0xff] }
 0x360   :  { %1119 = vmatprep.subr.mxu0 %v7064_v31  ;;  %1190 = vmatprep.subr.mxu1 %v7065_v33  ;;  %v5402_v33 = vld [vmem:[#allocation6 + $0x1d8] sm:$0xff] }
 0x361   :  { %1120 = vmatpush1.msra.mxu0 %v7066_v35  ;;  %1191 = vmatpush1.msra.mxu1 %v7067_v36  ;;  %v5405_v36 = vld [vmem:[#allocation6 + $0x1c0] sm:$0xff] }
 0x362   :  { %1121 = vmatprep.subr.mxu0 %v7068_v37  ;;  %1192 = vmatprep.subr.mxu1 %v7069_v38  ;;  %v5408_v38 = vld [vmem:[#allocation6 + $0x1d0] sm:$0xff] }
 0x363   :  { %1122 = vmatpush1.msra.mxu0 %v7070_v39  ;;  %1155 = vmatprep.mubr.f32.mxu0 %v7071_v40 }
 0x364   :  { %1193 = vmatpush1.msra.mxu1 %v7072_v41  ;;  %1226 = vmatprep.mubr.f32.mxu1 %v7071_v40  ;;  %v5411_v41 = vld [vmem:[#allocation6 + $0x1a8] sm:$0xff] }
 0x365   :  { %1273 = vmatprep.subr.mxu0 %v7073_v42  ;;  %1344 = vmatprep.subr.mxu1 %v5382_v43  ;;  %v5414_v42 = vld [vmem:[#allocation6 + $0x1b8] sm:$0xff] }
 0x404   :  { %v975_v44 = vpop.f32.mrf.mxu0  ;;  %v1046_v46 = vpop.f32.mrf.mxu1 }
 0x405   :  { %v1055_v45 = vrot.slane %v975_v44, 5  ;;  %v1057_v56 = vrot.slane %v1046_v46, 5  ;;  %v5417_v44 = vld [vmem:[#allocation6 + $0x1a0] sm:$0xff]  ;;  %v5423_v46 = vld [vmem:[#allocation6 + $0x188] sm:$0xff] }
 0x406   :  { %v977_v48 = vpop.f32.mrf.mxu0  ;;  %v1048_v55 = vpop.f32.mrf.mxu1 }
 0x407   :  { %v1063_v50 = vadd.f32 %v1055_v45, %v7026_v61  ;;  %v1056_v52 = vrot.slane %v977_v48, 5  ;;  %v1065_v47 = vadd.f32 %v1057_v56, %v5155_v49  ;;  %v1058_v18 = vrot.slane %v1048_v55, 5  ;;  %v5420_v45 = vld [vmem:[#allocation6 + $0x1b0] sm:$0xff]  ;;  %v5426_v48 = vld [vmem:[#allocation6 + $0x198] sm:$0xff]  ;;  %v5447_v55 = vld [vmem:[#allocation6 + $0x148] sm:$0xff] }
 0x408   :  { %v5438_v56 = vld [vmem:[#allocation6 + $0x178] sm:$0xff] }
 0x409   :  { %v1067_v54 = vmul.f32 0.5, %v1063_v50  ;;  %v1064_v60 = vadd.f32 %v1056_v52, %v7075_v58  ;;  %v1066_v53 = vadd.f32 %v1058_v18, %v5160_v2  ;;  %v5429_v50 = vld [vmem:[#allocation6 + $0x180] sm:$0xff]  ;;  %v5432_v52 = vld [vmem:[#allocation6 + $0x190] sm:$0xff] }
 0x40a   :  { %v5453_v18 = vld [vmem:[#allocation6 + $0x140] sm:$0xff] }
 0x40b   :  { %4389 = vtanh.f32 %v1067_v54  ;;  %v1071_v3 = vmul.f32 0.5, %v1064_v60  ;;  %v1076_v0 = vmul.f32 0.5, %v1066_v53  ;;  %v5435_v54 = vld [vmem:[#allocation6 + $0x168] sm:$0xff]  ;;  %v5441_v60 = vld [vmem:[#allocation6 + $0x160] sm:$0xff]  ;;  %v5456_v53 = vld [vmem:[#allocation6 + $0x150] sm:$0xff] }
 0x40d   :  { %4391 = vtanh.f32 %v1071_v3  ;;  %v5444_v3 = vld [vmem:[#allocation6 + $0x170] sm:$0xff] }
 0x40e   :  { %4393 = vtanh.f32 %v1065_v47  ;;  %v5450_v47 = vld [vmem:[#allocation6 + $0x158] sm:$0xff] }
 0x40f   :  { %4395 = vtanh.f32 %v1076_v0  ;;  %v5459_v0 = vld [vmem:[#allocation6 + $0x128] sm:$0xff] }
 0x418   :  { %v4390_v63 = vpop.eup %4389 }
 0x419   :  { %v1069_v26 = vadd.f32 1.0, %v4390_v63  ;;  %v5462_v63 = vld [vmem:[#allocation6 + $0x138] sm:$0xff] }
 0x41a   :  { %v4392_v24 = vpop.eup %4391 }
 0x41b   :  { %v1070_v57 = vmul.f32 0.5, %v1069_v26  ;;  %v1073_v12 = vadd.f32 1.0, %v4392_v24  ;;  %v4394_v34 = vpop.eup %4393  ;;  %v5465_v26 = vld [vmem:[#allocation6 + $0x120] sm:$0xff]  ;;  %v5468_v24 = vld [vmem:[#allocation6 + $0x130] sm:$0xff] }
 0x41c   :  { %v4396_v28 = vpop.eup %4395 }
 0x41d   :  { %v1074_v59 = vmul.f32 0.5, %v1073_v12  ;;  %v1084_v22 = vmul.f32 %v4394_v34, %v1070_v57  ;;  %v1078_v30 = vadd.f32 1.0, %v4396_v28  ;;  %v5472_v57 = vld [vmem:[#allocation6 + $0x118] sm:$0xff]  ;;  %v5476_v12 = vld [vmem:[#allocation6 + $0x110] sm:$0xff] }
 0x41f   :  { %v1083_v7 = vmul.f32 %v1081_v20, %v1074_v59  ;;  %v1079_v6 = vmul.f32 0.5, %v1078_v30  ;;  %v5480_v59 = vld [vmem:[#allocation6 + $0xf8] sm:$0xff]  ;;  %v5484_v20 = vld [vmem:[#allocation6 + $0xf0] sm:$0xff] }
 0x421   :  { %v5390_v51 = vadd.f32 %v1084_v22, %v1083_v7 }
 0x423   :  { %4397 = vtanh.f32 %v5390_v51 }
 0x430   :  { %v4398_v10 = vpop.eup %4397 }
 0x431   :  { %v1087_v16 = vmul.f32 %v4398_v10, %v1079_v6 }
 0x433   :  { %v1089_v21 = vrot.slane %v1087_v16, 3 }
 0x435   :  { %1156 = vmatmul.mubr.f32.vlgmr.msra.gmra.mxu0 %v1089_v21  ;;  %1227 = vmatmul.mubr.f32.vlgmr.msra.gmra.mxu1 %v1089_v21 }
 0x436   :  { %1274 = vmatpush1.msra.mxu0 %v5393_v25  ;;  %1345 = vmatpush1.msra.mxu1 %v5396_v32 }
 0x437   :  { %1275 = vmatprep.subr.mxu0 %v5399_v29  ;;  %1346 = vmatprep.subr.mxu1 %v5402_v33 }
 0x438   :  { %1276 = vmatpush1.msra.mxu0 %v5405_v36  ;;  %1347 = vmatpush1.msra.mxu1 %v5408_v38 }
 0x439   :  { %1277 = vmatprep.subr.mxu0 %v5411_v41  ;;  %1348 = vmatprep.subr.mxu1 %v5414_v42 }
 0x43a   :  { %1278 = vmatpush1.msra.mxu0 %v5417_v44  ;;  %1349 = vmatpush1.msra.mxu1 %v5420_v45 }
 0x43b   :  { %1279 = vmatprep.subr.mxu0 %v5423_v46  ;;  %1350 = vmatprep.subr.mxu1 %v5426_v48 }
 0x43c   :  { %1280 = vmatpush1.msra.mxu0 %v5429_v50  ;;  %1351 = vmatpush1.msra.mxu1 %v5432_v52 }
 0x43d   :  { %1281 = vmatprep.subr.mxu0 %v5435_v54  ;;  %1352 = vmatprep.subr.mxu1 %v5438_v56 }
 0x43e   :  { %1282 = vmatpush1.msra.mxu0 %v5441_v60  ;;  %1353 = vmatpush1.msra.mxu1 %v5444_v3 }
 0x43f   :  { %1283 = vmatprep.subr.mxu0 %v5447_v55  ;;  %1354 = vmatprep.subr.mxu1 %v5450_v47 }
 0x440   :  { %1284 = vmatpush1.msra.mxu0 %v5453_v18  ;;  %1355 = vmatpush1.msra.mxu1 %v5456_v53 }
 0x441   :  { %1285 = vmatprep.subr.mxu0 %v5459_v0  ;;  %1356 = vmatprep.subr.mxu1 %v5462_v63 }
 0x442   :  { %1286 = vmatpush1.msra.mxu0 %v5465_v26  ;;  %1357 = vmatpush1.msra.mxu1 %v5468_v24 }
 0x443   :  { %1287 = vmatprep.subr.mxu0 %v4994_v62  ;;  %1358 = vmatprep.subr.mxu1 %v5472_v57  ;;  %v5488_v62 = vld [vmem:[#allocation6 + $0xd8] sm:$0xff] }
 0x444   :  { %1288 = vmatpush1.msra.mxu0 %v5000_v1  ;;  %1359 = vmatpush1.msra.mxu1 %v5476_v12  ;;  %v5492_v1 = vld [vmem:[#allocation6 + $0xd0] sm:$0xff] }
 0x445   :  { %1289 = vmatprep.subr.mxu0 %v5006_v5  ;;  %1360 = vmatprep.subr.mxu1 %v5480_v59  ;;  %v5496_v5 = vld [vmem:[#allocation6 + $0xb8] sm:$0xff] }
 0x446   :  { %1290 = vmatpush1.msra.mxu0 %v5013_v9  ;;  %1361 = vmatpush1.msra.mxu1 %v5484_v20  ;;  %v5500_v9 = vld [vmem:[#allocation6 + $0xb0] sm:$0xff] }
 0x447   :  { %1291 = vmatprep.subr.mxu0 %v5017_v11  ;;  %1362 = vmatprep.subr.mxu1 %v5488_v62  ;;  %v5504_v11 = vld [vmem:[#allocation6 + $0x98] sm:$0xff] }
 0x448   :  { %1292 = vmatpush1.msra.mxu0 %v5021_v13  ;;  %1363 = vmatpush1.msra.mxu1 %v5492_v1  ;;  %7076 = vst [vmem:[#allocation43_spill] sm:$0xff] %v5504_v11  ;;  %v5508_v13 = vld [vmem:[#allocation6 + $0x90] sm:$0xff] }
 0x449   :  { %1293 = vmatprep.subr.mxu0 %v5024_v15  ;;  %1364 = vmatprep.subr.mxu1 %v5496_v5  ;;  %7077 = vst [vmem:[#allocation17_spill] sm:$0xff] %v5508_v13  ;;  %v5512_v15 = vld [vmem:[#allocation6 + $0x78] sm:$0xff] }
 0x44a   :  { %1294 = vmatpush1.msra.mxu0 %v5027_v17  ;;  %1365 = vmatpush1.msra.mxu1 %v5500_v9  ;;  %7078 = vst [vmem:[#allocation30_spill] sm:$0xff] %v5512_v15  ;;  %v5516_v17 = vld [vmem:[#allocation6 + $0x70] sm:$0xff] }
 0x44b   :  { %1295 = vmatprep.subr.mxu0 %v7052_v4  ;;  %1366 = vmatprep.subr.mxu1 %v5504_v11  ;;  %7079 = vst [vmem:[#allocation20_spill] sm:$0xff] %v5516_v17  ;;  %v5520_v4 = vld [vmem:[#allocation6 + $0x58] sm:$0xff] }
 0x44c   :  { %1296 = vmatpush1.msra.mxu0 %v7054_v8  ;;  %1367 = vmatpush1.msra.mxu1 %v5508_v13  ;;  %7080 = vst [vmem:[#allocation31_spill] sm:$0xff] %v5520_v4  ;;  %v5524_v8 = vld [vmem:[#allocation6 + $0x50] sm:$0xff] }
 0x44d   :  { %1297 = vmatprep.subr.mxu0 %v7056_v14  ;;  %1368 = vmatprep.subr.mxu1 %v5512_v15  ;;  %7081 = vst [vmem:[#allocation21_spill] sm:$0xff] %v5524_v8  ;;  %v5528_v14 = vld [vmem:[#allocation6 + $0x38] sm:$0xff] }
 0x44e   :  { %1298 = vmatpush1.msra.mxu0 %v7058_v19  ;;  %1369 = vmatpush1.msra.mxu1 %v5516_v17  ;;  %7082 = vst [vmem:[#allocation32_spill] sm:$0xff] %v5528_v14  ;;  %v5532_v19 = vld [vmem:[#allocation6 + $0x30] sm:$0xff] }
 0x44f   :  { %1299 = vmatprep.subr.mxu0 %v7060_v23  ;;  %1370 = vmatprep.subr.mxu1 %v5520_v4  ;;  %7083 = vst [vmem:[#allocation22_spill] sm:$0xff] %v5532_v19  ;;  %v5536_v23 = vld [vmem:[#allocation6 + $0x18] sm:$0xff] }
 0x450   :  { %1300 = vmatpush1.msra.mxu0 %v7062_v27  ;;  %1371 = vmatpush1.msra.mxu1 %v5524_v8  ;;  %7084 = vst [vmem:[#allocation33_spill] sm:$0xff] %v5536_v23  ;;  %v5541_v27 = vld [vmem:[#allocation6 + $0x10] sm:$0xff] }
 0x451   :  { %1301 = vmatprep.subr.mxu0 %v7064_v31  ;;  %1372 = vmatprep.subr.mxu1 %v5528_v14  ;;  %7085 = vst [vmem:[#allocation23_spill] sm:$0xff] %v5541_v27  ;;  %v5545_v31 = vld [vmem:[#allocation6 + $0x1e8] sm:$0xff] }
 0x452   :  { %1302 = vmatpush1.msra.mxu0 %v7066_v35  ;;  %1373 = vmatpush1.msra.mxu1 %v5532_v19  ;;  %7086 = vst [vmem:[#allocation34_spill] sm:$0xff] %v5545_v31 }
 0x453   :  { %1303 = vmatprep.subr.mxu0 %v7068_v37  ;;  %1374 = vmatprep.subr.mxu1 %v5536_v23 }
 0x454   :  { %1304 = vmatpush1.msra.mxu0 %v7070_v39  ;;  %1337 = vmatprep.mubr.f32.mxu0 %v7071_v40 }
 0x455   :  { %1375 = vmatpush1.msra.mxu1 %v5541_v27  ;;  %1408 = vmatprep.mubr.f32.mxu1 %v7071_v40 }
 0x456   :  { %1455 = vmatprep.subr.mxu0 %v5545_v31  ;;  %1526 = vmatprep.subr.mxu1 %v5382_v43 }
 0x4f5   :  { %v1157_v35 = vpop.f32.mrf.mxu0  ;;  %v1228_v34 = vpop.f32.mrf.mxu1 }
 0x4f6   :  { %v1237_v37 = vrot.slane %v1157_v35, 4  ;;  %v1239_v30 = vrot.slane %v1228_v34, 4 }
 0x4f7   :  { %v1159_v7 = vpop.f32.mrf.mxu0  ;;  %v1230_v16 = vpop.f32.mrf.mxu1 }
 0x4f8   :  { %v1245_v39 = vadd.f32 %v1237_v37, %v7026_v61  ;;  %v1238_v22 = vrot.slane %v1159_v7, 4  ;;  %v1247_v21 = vadd.f32 %v1239_v30, %v5155_v49  ;;  %v1240_v31 = vrot.slane %v1230_v16, 4 }
 0x4fa   :  { %v1249_v28 = vmul.f32 0.5, %v1245_v39  ;;  %v1246_v6 = vadd.f32 %v1238_v22, %v7075_v58  ;;  %v1248_v43 = vadd.f32 %v1240_v31, %v5160_v2  ;;  %v1263_v39 = vrot.slane %v5390_v51, 7  ;;  %v5587_v51 = vld [vmem:[#allocation6 + $0x100] sm:$0xff] }
 0x4fc   :  { %4399 = vtanh.f32 %v1249_v28  ;;  %v1253_v10 = vmul.f32 0.5, %v1246_v6  ;;  %v1258_v35 = vmul.f32 0.5, %v1248_v43 }
 0x4fe   :  { %4401 = vtanh.f32 %v1253_v10 }
 0x4ff   :  { %4403 = vtanh.f32 %v1247_v21  ;;  %v5595_v21 = vld [vmem:[#allocation6 + $0xe0] sm:$0xff] }
 0x500   :  { %4405 = vtanh.f32 %v1258_v35  ;;  %v5599_v35 = vld [vmem:[#allocation6 + $0xc8] sm:$0xff] }
 0x509   :  { %v4400_v27 = vpop.eup %4399 }
 0x50a   :  { %v1251_v40 = vadd.f32 1.0, %v4400_v27 }
 0x50b   :  { %v4402_v23 = vpop.eup %4401 }
 0x50c   :  { %v1252_v37 = vmul.f32 0.5, %v1251_v40  ;;  %v1255_v7 = vadd.f32 1.0, %v4402_v23  ;;  %v4404_v22 = vpop.eup %4403  ;;  %v5583_v40 = vld [vmem:[#allocation6 + $0x108] sm:$0xff] }
 0x50d   :  { %v4406_v30 = vpop.eup %4405  ;;  %v5591_v23 = vld [vmem:[#allocation6 + $0xe8] sm:$0xff] }
 0x50e   :  { %v1256_v34 = vmul.f32 0.5, %v1255_v7  ;;  %v1266_v6 = vmul.f32 %v4404_v22, %v1252_v37  ;;  %v1260_v10 = vadd.f32 1.0, %v4406_v30  ;;  %v5603_v37 = vld [vmem:[#allocation6 + $0xc0] sm:$0xff]  ;;  %v5607_v7 = vld [vmem:[#allocation6 + $0xa8] sm:$0xff] }
 0x50f   :  { %v5619_v22 = vld [vmem:[#allocation6 + $0x80] sm:$0xff]  ;;  %v5631_v30 = vld [vmem:[#allocation6 + $0x48] sm:$0xff] }
 0x510   :  { %v1265_v28 = vmul.f32 %v1263_v39, %v1256_v34  ;;  %v1261_v31 = vmul.f32 0.5, %v1260_v10  ;;  %v5611_v34 = vld [vmem:[#allocation6 + $0xa0] sm:$0xff]  ;;  %v5615_v39 = vld [vmem:[#allocation6 + $0x88] sm:$0xff]  ;;  %7088 = vst [vmem:[#allocation35_spill] sm:$0xff] %v5619_v22  ;;  %7091 = vst [vmem:[#allocation26_spill] sm:$0xff] %v5631_v30 }
 0x511   :  { %7087 = vst [vmem:[#allocation24_spill] sm:$0xff] %v5615_v39  ;;  %v5635_v10 = vld [vmem:[#allocation6 + $0x40] sm:$0xff] }
 0x512   :  { %v5554_v58 = vadd.f32 %v1266_v6, %v1265_v28  ;;  %v5623_v28 = vld [vmem:[#allocation6 + $0x68] sm:$0xff]  ;;  %v5627_v6 = vld [vmem:[#allocation6 + $0x60] sm:$0xff]  ;;  %7092 = vst [vmem:[#allocation37_spill] sm:$0xff] %v5635_v10 }
 0x513   :  { %7089 = vst [vmem:[#allocation25_spill] sm:$0xff] %v5623_v28  ;;  %7090 = vst [vmem:[#allocation36_spill] sm:$0xff] %v5627_v6 }
 0x514   :  { %4407 = vtanh.f32 %v5554_v58 }
 0x521   :  { %v4408_v43 = vpop.eup %4407 }
 0x522   :  { %v1269_v16 = vmul.f32 %v4408_v43, %v1261_v31  ;;  %v5639_v31 = vld [vmem:[#allocation6 + $0x28] sm:$0xff]  ;;  %v5643_v43 = vld [vmem:[#allocation6 + $0x20] sm:$0xff] }
 0x523   :  { %7093 = vst [vmem:[#allocation27_spill] sm:$0xff] %v5639_v31  ;;  %7094 = vst [vmem:[#allocation38_spill] sm:$0xff] %v5643_v43 }
 0x524   :  { %v1271_v27 = vrot.slane %v1269_v16, 4  ;;  %v5647_v16 = vld [vmem:[#allocation6 + $0x8] sm:$0xff] }
 0x525   :  { %7095 = vst [vmem:[#allocation28_spill] sm:$0xff] %v5647_v16 }
 0x526   :  { %1338 = vmatmul.mubr.f32.vlgmr.msra.gmra.mxu0 %v1271_v27  ;;  %1409 = vmatmul.mubr.f32.vlgmr.msra.gmra.mxu1 %v1271_v27  ;;  %v7096_v27 = vld [vmem:[#allocation33_spill] sm:$0xff] }
 0x527   :  { %1456 = vmatpush1.msra.mxu0 %v5393_v25  ;;  %1527 = vmatpush1.msra.mxu1 %v5396_v32 }
 0x528   :  { %1457 = vmatprep.subr.mxu0 %v5399_v29  ;;  %1528 = vmatprep.subr.mxu1 %v5402_v33 }
 0x529   :  { %1458 = vmatpush1.msra.mxu0 %v5405_v36  ;;  %1529 = vmatpush1.msra.mxu1 %v5408_v38 }
 0x52a   :  { %1459 = vmatprep.subr.mxu0 %v5411_v41  ;;  %1530 = vmatprep.subr.mxu1 %v5414_v42 }
 0x52b   :  { %1460 = vmatpush1.msra.mxu0 %v5417_v44  ;;  %1531 = vmatpush1.msra.mxu1 %v5420_v45 }
 0x52c   :  { %1461 = vmatprep.subr.mxu0 %v5423_v46  ;;  %1532 = vmatprep.subr.mxu1 %v5426_v48 }
 0x52d   :  { %1462 = vmatpush1.msra.mxu0 %v5429_v50  ;;  %1533 = vmatpush1.msra.mxu1 %v5432_v52 }
 0x52e   :  { %1463 = vmatprep.subr.mxu0 %v5435_v54  ;;  %1534 = vmatprep.subr.mxu1 %v5438_v56 }
 0x52f   :  { %1464 = vmatpush1.msra.mxu0 %v5441_v60  ;;  %1535 = vmatpush1.msra.mxu1 %v5444_v3 }
 0x530   :  { %1465 = vmatprep.subr.mxu0 %v5447_v55  ;;  %1536 = vmatprep.subr.mxu1 %v5450_v47 }
 0x531   :  { %1466 = vmatpush1.msra.mxu0 %v5453_v18  ;;  %1537 = vmatpush1.msra.mxu1 %v5456_v53 }
 0x532   :  { %1467 = vmatprep.subr.mxu0 %v5459_v0  ;;  %1538 = vmatprep.subr.mxu1 %v5462_v63 }
 0x533   :  { %1468 = vmatpush1.msra.mxu0 %v5465_v26  ;;  %1539 = vmatpush1.msra.mxu1 %v5468_v24 }
 0x534   :  { %1469 = vmatprep.subr.mxu0 %v5583_v40  ;;  %1540 = vmatprep.subr.mxu1 %v5472_v57 }
 0x535   :  { %1470 = vmatpush1.msra.mxu0 %v5587_v51  ;;  %1541 = vmatpush1.msra.mxu1 %v5476_v12 }
 0x536   :  { %1471 = vmatprep.subr.mxu0 %v5591_v23  ;;  %1542 = vmatprep.subr.mxu1 %v5480_v59 }
 0x537   :  { %1472 = vmatpush1.msra.mxu0 %v5595_v21  ;;  %1543 = vmatpush1.msra.mxu1 %v5484_v20 }
 0x538   :  { %1473 = vmatprep.subr.mxu0 %v5599_v35  ;;  %1544 = vmatprep.subr.mxu1 %v5488_v62 }
 0x539   :  { %1474 = vmatpush1.msra.mxu0 %v5603_v37  ;;  %1545 = vmatpush1.msra.mxu1 %v5492_v1 }
 0x53a   :  { %1475 = vmatprep.subr.mxu0 %v5607_v7  ;;  %1546 = vmatprep.subr.mxu1 %v5496_v5 }
 0x53b   :  { %1476 = vmatpush1.msra.mxu0 %v5611_v34  ;;  %1547 = vmatpush1.msra.mxu1 %v5500_v9 }
 0x53c   :  { %1477 = vmatprep.subr.mxu0 %v5615_v39  ;;  %1548 = vmatprep.subr.mxu1 %v5504_v11 }
 0x53d   :  { %1478 = vmatpush1.msra.mxu0 %v5619_v22  ;;  %1549 = vmatpush1.msra.mxu1 %v5508_v13 }
 0x53e   :  { %1479 = vmatprep.subr.mxu0 %v5623_v28  ;;  %1550 = vmatprep.subr.mxu1 %v5512_v15 }
 0x53f   :  { %1480 = vmatpush1.msra.mxu0 %v5627_v6  ;;  %1551 = vmatpush1.msra.mxu1 %v5516_v17 }
 0x540   :  { %1481 = vmatprep.subr.mxu0 %v5631_v30  ;;  %1552 = vmatprep.subr.mxu1 %v5520_v4 }
 0x541   :  { %1482 = vmatpush1.msra.mxu0 %v5635_v10  ;;  %1553 = vmatpush1.msra.mxu1 %v5524_v8  ;;  %v5651_v10 = vld [vmem:[#allocation6] sm:$0xff]  ;;  %v7098_v8 = vmov 0.0  }
 0x542   :  { %1483 = vmatprep.subr.mxu0 %v5639_v31  ;;  %1554 = vmatprep.subr.mxu1 %v5528_v14  ;;  %7097 = vst [vmem:[#allocation39_spill] sm:$0xff] %v5651_v10  ;;  %v7099_v31 = vld [vmem:[#allocation23_spill] sm:$0xff]  ;;  %v7100_v14 = vld [vmem:[#allocation34_spill] sm:$0xff] }
 0x543   :  { %1484 = vmatpush1.msra.mxu0 %v5643_v43  ;;  %1555 = vmatpush1.msra.mxu1 %v5532_v19  ;;  %v7101_v43 = vld [vmem:[#allocation18_spill] sm:$0xff] }
 0x544   :  { %1485 = vmatprep.subr.mxu0 %v5647_v16  ;;  %1556 = vmatprep.subr.mxu1 %v7096_v27 }
 0x545   :  { %1486 = vmatpush1.msra.mxu0 %v5651_v10  ;;  %1519 = vmatprep.mubr.f32.mxu0 %v7098_v8  ;;  %v7102_v10 = vld [vmem:[#allocation44_spill] sm:$0xff] }
 0x546   :  { %1557 = vmatpush1.msra.mxu1 %v7099_v31  ;;  %1590 = vmatprep.mubr.f32.mxu1 %v7098_v8 }
 0x547   :  { %1637 = vmatprep.subr.mxu0 %v7100_v14  ;;  %1708 = vmatprep.subr.mxu1 %v7101_v43 }
 0x5e6   :  { %v1339_v19 = vpop.f32.mrf.mxu0  ;;  %v1410_v30 = vpop.f32.mrf.mxu1 }
 0x5e7   :  { %v1419_v4 = vrot.slane %v1339_v19, 3  ;;  %v1421_v15 = vrot.slane %v1410_v30, 3 }
 0x5e8   :  { %v1341_v16 = vpop.f32.mrf.mxu0  ;;  %v1412_v31 = vpop.f32.mrf.mxu1 }
 0x5e9   :  { %v1427_v27 = vadd.f32 %v1419_v4, %v7026_v61  ;;  %v1420_v17 = vrot.slane %v1341_v16, 3  ;;  %v1429_v8 = vadd.f32 %v1421_v15, %v5155_v49  ;;  %v1422_v14 = vrot.slane %v1412_v31, 3 }
 0x5eb   :  { %v1431_v6 = vmul.f32 0.5, %v1427_v27  ;;  %v1428_v28 = vadd.f32 %v1420_v17, %v7102_v10  ;;  %v1430_v43 = vadd.f32 %v1422_v14, %v5160_v2  ;;  %v1445_v17 = vrot.slane %v5554_v58, 7  ;;  %v7103_v58 = vld [vmem:[#allocation24_spill] sm:$0xff] }
 0x5ed   :  { %4409 = vtanh.f32 %v1431_v6  ;;  %v1435_v13 = vmul.f32 0.5, %v1428_v28  ;;  %v1440_v19 = vmul.f32 0.5, %v1430_v43 }
 0x5ef   :  { %4411 = vtanh.f32 %v1435_v13 }
 0x5f0   :  { %4413 = vtanh.f32 %v1429_v8 }
 0x5f1   :  { %4415 = vtanh.f32 %v1440_v19 }
 0x5fa   :  { %v4410_v22 = vpop.eup %4409 }
 0x5fb   :  { %v1433_v11 = vadd.f32 1.0, %v4410_v22 }
 0x5fc   :  { %v4412_v39 = vpop.eup %4411 }
 0x5fd   :  { %v1434_v4 = vmul.f32 0.5, %v1433_v11  ;;  %v1437_v16 = vadd.f32 1.0, %v4412_v39  ;;  %v4414_v6 = vpop.eup %4413 }
 0x5fe   :  { %v4416_v13 = vpop.eup %4415 }
 0x5ff   :  { %v1438_v30 = vmul.f32 0.5, %v1437_v16  ;;  %v1448_v27 = vmul.f32 %v4414_v6, %v1434_v4  ;;  %v1442_v15 = vadd.f32 1.0, %v4416_v13  ;;  %v1846_v13 = vld [vmem:[%s6777_s11 + $0xf0] sm:$0xff] }
 0x601   :  { %v1447_v28 = vmul.f32 %v1445_v17, %v1438_v30  ;;  %v1443_v8 = vmul.f32 0.5, %v1442_v15  ;;  %v1845_v15 = vld [vmem:[%s6777_s11 + $0xe8] sm:$0xff] }
 0x603   :  { %v5664_v10 = vadd.f32 %v1448_v27, %v1447_v28 }
 0x605   :  { %4417 = vtanh.f32 %v5664_v10 }
 0x612   :  { %v4418_v31 = vpop.eup %4417 }
 0x613   :  { %v1451_v14 = vmul.f32 %v4418_v31, %v1443_v8  ;;  %v1844_v8 = vld [vmem:[%s6777_s11 + $0xe0] sm:$0xff]  ;;  %v1843_v31 = vld [vmem:[%s6777_s11 + $0xd8] sm:$0xff] }
 0x615   :  { %v1453_v22 = vrot.slane %v1451_v14, 5  ;;  %v1842_v14 = vld [vmem:[%s6777_s11 + $0xd0] sm:$0xff] }
 0x617   :  { %1520 = vmatmul.mubr.f32.vlgmr.msra.gmra.mxu0 %v1453_v22  ;;  %1591 = vmatmul.mubr.f32.vlgmr.msra.gmra.mxu1 %v1453_v22  ;;  %v1841_v22 = vld [vmem:[%s6777_s11 + $0xc8] sm:$0xff] }
 0x618   :  { %1638 = vmatpush1.msra.mxu0 %v5393_v25  ;;  %1709 = vmatpush1.msra.mxu1 %v5396_v32  ;;  %v7104_v25 = vld [vmem:[#allocation43_spill] sm:$0xff] }
 0x619   :  { %1639 = vmatprep.subr.mxu0 %v5399_v29  ;;  %1710 = vmatprep.subr.mxu1 %v5402_v33  ;;  %v7105_v32 = vld [vmem:[#allocation35_spill] sm:$0xff]  ;;  %v7106_v29 = vld [vmem:[#allocation17_spill] sm:$0xff] }
 0x61a   :  { %1640 = vmatpush1.msra.mxu0 %v5405_v36  ;;  %1711 = vmatpush1.msra.mxu1 %v5408_v38  ;;  %v7107_v33 = vld [vmem:[#allocation25_spill] sm:$0xff]  ;;  %v7108_v36 = vld [vmem:[#allocation30_spill] sm:$0xff]  ;;  %v7109_v38 = vld [vmem:[#allocation36_spill] sm:$0xff] }
 0x61b   :  { %1641 = vmatprep.subr.mxu0 %v5411_v41  ;;  %1712 = vmatprep.subr.mxu1 %v5414_v42  ;;  %v7110_v41 = vld [vmem:[#allocation20_spill] sm:$0xff]  ;;  %v7111_v42 = vld [vmem:[#allocation26_spill] sm:$0xff] }
 0x61c   :  { %1642 = vmatpush1.msra.mxu0 %v5417_v44  ;;  %1713 = vmatpush1.msra.mxu1 %v5420_v45  ;;  %v7112_v44 = vld [vmem:[#allocation31_spill] sm:$0xff]  ;;  %v7113_v45 = vld [vmem:[#allocation37_spill] sm:$0xff] }
 0x61d   :  { %1643 = vmatprep.subr.mxu0 %v5423_v46  ;;  %1714 = vmatprep.subr.mxu1 %v5426_v48  ;;  %v7114_v46 = vld [vmem:[#allocation21_spill] sm:$0xff]  ;;  %v7115_v48 = vld [vmem:[#allocation27_spill] sm:$0xff] }
 0x61e   :  { %1644 = vmatpush1.msra.mxu0 %v5429_v50  ;;  %1715 = vmatpush1.msra.mxu1 %v5432_v52  ;;  %v7116_v50 = vld [vmem:[#allocation32_spill] sm:$0xff]  ;;  %v7117_v52 = vld [vmem:[#allocation38_spill] sm:$0xff] }
 0x61f   :  { %1645 = vmatprep.subr.mxu0 %v5435_v54  ;;  %1716 = vmatprep.subr.mxu1 %v5438_v56  ;;  %v7118_v54 = vld [vmem:[#allocation22_spill] sm:$0xff]  ;;  %v7119_v56 = vld [vmem:[#allocation28_spill] sm:$0xff] }
 0x620   :  { %1646 = vmatpush1.msra.mxu0 %v5441_v60  ;;  %1717 = vmatpush1.msra.mxu1 %v5444_v3  ;;  %v7120_v60 = vld [vmem:[#allocation33_spill] sm:$0xff]  ;;  %v7121_v3 = vld [vmem:[#allocation39_spill] sm:$0xff] }
 0x621   :  { %1647 = vmatprep.subr.mxu0 %v5447_v55  ;;  %1718 = vmatprep.subr.mxu1 %v5450_v47  ;;  %v7122_v55 = vmov 0.0   ;;  %v7123_v47 = vld [vmem:[#allocation23_spill] sm:$0xff] }
 0x622   :  { %1648 = vmatpush1.msra.mxu0 %v5453_v18  ;;  %1719 = vmatpush1.msra.mxu1 %v5456_v53 }
 0x623   :  { %1649 = vmatprep.subr.mxu0 %v5459_v0  ;;  %1720 = vmatprep.subr.mxu1 %v5462_v63 }
 0x624   :  { %1650 = vmatpush1.msra.mxu0 %v5465_v26  ;;  %1721 = vmatpush1.msra.mxu1 %v5468_v24 }
 0x625   :  { %1651 = vmatprep.subr.mxu0 %v5583_v40  ;;  %1722 = vmatprep.subr.mxu1 %v5472_v57 }
 0x626   :  { %1652 = vmatpush1.msra.mxu0 %v5587_v51  ;;  %1723 = vmatpush1.msra.mxu1 %v5476_v12 }
 0x627   :  { %1653 = vmatprep.subr.mxu0 %v5591_v23  ;;  %1724 = vmatprep.subr.mxu1 %v5480_v59  ;;  %v7124_v59 = vld [vmem:[#allocation44_spill] sm:$0xff] }
 0x628   :  { %1654 = vmatpush1.msra.mxu0 %v5595_v21  ;;  %1725 = vmatpush1.msra.mxu1 %v5484_v20 }
 0x629   :  { %1655 = vmatprep.subr.mxu0 %v5599_v35  ;;  %1726 = vmatprep.subr.mxu1 %v5488_v62 }
 0x62a   :  { %1656 = vmatpush1.msra.mxu0 %v5603_v37  ;;  %1727 = vmatpush1.msra.mxu1 %v5492_v1 }
 0x62b   :  { %1657 = vmatprep.subr.mxu0 %v5607_v7  ;;  %1728 = vmatprep.subr.mxu1 %v5496_v5 }
 0x62c   :  { %1658 = vmatpush1.msra.mxu0 %v5611_v34  ;;  %1729 = vmatpush1.msra.mxu1 %v5500_v9  ;;  %v1627_v34 = vrot.slane %v5664_v10, 7  ;;  %v1847_v10 = vld [vmem:[%s6777_s11 + $0xf8] sm:$0xff] }
 0x62d   :  { %1659 = vmatprep.subr.mxu0 %v7103_v58  ;;  %1730 = vmatprep.subr.mxu1 %v7104_v25  ;;  %v1840_v58 = vld [vmem:[%s6777_s11 + $0xc0] sm:$0xff]  ;;  %v1839_v25 = vld [vmem:[%s6777_s11 + $0xb8] sm:$0xff] }
 0x62e   :  { %1660 = vmatpush1.msra.mxu0 %v7105_v32  ;;  %1731 = vmatpush1.msra.mxu1 %v7106_v29  ;;  %v1838_v32 = vld [vmem:[%s6777_s11 + $0xb0] sm:$0xff]  ;;  %v1837_v29 = vld [vmem:[%s6777_s11 + $0xa8] sm:$0xff] }
 0x62f   :  { %1661 = vmatprep.subr.mxu0 %v7107_v33  ;;  %1732 = vmatprep.subr.mxu1 %v7108_v36  ;;  %v1836_v33 = vld [vmem:[%s6777_s11 + $0xa0] sm:$0xff]  ;;  %v1835_v36 = vld [vmem:[%s6777_s11 + $0x98] sm:$0xff] }
 0x630   :  { %1662 = vmatpush1.msra.mxu0 %v7109_v38  ;;  %1733 = vmatpush1.msra.mxu1 %v7110_v41  ;;  %v1834_v38 = vld [vmem:[%s6777_s11 + $0x90] sm:$0xff]  ;;  %v1833_v41 = vld [vmem:[%s6777_s11 + $0x88] sm:$0xff] }
 0x631   :  { %1663 = vmatprep.subr.mxu0 %v7111_v42  ;;  %1734 = vmatprep.subr.mxu1 %v7112_v44  ;;  %v1832_v42 = vld [vmem:[%s6777_s11 + $0x80] sm:$0xff]  ;;  %v1831_v44 = vld [vmem:[%s6777_s11 + $0x78] sm:$0xff] }
 0x632   :  { %1664 = vmatpush1.msra.mxu0 %v7113_v45  ;;  %1735 = vmatpush1.msra.mxu1 %v7114_v46  ;;  %v1830_v45 = vld [vmem:[%s6777_s11 + $0x70] sm:$0xff]  ;;  %v1829_v46 = vld [vmem:[%s6777_s11 + $0x68] sm:$0xff] }
 0x633   :  { %1665 = vmatprep.subr.mxu0 %v7115_v48  ;;  %1736 = vmatprep.subr.mxu1 %v7116_v50  ;;  %v1828_v48 = vld [vmem:[%s6777_s11 + $0x60] sm:$0xff]  ;;  %v1827_v50 = vld [vmem:[%s6777_s11 + $0x58] sm:$0xff] }
 0x634   :  { %1666 = vmatpush1.msra.mxu0 %v7117_v52  ;;  %1737 = vmatpush1.msra.mxu1 %v7118_v54  ;;  %v1826_v52 = vld [vmem:[%s6777_s11 + $0x50] sm:$0xff]  ;;  %v1825_v54 = vld [vmem:[%s6777_s11 + $0x48] sm:$0xff] }
 0x635   :  { %1667 = vmatprep.subr.mxu0 %v7119_v56  ;;  %1738 = vmatprep.subr.mxu1 %v7120_v60  ;;  %v1824_v56 = vld [vmem:[%s6777_s11 + $0x40] sm:$0xff]  ;;  %v1823_v60 = vld [vmem:[%s6777_s11 + $0x38] sm:$0xff] }
 0x636   :  { %1668 = vmatpush1.msra.mxu0 %v7121_v3  ;;  %1701 = vmatprep.mubr.f32.mxu0 %v7122_v55  ;;  %v1822_v3 = vld [vmem:[%s6777_s11 + $0x30] sm:$0xff] }
 0x637   :  { %1739 = vmatpush1.msra.mxu1 %v7123_v47  ;;  %1772 = vmatprep.mubr.f32.mxu1 %v7122_v55  ;;  %v1821_v47 = vld [vmem:[%s6777_s11 + $0x28] sm:$0xff] }
 0x638   :  { %1863 = vmatprep.subr.mxu0 %v1847_v10 }
 0x6d7   :  { %v1521_v18 = vpop.f32.mrf.mxu0  ;;  %v1592_v0 = vpop.f32.mrf.mxu1 }
 0x6d8   :  { %v1601_v53 = vrot.slane %v1521_v18, 2  ;;  %v1603_v12 = vrot.slane %v1592_v0, 2  ;;  %v1820_v18 = vld [vmem:[%s6777_s11 + $0x20] sm:$0xff]  ;;  %v1818_v0 = vld [vmem:[%s6777_s11 + $0x10] sm:$0xff] }
 0x6d9   :  { %v1523_v63 = vpop.f32.mrf.mxu0  ;;  %v1594_v1 = vpop.f32.mrf.mxu1 }
 0x6da   :  { %v1609_v26 = vadd.f32 %v1601_v53, %v7026_v61  ;;  %v1602_v24 = vrot.slane %v1523_v63, 2  ;;  %v1611_v5 = vadd.f32 %v1603_v12, %v5155_v49  ;;  %v1604_v9 = vrot.slane %v1594_v1, 2  ;;  %v1819_v53 = vld [vmem:[%s6777_s11 + $0x18] sm:$0xff]  ;;  %v1817_v63 = vld [vmem:[%s6777_s11 + $0x8] sm:$0xff]  ;;  %v1999_v12 = vld [vmem:[#allocation8 + $0x48] sm:$0xff] }
 0x6db   :  { %v1994_v1 = vld [vmem:[#allocation8 + $0x20] sm:$0xff] }
 0x6dc   :  { %v1613_v57 = vmul.f32 0.5, %v1609_v26  ;;  %v1610_v20 = vadd.f32 %v1602_v24, %v7124_v59  ;;  %v1612_v11 = vadd.f32 %v1604_v9, %v5160_v2  ;;  %v1816_v26 = vld [vmem:[%s6777_s11] sm:$0xff]  ;;  %v2003_v24 = vld [vmem:[#allocation8 + $0x68] sm:$0xff]  ;;  %v1990_v9 = vld [vmem:[#allocation8] sm:$0xff]  ;;  %s7125_s11 = sld [smem:[#allocation46_spill]] }
 0x6dd   :  { %2055 = vmatprep.subr.mxu1 %v2003_v24  ;;  %v5892_v24 = vld [vmem:[#allocation9 + $0x180] sm:$0xff] }
 0x6de   :  { %4419 = vtanh.f32 %v1613_v57  ;;  %v1617_v62 = vmul.f32 0.5, %v1610_v20  ;;  %v1622_v40 = vmul.f32 0.5, %v1612_v11  ;;  %v2002_v57 = vld [vmem:[#allocation8 + $0x60] sm:$0xff] }
 0x6df   :  { %v1998_v20 = vld [vmem:[#allocation8 + $0x40] sm:$0xff] }
 0x6e0   :  { %4421 = vtanh.f32 %v1617_v62  ;;  %v1995_v62 = vld [vmem:[#allocation8 + $0x28] sm:$0xff] }
 0x6e1   :  { %4423 = vtanh.f32 %v1611_v5  ;;  %v1991_v5 = vld [vmem:[#allocation8 + $0x8] sm:$0xff] }
 0x6e2   :  { %4425 = vtanh.f32 %v1622_v40  ;;  %v1989_v11 = vld [vmem:[%s7125_s11] sm:$0xff] }
 0x6e3   :  { %v2005_v40 = vld [vmem:[#allocation8 + $0x78] sm:$0xff] }
 0x6eb   :  { %v4420_v51 = vpop.eup %4419 }
 0x6ec   :  { %v1615_v23 = vadd.f32 1.0, %v4420_v51  ;;  %v5840_v51 = vld [vmem:[#allocation9 + $0x1f8] sm:$0xff] }
 0x6ed   :  { %v4422_v21 = vpop.eup %4421  ;;  %7126 = vst [vmem:[#allocation29_spill] sm:$0xff] %v5840_v51 }
 0x6ee   :  { %v1616_v35 = vmul.f32 0.5, %v1615_v23  ;;  %v1619_v37 = vadd.f32 1.0, %v4422_v21  ;;  %v4424_v39 = vpop.eup %4423  ;;  %v2004_v23 = vld [vmem:[#allocation8 + $0x70] sm:$0xff]  ;;  %v2001_v21 = vld [vmem:[#allocation8 + $0x58] sm:$0xff] }
 0x6ef   :  { %v4426_v16 = vpop.eup %4425 }
 0x6f0   :  { %v1620_v7 = vmul.f32 0.5, %v1619_v37  ;;  %v1630_v19 = vmul.f32 %v4424_v39, %v1616_v35  ;;  %v1624_v30 = vadd.f32 1.0, %v4426_v16  ;;  %v2000_v35 = vld [vmem:[#allocation8 + $0x50] sm:$0xff]  ;;  %v1997_v37 = vld [vmem:[#allocation8 + $0x38] sm:$0xff]  ;;  %v5849_v16 = vld [vmem:[#allocation9 + $0x1c8] sm:$0xff] }
 0x6f1   :  { %v1992_v39 = vld [vmem:[#allocation8 + $0x10] sm:$0xff] }
 0x6f2   :  { %v1629_v43 = vmul.f32 %v1627_v34, %v1620_v7  ;;  %v1625_v17 = vmul.f32 0.5, %v1624_v30  ;;  %v1996_v7 = vld [vmem:[#allocation8 + $0x30] sm:$0xff]  ;;  %v1993_v34 = vld [vmem:[#allocation8 + $0x18] sm:$0xff] }
 0x6f4   :  { %v5736_v4 = vadd.f32 %v1630_v19, %v1629_v43  ;;  %v5845_v43 = vld [vmem:[#allocation9 + $0x1e8] sm:$0xff]  ;;  %v5847_v19 = vld [vmem:[#allocation9 + $0x1e0] sm:$0xff] }
 0x6f5   :  { %7127 = vst [vmem:[#allocation19_spill] sm:$0xff] %v5845_v43 }
 0x6f6   :  { %4427 = vtanh.f32 %v5736_v4 }
 0x703   :  { %v4428_v6 = vpop.eup %4427 }
 0x704   :  { %v1633_v28 = vmul.f32 %v4428_v6, %v1625_v17 }
 0x706   :  { %v1635_v27 = vrot.slane %v1633_v28, 6 }
 0x708   :  { %1702 = vmatmul.mubr.f32.vlgmr.msra.gmra.mxu0 %v1635_v27  ;;  %1773 = vmatmul.mubr.f32.vlgmr.msra.gmra.mxu1 %v1635_v27 }
 0x709   :  { %1927 = vmatprep.mubr.f32.mxu0 %v7122_v55  ;;  %2095 = vmatprep.mubr.f32.mxu1 %v7122_v55 }
 0x70a   :  { %1864 = vmatpush1.msra.mxu0 %v1846_v13  ;;  %2056 = vmatpush1.msra.mxu1 %v2002_v57  ;;  %v5894_v57 = vld [vmem:[#allocation9 + $0x190] sm:$0xff] }
 0x70b   :  { %1865 = vmatprep.subr.mxu0 %v1845_v15  ;;  %2057 = vmatprep.subr.mxu1 %v1999_v12  ;;  %v5898_v12 = vld [vmem:[#allocation9 + $0x168] sm:$0xff] }
 0x70c   :  { %1866 = vmatpush1.msra.mxu0 %v1844_v8  ;;  %2058 = vmatpush1.msra.mxu1 %v1998_v20  ;;  %v5900_v20 = vld [vmem:[#allocation9 + $0x178] sm:$0xff] }
 0x70d   :  { %1867 = vmatprep.subr.mxu0 %v1843_v31  ;;  %2059 = vmatprep.subr.mxu1 %v1995_v62  ;;  %v5904_v62 = vld [vmem:[#allocation9 + $0x160] sm:$0xff] }
 0x70e   :  { %1868 = vmatpush1.msra.mxu0 %v1842_v14  ;;  %2060 = vmatpush1.msra.mxu1 %v1994_v1  ;;  %v5906_v1 = vld [vmem:[#allocation9 + $0x170] sm:$0xff] }
 0x70f   :  { %1869 = vmatprep.subr.mxu0 %v1841_v22  ;;  %2061 = vmatprep.subr.mxu1 %v1991_v5  ;;  %v5910_v5 = vld [vmem:[#allocation9 + $0x148] sm:$0xff] }
 0x710   :  { %1870 = vmatpush1.msra.mxu0 %v1840_v58  ;;  %2062 = vmatpush1.msra.mxu1 %v1990_v9  ;;  %v5912_v9 = vld [vmem:[#allocation9 + $0x158] sm:$0xff] }
 0x711   :  { %1871 = vmatprep.subr.mxu0 %v1839_v25  ;;  %4281 = vmatmul.mubr.msk.f32.vlgmr.msra.gmra.mxu1 %vm169_vm0, %v1989_v11 }
 0x712   :  { %1872 = vmatpush1.msra.mxu0 %v1838_v32  ;;  %2126 = vmatprep.subr.mxu1 %v2005_v40  ;;  %v5918_v40 = vld [vmem:[#allocation9 + $0x150] sm:$0xff] }
 0x713   :  { %1873 = vmatprep.subr.mxu0 %v1837_v29  ;;  %2127 = vmatpush1.msra.mxu1 %v2004_v23  ;;  %v5922_v23 = vld [vmem:[#allocation9 + $0x128] sm:$0xff] }
 0x714   :  { %1874 = vmatpush1.msra.mxu0 %v1836_v33  ;;  %2166 = vmatprep.mubr.f32.mxu1 %v7122_v55 }
 0x715   :  { %1875 = vmatprep.subr.mxu0 %v1835_v36  ;;  %2128 = vmatprep.subr.mxu1 %v2001_v21  ;;  %v5924_v21 = vld [vmem:[#allocation9 + $0x138] sm:$0xff] }
 0x716   :  { %1876 = vmatpush1.msra.mxu0 %v1834_v38  ;;  %2129 = vmatpush1.msra.mxu1 %v2000_v35  ;;  %v5926_v35 = vld [vmem:[#allocation9 + $0x120] sm:$0xff] }
 0x717   :  { %1877 = vmatprep.subr.mxu0 %v1833_v41  ;;  %2130 = vmatprep.subr.mxu1 %v1997_v37  ;;  %v5930_v37 = vld [vmem:[#allocation9 + $0x130] sm:$0xff] }
 0x718   :  { %1878 = vmatpush1.msra.mxu0 %v1832_v42  ;;  %2131 = vmatpush1.msra.mxu1 %v1996_v7  ;;  %v5932_v7 = vld [vmem:[#allocation9 + $0x108] sm:$0xff] }
 0x719   :  { %1879 = vmatprep.subr.mxu0 %v1831_v44  ;;  %2132 = vmatprep.subr.mxu1 %v1993_v34  ;;  %v5934_v34 = vld [vmem:[#allocation9 + $0x118] sm:$0xff] }
 0x71a   :  { %1880 = vmatpush1.msra.mxu0 %v1830_v45  ;;  %2133 = vmatpush1.msra.mxu1 %v1992_v39  ;;  %v5938_v39 = vld [vmem:[#allocation9 + $0x100] sm:$0xff] }
 0x71b   :  { %1881 = vmatprep.subr.mxu0 %v1829_v46  ;;  %4282 = vmatmul.mubr.msk.f32.vlgmr.msra.gmra.mxu1 %vm169_vm0, %v1989_v11  ;;  %v5916_v11 = vld [vmem:[#allocation9 + $0x140] sm:$0xff] }
 0x71c   :  { %1882 = vmatpush1.msra.mxu0 %v1828_v48  ;;  %2238 = vmatprep.subr.mxu1 %v5845_v43 }
 0x71d   :  { %1883 = vmatprep.subr.mxu0 %v1827_v50  ;;  %2239 = vmatpush1.msra.mxu1 %v5847_v19 }
 0x71e   :  { %1884 = vmatpush1.msra.mxu0 %v1826_v52  ;;  %2302 = vmatprep.mubr.f32.mxu1 %v7122_v55 }
 0x71f   :  { %1885 = vmatprep.subr.mxu0 %v1825_v54  ;;  %2240 = vmatprep.subr.mxu1 %v5849_v16 }
 0x720   :  { %1886 = vmatpush1.msra.mxu0 %v1824_v56  ;;  %v5861_v56 = vld [vmem:[#allocation9 + $0x1f0] sm:$0xff] }
 0x721   :  { %1887 = vmatprep.subr.mxu0 %v1823_v60  ;;  %v5863_v60 = vld [vmem:[#allocation9 + $0x1d8] sm:$0xff] }
 0x722   :  { %1888 = vmatpush1.msra.mxu0 %v1822_v3  ;;  %v5870_v3 = vld [vmem:[#allocation9 + $0x1d0] sm:$0xff] }
 0x723   :  { %1889 = vmatprep.subr.mxu0 %v1821_v47  ;;  %v5874_v47 = vld [vmem:[#allocation9 + $0x1a8] sm:$0xff] }
 0x724   :  { %1890 = vmatpush1.msra.mxu0 %v1820_v18  ;;  %v5876_v18 = vld [vmem:[#allocation9 + $0x1b8] sm:$0xff] }
 0x725   :  { %1891 = vmatprep.subr.mxu0 %v1819_v53  ;;  %v5880_v53 = vld [vmem:[#allocation9 + $0x1a0] sm:$0xff] }
 0x726   :  { %1892 = vmatpush1.msra.mxu0 %v1818_v0  ;;  %v5882_v0 = vld [vmem:[#allocation9 + $0x1b0] sm:$0xff] }
 0x727   :  { %1893 = vmatprep.subr.mxu0 %v1817_v63  ;;  %v5886_v63 = vld [vmem:[#allocation9 + $0x188] sm:$0xff] }
 0x728   :  { %1894 = vmatpush1.msra.mxu0 %v1816_v26  ;;  %v5888_v26 = vld [vmem:[#allocation9 + $0x198] sm:$0xff] }
 0x729   :  { %2309 = vmatprep.subr.mxu0 %v5840_v51 }
 0x7c8   :  { %v1703_v30 = vpop.f32.mrf.mxu0  ;;  %v1774_v6 = vpop.f32.mrf.mxu1 }
 0x7c9   :  { %v1783_v17 = vrot.slane %v1703_v30, 1  ;;  %v1785_v15 = vrot.slane %v1774_v6, 1  ;;  %v5940_v30 = vld [vmem:[#allocation9 + $0x110] sm:$0xff]  ;;  %v5946_v6 = vld [vmem:[#allocation9 + $0xf8] sm:$0xff] }
 0x7ca   :  { %v1705_v28 = vpop.f32.mrf.mxu0  ;;  %v1776_v14 = vpop.f32.mrf.mxu1 }
 0x7cb   :  { %v1791_v27 = vadd.f32 %v1783_v17, %v7026_v61  ;;  %v1784_v10 = vrot.slane %v1705_v28, 1  ;;  %v1793_v22 = vadd.f32 %v1785_v15, %v5155_v49  ;;  %v1786_v58 = vrot.slane %v1776_v14, 1  ;;  %v5942_v17 = vld [vmem:[#allocation9 + $0xe8] sm:$0xff]  ;;  %v5948_v28 = vld [vmem:[#allocation9 + $0xe0] sm:$0xff]  ;;  %v5968_v14 = vld [vmem:[#allocation9 + $0xb8] sm:$0xff] }
 0x7cc   :  { %v5960_v15 = vld [vmem:[#allocation9 + $0xc0] sm:$0xff] }
 0x7cd   :  { %v1795_v13 = vmul.f32 0.5, %v1791_v27  ;;  %v1792_v8 = vadd.f32 %v1784_v10, %v7124_v59  ;;  %v1794_v25 = vadd.f32 %v1786_v58, %v5160_v2  ;;  %v1809_v59 = vrot.slane %v5736_v4, 7  ;;  %v5868_v4 = vld [vmem:[#allocation9 + $0x1c0] sm:$0xff]  ;;  %v5950_v27 = vld [vmem:[#allocation9 + $0xf0] sm:$0xff]  ;;  %v5954_v10 = vld [vmem:[#allocation9 + $0xc8] sm:$0xff] }
 0x7ce   :  { %2241 = vmatpush1.msra.mxu1 %v5868_v4  ;;  %v5974_v58 = vld [vmem:[#allocation9 + $0xb0] sm:$0xff] }
 0x7cf   :  { %4429 = vtanh.f32 %v1795_v13  ;;  %v1799_v31 = vmul.f32 0.5, %v1792_v8  ;;  %v1804_v32 = vmul.f32 0.5, %v1794_v25  ;;  %2242 = vmatprep.subr.mxu1 %v5874_v47  ;;  %v5956_v13 = vld [vmem:[#allocation9 + $0xd8] sm:$0xff]  ;;  %v5962_v8 = vld [vmem:[#allocation9 + $0xd0] sm:$0xff]  ;;  %v5978_v25 = vld [vmem:[#allocation9 + $0x88] sm:$0xff] }
 0x7d0   :  { %2243 = vmatpush1.msra.mxu1 %v5880_v53 }
 0x7d1   :  { %4431 = vtanh.f32 %v1799_v31  ;;  %2244 = vmatprep.subr.mxu1 %v5886_v63  ;;  %v5966_v31 = vld [vmem:[#allocation9 + $0xa8] sm:$0xff] }
 0x7d2   :  { %4433 = vtanh.f32 %v1793_v22  ;;  %2245 = vmatpush1.msra.mxu1 %v5892_v24  ;;  %v5972_v22 = vld [vmem:[#allocation9 + $0xa0] sm:$0xff] }
 0x7d3   :  { %4435 = vtanh.f32 %v1804_v32  ;;  %2246 = vmatprep.subr.mxu1 %v5898_v12  ;;  %v5980_v32 = vld [vmem:[#allocation9 + $0x98] sm:$0xff] }
 0x7d4   :  { %2247 = vmatpush1.msra.mxu1 %v5904_v62  ;;  %7128 = vst [vmem:[#allocation34_spill] sm:$0xff] %v5980_v32 }
 0x7d5   :  { %2248 = vmatprep.subr.mxu1 %v5910_v5 }
 0x7d6   :  { %2249 = vmatpush1.msra.mxu1 %v5916_v11 }
 0x7d7   :  { %2250 = vmatprep.subr.mxu1 %v5922_v23 }
 0x7d8   :  { %2251 = vmatpush1.msra.mxu1 %v5926_v35 }
 0x7d9   :  { %2252 = vmatprep.subr.mxu1 %v5932_v7 }
 0x7da   :  { %2253 = vmatpush1.msra.mxu1 %v5938_v39 }
 0x7db   :  { %2254 = vmatprep.subr.mxu1 %v5942_v17 }
 0x7dc   :  { %v4430_v29 = vpop.eup %4429  ;;  %2255 = vmatpush1.msra.mxu1 %v5948_v28 }
 0x7dd   :  { %v1797_v33 = vadd.f32 1.0, %v4430_v29  ;;  %2256 = vmatprep.subr.mxu1 %v5954_v10  ;;  %v5984_v29 = vld [vmem:[#allocation9 + $0x80] sm:$0xff] }
 0x7de   :  { %v4432_v36 = vpop.eup %4431  ;;  %2257 = vmatpush1.msra.mxu1 %v5960_v15  ;;  %7129 = vst [vmem:[#allocation18_spill] sm:$0xff] %v5984_v29 }
 0x7df   :  { %v1798_v61 = vmul.f32 0.5, %v1797_v33  ;;  %v1801_v38 = vadd.f32 1.0, %v4432_v36  ;;  %v4434_v42 = vpop.eup %4433  ;;  %2258 = vmatprep.subr.mxu1 %v5966_v31  ;;  %v5986_v33 = vld [vmem:[#allocation9 + $0x90] sm:$0xff]  ;;  %v5990_v36 = vld [vmem:[#allocation9 + $0x68] sm:$0xff] }
 0x7e0   :  { %v4436_v49 = vpop.eup %4435  ;;  %7130 = vst [vmem:[#allocation24_spill] sm:$0xff] %v5986_v33  ;;  %2259 = vmatpush1.msra.mxu1 %v5972_v22  ;;  %7131 = vst [vmem:[#allocation43_spill] sm:$0xff] %v5990_v36 }
 0x7e1   :  { %v1802_v41 = vmul.f32 0.5, %v1801_v38  ;;  %v1812_v45 = vmul.f32 %v4434_v42, %v1798_v61  ;;  %v1806_v48 = vadd.f32 1.0, %v4436_v49  ;;  %v5992_v61 = vld [vmem:[#allocation9 + $0x78] sm:$0xff]  ;;  %2260 = vmatprep.subr.mxu1 %v5978_v25  ;;  %v5996_v38 = vld [vmem:[#allocation9 + $0x60] sm:$0xff] }
 0x7e2   :  { %7132 = vst [vmem:[#allocation35_spill] sm:$0xff] %v5992_v61  ;;  %7133 = vst [vmem:[#allocation17_spill] sm:$0xff] %v5996_v38  ;;  %2261 = vmatpush1.msra.mxu1 %v5984_v29  ;;  %v6004_v42 = vld [vmem:[#allocation9 + $0x58] sm:$0xff] }
 0x7e3   :  { %v1811_v44 = vmul.f32 %v1809_v59, %v1802_v41  ;;  %v1807_v50 = vmul.f32 0.5, %v1806_v48  ;;  %v5998_v41 = vld [vmem:[#allocation9 + $0x70] sm:$0xff]  ;;  %v6002_v59 = vld [vmem:[#allocation9 + $0x48] sm:$0xff]  ;;  %7136 = vst [vmem:[#allocation36_spill] sm:$0xff] %v6004_v42  ;;  %2262 = vmatprep.subr.mxu1 %v5990_v36  ;;  %v6016_v49 = vld [vmem:[#allocation9 + $0x38] sm:$0xff] }
 0x7e4   :  { %7134 = vst [vmem:[#allocation25_spill] sm:$0xff] %v5998_v41  ;;  %7135 = vst [vmem:[#allocation30_spill] sm:$0xff] %v6002_v59  ;;  %2263 = vmatpush1.msra.mxu1 %v5996_v38  ;;  %v6020_v48 = vld [vmem:[#allocation9 + $0x20] sm:$0xff] }
 0x7e5   :  { %v1813_v46 = vadd.f32 %v1812_v45, %v1811_v44  ;;  %v6008_v44 = vld [vmem:[#allocation9 + $0x40] sm:$0xff]  ;;  %v6010_v45 = vld [vmem:[#allocation9 + $0x50] sm:$0xff]  ;;  %7140 = vst [vmem:[#allocation37_spill] sm:$0xff] %v6016_v49  ;;  %2264 = vmatprep.subr.mxu1 %v6002_v59  ;;  %7141 = vst [vmem:[#allocation21_spill] sm:$0xff] %v6020_v48 }
 0x7e6   :  { %7137 = vst [vmem:[#allocation20_spill] sm:$0xff] %v6008_v44  ;;  %7138 = vst [vmem:[#allocation26_spill] sm:$0xff] %v6010_v45  ;;  %2265 = vmatpush1.msra.mxu1 %v6008_v44 }
 0x7e7   :  { %4437 = vtanh.f32 %v1813_v46  ;;  %v6014_v46 = vld [vmem:[#allocation9 + $0x28] sm:$0xff] }
 0x7e8   :  { %7139 = vst [vmem:[#allocation31_spill] sm:$0xff] %v6014_v46  ;;  %2266 = vmatprep.subr.mxu1 %v6014_v46  ;;  %v7147_v46 = vld [vmem:[#allocation42_spill] sm:$0xff] }
 0x7e9   :  { %2267 = vmatpush1.msra.mxu1 %v6020_v48 }
 0x7f4   :  { %v4438_v52 = vpop.eup %4437 }
 0x7f5   :  { %v1815_v2 = vmul.f32 %v4438_v52, %v1807_v50  ;;  %v6022_v50 = vld [vmem:[#allocation9 + $0x30] sm:$0xff]  ;;  %v6026_v52 = vld [vmem:[#allocation9 + $0x8] sm:$0xff] }
 0x7f6   :  { %7142 = vst [vmem:[#allocation27_spill] sm:$0xff] %v6022_v50  ;;  %7143 = vst [vmem:[#allocation32_spill] sm:$0xff] %v6026_v52  ;;  %2268 = vmatprep.subr.mxu1 %v6026_v52 }
 0x7f7   :  { %v1850_v54 = vrot.slane %v1815_v2, 7  ;;  %v6028_v2 = vld [vmem:[#allocation9 + $0x18] sm:$0xff] }
 0x7f8   :  { %7144 = vst [vmem:[#allocation38_spill] sm:$0xff] %v6028_v2 }
 0x7f9   :  { %1928 = vmatmul.mubr.f32.vlgmr.msra.gmra.mxu0 %v1850_v54  ;;  %v6032_v54 = vld [vmem:[#allocation9] sm:$0xff] }
 0x7fa   :  { %2310 = vmatpush1.msra.mxu0 %v5861_v56  ;;  %2373 = vmatprep.mubr.f32.mxu0 %v7122_v55  ;;  %7145 = vst [vmem:[#allocation22_spill] sm:$0xff] %v6032_v54  ;;  %v6034_v55 = vld [vmem:[#allocation9 + $0x10] sm:$0xff] }
 0x7fb   :  { %2311 = vmatprep.subr.mxu0 %v5863_v60  ;;  %7146 = vst [vmem:[#allocation28_spill] sm:$0xff] %v6034_v55  ;;  %2269 = vmatpush1.msra.mxu1 %v6032_v54  ;;  %v7149_v54 = vld [vmem:[#allocation41_spill] sm:$0xff] }
 0x7fc   :  { %2312 = vmatpush1.msra.mxu0 %v5870_v3  ;;  %2467 = vmatprep.subr.mxu1 %v5845_v43 }
 0x7fd   :  { %2313 = vmatprep.subr.mxu0 %v5876_v18 }
 0x7fe   :  { %2314 = vmatpush1.msra.mxu0 %v5882_v0 }
 0x7ff   :  { %2315 = vmatprep.subr.mxu0 %v5888_v26 }
 0x800   :  { %2316 = vmatpush1.msra.mxu0 %v5894_v57 }
 0x801   :  { %2317 = vmatprep.subr.mxu0 %v5900_v20 }
 0x802   :  { %2318 = vmatpush1.msra.mxu0 %v5906_v1 }
 0x803   :  { %2319 = vmatprep.subr.mxu0 %v5912_v9 }
 0x804   :  { %2320 = vmatpush1.msra.mxu0 %v5918_v40 }
 0x805   :  { %2321 = vmatprep.subr.mxu0 %v5924_v21 }
 0x806   :  { %2322 = vmatpush1.msra.mxu0 %v5930_v37 }
 0x807   :  { %2323 = vmatprep.subr.mxu0 %v5934_v34 }
 0x808   :  { %2324 = vmatpush1.msra.mxu0 %v5940_v30 }
 0x809   :  { %2325 = vmatprep.subr.mxu0 %v5946_v6 }
 0x80a   :  { %2326 = vmatpush1.msra.mxu0 %v5950_v27 }
 0x80b   :  { %2327 = vmatprep.subr.mxu0 %v5956_v13 }
 0x80c   :  { %2328 = vmatpush1.msra.mxu0 %v5962_v8 }
 0x80d   :  { %2329 = vmatprep.subr.mxu0 %v5968_v14 }
 0x80e   :  { %2330 = vmatpush1.msra.mxu0 %v5974_v58 }
 0x80f   :  { %2331 = vmatprep.subr.mxu0 %v5980_v32 }
 0x810   :  { %2332 = vmatpush1.msra.mxu0 %v5986_v33 }
 0x811   :  { %2333 = vmatprep.subr.mxu0 %v5992_v61 }
 0x812   :  { %2334 = vmatpush1.msra.mxu0 %v5998_v41 }
 0x813   :  { %2335 = vmatprep.subr.mxu0 %v6004_v42 }
 0x814   :  { %2336 = vmatpush1.msra.mxu0 %v6010_v45 }
 0x815   :  { %2337 = vmatprep.subr.mxu0 %v6016_v49  ;;  %v1848_v49 = vld [vmem:[%s6778_s12] sm:$0x3] }
 0x816   :  { %2338 = vmatpush1.msra.mxu0 %v6022_v50  ;;  %v1860_v48 = vrot.slane %v1848_v49, %v7147_v46  ;;  %v1987_v46 = vld [vmem:[%s6770_s4] sm:$0x1] }
 0x817   :  { %2339 = vmatprep.subr.mxu0 %v6028_v2 }
 0x818   :  { %2340 = vmatpush1.msra.mxu0 %v6034_v55  ;;  %v1856_v55 = vrot.slane %v1848_v49, %v7149_v54  ;;  %v7157_v49 = vld [vmem:[#allocation21_spill] sm:$0xff] }
 0x819   :  { %2538 = vmatprep.subr.mxu0 %v5840_v51  ;;  %v1934_v51 = vld [vmem:[%s6772_s6] sm:$0x1] }
 0x8b9   :  { %v1929_v45 = vpop.f32.mrf.mxu0 }
 0x8ba   :  { %v6055_v42 = vadd.f32 %v1929_v45, %v1856_v55  ;;  %v7151_v55 = vld [vmem:[#allocation30_spill] sm:$0xff]  ;;  %v7155_v45 = vld [vmem:[#allocation31_spill] sm:$0xff] }
 0x8bb   :  { %v1931_v50 = vpop.f32.mrf.mxu0 }
 0x8bc   :  { %v6048_v44 = vadd.f32 %v1931_v50, %v1860_v48  ;;  %7150 = vst [vmem:[#allocation39_spill] sm:$0xff] %v6055_v42 }
 0x8be   :  { %7148 = vst [vmem:[#allocation33_spill] sm:$0xff] %v6048_v44  ;;  %v1935_v2 = vmul.f32 0.5, %v6048_v44  ;;  %v7162_v44 = vmov 0.0  }
 0x8c0   :  { %v1936_v52 = vmul.f32 1.442695, %v1935_v2  ;;  %v7159_v2 = vld [vmem:[#allocation32_spill] sm:$0xff] }
 0x8c2   :  { %4439 = vpow2.f32 %v1936_v52  ;;  %v7158_v52 = vld [vmem:[#allocation27_spill] sm:$0xff] }
 0x8cf   :  { %v4440_v43 = vpop.eup %4439 }
 0x8d0   :  { %v1938_v59 = vmul.f32 %v4440_v43, %v1934_v51  ;;  %v7152_v51 = vld [vmem:[#allocation36_spill] sm:$0xff] }
 0x8d1   :  { %v7153_v43 = vld [vmem:[#allocation20_spill] sm:$0xff] }
 0x8d2   :  { %v1939_v48 = vadd.f32 %v1938_v59, %v6055_v42  ;;  %v7154_v59 = vld [vmem:[#allocation26_spill] sm:$0xff]  ;;  %v7163_v42 = vld [vmem:[#allocation28_spill] sm:$0xff] }
 0x8d4   :  { %v1988_v50 = vadd.f32 %v1987_v46, %v1939_v48  ;;  %v7156_v46 = vld [vmem:[#allocation37_spill] sm:$0xff]  ;;  %v7160_v48 = vld [vmem:[#allocation38_spill] sm:$0xff] }
 0x8d6   :  { %2303 = vmatmul.mubr.f32.vlgmr.msra.gmra.mxu1 %v1988_v50  ;;  %2374 = vmatmul.mubr.f32.vlgmr.msra.gmra.mxu0 %v1988_v50  ;;  %v7161_v50 = vld [vmem:[#allocation22_spill] sm:$0xff] }
 0x8d7   :  { %2468 = vmatpush1.msra.mxu1 %v5847_v19  ;;  %2539 = vmatpush1.msra.mxu0 %v5861_v56 }
 0x8d8   :  { %2469 = vmatprep.subr.mxu1 %v5849_v16  ;;  %2540 = vmatprep.subr.mxu0 %v5863_v60 }
 0x8d9   :  { %2470 = vmatpush1.msra.mxu1 %v5868_v4  ;;  %2541 = vmatpush1.msra.mxu0 %v5870_v3 }
 0x8da   :  { %2471 = vmatprep.subr.mxu1 %v5874_v47  ;;  %2542 = vmatprep.subr.mxu0 %v5876_v18 }
 0x8db   :  { %2472 = vmatpush1.msra.mxu1 %v5880_v53  ;;  %2543 = vmatpush1.msra.mxu0 %v5882_v0 }
 0x8dc   :  { %2473 = vmatprep.subr.mxu1 %v5886_v63  ;;  %2544 = vmatprep.subr.mxu0 %v5888_v26 }
 0x8dd   :  { %2474 = vmatpush1.msra.mxu1 %v5892_v24  ;;  %2545 = vmatpush1.msra.mxu0 %v5894_v57 }
 0x8de   :  { %2475 = vmatprep.subr.mxu1 %v5898_v12  ;;  %2546 = vmatprep.subr.mxu0 %v5900_v20 }
 0x8df   :  { %2476 = vmatpush1.msra.mxu1 %v5904_v62  ;;  %2547 = vmatpush1.msra.mxu0 %v5906_v1 }
 0x8e0   :  { %2477 = vmatprep.subr.mxu1 %v5910_v5  ;;  %2548 = vmatprep.subr.mxu0 %v5912_v9 }
 0x8e1   :  { %2478 = vmatpush1.msra.mxu1 %v5916_v11  ;;  %2549 = vmatpush1.msra.mxu0 %v5918_v40 }
 0x8e2   :  { %2479 = vmatprep.subr.mxu1 %v5922_v23  ;;  %2550 = vmatprep.subr.mxu0 %v5924_v21 }
 0x8e3   :  { %2480 = vmatpush1.msra.mxu1 %v5926_v35  ;;  %2551 = vmatpush1.msra.mxu0 %v5930_v37 }
 0x8e4   :  { %2481 = vmatprep.subr.mxu1 %v5932_v7  ;;  %2552 = vmatprep.subr.mxu0 %v5934_v34 }
 0x8e5   :  { %2482 = vmatpush1.msra.mxu1 %v5938_v39  ;;  %2553 = vmatpush1.msra.mxu0 %v5940_v30 }
 0x8e6   :  { %2483 = vmatprep.subr.mxu1 %v5942_v17  ;;  %2554 = vmatprep.subr.mxu0 %v5946_v6 }
 0x8e7   :  { %2484 = vmatpush1.msra.mxu1 %v5948_v28  ;;  %2555 = vmatpush1.msra.mxu0 %v5950_v27 }
 0x8e8   :  { %2485 = vmatprep.subr.mxu1 %v5954_v10  ;;  %2556 = vmatprep.subr.mxu0 %v5956_v13 }
 0x8e9   :  { %2486 = vmatpush1.msra.mxu1 %v5960_v15  ;;  %2557 = vmatpush1.msra.mxu0 %v5962_v8 }
 0x8ea   :  { %2487 = vmatprep.subr.mxu1 %v5966_v31  ;;  %2558 = vmatprep.subr.mxu0 %v5968_v14 }
 0x8eb   :  { %2488 = vmatpush1.msra.mxu1 %v5972_v22  ;;  %2559 = vmatpush1.msra.mxu0 %v5974_v58 }
 0x8ec   :  { %2489 = vmatprep.subr.mxu1 %v5978_v25  ;;  %2560 = vmatprep.subr.mxu0 %v5980_v32 }
 0x8ed   :  { %2490 = vmatpush1.msra.mxu1 %v5984_v29  ;;  %2561 = vmatpush1.msra.mxu0 %v5986_v33 }
 0x8ee   :  { %2491 = vmatprep.subr.mxu1 %v5990_v36  ;;  %2562 = vmatprep.subr.mxu0 %v5992_v61 }
 0x8ef   :  { %2492 = vmatpush1.msra.mxu1 %v5996_v38  ;;  %2563 = vmatpush1.msra.mxu0 %v5998_v41 }
 0x8f0   :  { %2493 = vmatprep.subr.mxu1 %v7151_v55  ;;  %2564 = vmatprep.subr.mxu0 %v7152_v51 }
 0x8f1   :  { %2494 = vmatpush1.msra.mxu1 %v7153_v43  ;;  %2565 = vmatpush1.msra.mxu0 %v7154_v59  ;;  %v7164_v59 = vld [vmem:[#allocation19_spill] sm:$0xff] }
 0x8f2   :  { %2495 = vmatprep.subr.mxu1 %v7155_v45  ;;  %2566 = vmatprep.subr.mxu0 %v7156_v46  ;;  %v7165_v45 = vld [vmem:[#allocation29_spill] sm:$0xff]  ;;  %v2097_v46 = vpop.f32.mrf.mxu1 }
 0x8f3   :  { %2496 = vmatpush1.msra.mxu1 %v7157_v49  ;;  %2567 = vmatpush1.msra.mxu0 %v7158_v52  ;;  %v2006_v52 = vld [vmem:[%s6781_s15] sm:$0xf] }
 0x8f4   :  { %2497 = vmatprep.subr.mxu1 %v7159_v2  ;;  %2568 = vmatprep.subr.mxu0 %v7160_v48  ;;  %v2099_v2 = vpop.f32.mrf.mxu1  ;;  %v2011_v48 = vrot.slane %v2006_v52, %v7149_v54 }
 0x8f5   :  { %2498 = vmatpush1.msra.mxu1 %v7161_v50  ;;  %2531 = vmatprep.mubr.f32.mxu1 %v7162_v44  ;;  %v7166_v50 = vld [vmem:[#allocation42_spill] sm:$0xff] }
 0x8f6   :  { %2569 = vmatpush1.msra.mxu0 %v7163_v42  ;;  %2602 = vmatprep.mubr.f32.mxu0 %v7162_v44  ;;  %v2168_v49 = vpop.f32.mrf.mxu1  ;;  %v2015_v43 = vrot.slane %v2006_v52, %v7166_v50  ;;  %v6132_v55 = vadd.f32 %v2097_v46, %v2011_v48 }
 0x8f7   :  { %2714 = vmatprep.subr.mxu1 %v7164_v59  ;;  %2785 = vmatprep.subr.mxu0 %v7165_v45  ;;  %v7168_v59 = vld [vmem:[#allocation40_spill] sm:$0xff] }
 0x8f8   :  { %v2170_v51 = vpop.f32.mrf.mxu1  ;;  %v6134_v44 = vadd.f32 %v2099_v2, %v2015_v43  ;;  %v7169_v41 = vsub.s32 2, %v7168_v59  ;;  %v7170_v46 = vsub.s32 3, %v7168_v59 }
 0x8fa   :  { %7167 = vst [vmem:[#allocation23_spill] sm:$0xff] %v6134_v44  ;;  %v2019_v45 = vrot.slane %v2006_v52, %v7169_v41  ;;  %v2023_v48 = vrot.slane %v2006_v52, %v7170_v46 }
 0x8fc   :  { %v6140_v32 = vadd.f32 %v2168_v49, %v2019_v45  ;;  %v6145_v50 = vadd.f32 %v2170_v51, %v2023_v48 }
 0x996   :  { %v2304_v42 = vpop.f32.mrf.mxu1  ;;  %v2375_v29 = vpop.f32.mrf.mxu0 }
 0x997   :  { %v2380_v38 = vadd.f32 %v2304_v42, %v6132_v55  ;;  %v2382_v43 = vadd.f32 %v2375_v29, %v6140_v32 }
 0x998   :  { %v2306_v61 = vpop.f32.mrf.mxu1  ;;  %v2377_v2 = vpop.f32.mrf.mxu0 }
 0x999   :  { %v2384_v36 = vmul.f32 0.5, %v2380_v38  ;;  %v2381_v33 = vadd.f32 %v2306_v61, %v6134_v44  ;;  %v2383_v41 = vadd.f32 %v2377_v2, %v6145_v50 }
 0x99b   :  { %4441 = vtanh.f32 %v2384_v36  ;;  %v2388_v54 = vmul.f32 0.5, %v2381_v33  ;;  %v2393_v38 = vmul.f32 0.5, %v2383_v41  ;;  %v2173_v33 = vld [vmem:[%s6771_s5] sm:$0x1]  ;;  %v7180_v41 = vld [vmem:[#allocation20_spill] sm:$0xff] }
 0x99d   :  { %4443 = vtanh.f32 %v2388_v54 }
 0x99e   :  { %4445 = vtanh.f32 %v2382_v43 }
 0x99f   :  { %4447 = vtanh.f32 %v2393_v38  ;;  %v7181_v38 = vld [vmem:[#allocation26_spill] sm:$0xff] }
 0x9a8   :  { %v4442_v42 = vpop.eup %4441 }
 0x9a9   :  { %v2386_v61 = vadd.f32 1.0, %v4442_v42  ;;  %v7182_v42 = vld [vmem:[#allocation31_spill] sm:$0xff] }
 0x9aa   :  { %v4444_v44 = vpop.eup %4443 }
 0x9ab   :  { %v2387_v49 = vmul.f32 0.5, %v2386_v61  ;;  %v2390_v45 = vadd.f32 1.0, %v4444_v44  ;;  %v4446_v29 = vpop.eup %4445  ;;  %v7179_v44 = vld [vmem:[#allocation36_spill] sm:$0xff]  ;;  %v7183_v61 = vld [vmem:[#allocation37_spill] sm:$0xff] }
 0x9ac   :  { %v4448_v54 = vpop.eup %4447 }
 0x9ad   :  { %v2391_v36 = vmul.f32 0.5, %v2390_v45  ;;  %v2398_v59 = vmul.f32 %v4446_v29, %v2387_v49  ;;  %v2395_v46 = vadd.f32 1.0, %v4448_v54  ;;  %v7184_v49 = vld [vmem:[#allocation21_spill] sm:$0xff]  ;;  %v7185_v45 = vld [vmem:[#allocation27_spill] sm:$0xff]  ;;  %v7188_v29 = vld [vmem:[#allocation22_spill] sm:$0xff] }
 0x9af   :  { %v2397_v52 = vmul.f32 %v2391_v36, %v2173_v33  ;;  %v2396_v48 = vmul.f32 0.5, %v2395_v46  ;;  %v7186_v33 = vld [vmem:[#allocation32_spill] sm:$0xff]  ;;  %v7187_v36 = vld [vmem:[#allocation38_spill] sm:$0xff] }
 0x9b1   :  { %v6151_v51 = vadd.f32 %v2398_v59, %v2397_v52  ;;  %v7189_v52 = vmov 0.0   ;;  %v7190_v59 = vld [vmem:[#allocation28_spill] sm:$0xff] }
 0x9b3   :  { %4449 = vtanh.f32 %v6151_v51 }
 0x9c0   :  { %v4450_v43 = vpop.eup %4449 }
 0x9c1   :  { %v2401_v2 = vmul.f32 %v4450_v43, %v2396_v48 }
 0x9c3   :  { %2402 = vst [vmem:[#allocation2] sm:$0x1] %v2401_v2  ;;  %2532 = vmatmul.mubr.f32.vlgmr.msra.gmra.mxu1 %v2401_v2  ;;  %2603 = vmatmul.mubr.f32.vlgmr.msra.gmra.mxu0 %v2401_v2 }
 0x9c4   :  { %2715 = vmatpush1.msra.mxu1 %v5847_v19  ;;  %2786 = vmatpush1.msra.mxu0 %v5861_v56  ;;  %v7171_v19 = vld [vmem:[#allocation34_spill] sm:$0xff]  ;;  %v7173_v56 = vld [vmem:[#allocation24_spill] sm:$0xff] }
 0x9c5   :  { %2716 = vmatprep.subr.mxu1 %v5849_v16  ;;  %2787 = vmatprep.subr.mxu0 %v5863_v60  ;;  %v7172_v16 = vld [vmem:[#allocation18_spill] sm:$0xff]  ;;  %v7174_v60 = vld [vmem:[#allocation43_spill] sm:$0xff] }
 0x9c6   :  { %2717 = vmatpush1.msra.mxu1 %v5868_v4  ;;  %2788 = vmatpush1.msra.mxu0 %v5870_v3  ;;  %v7175_v4 = vld [vmem:[#allocation35_spill] sm:$0xff]  ;;  %v7176_v3 = vld [vmem:[#allocation17_spill] sm:$0xff] }
 0x9c7   :  { %2718 = vmatprep.subr.mxu1 %v5874_v47  ;;  %2789 = vmatprep.subr.mxu0 %v5876_v18  ;;  %v7177_v47 = vld [vmem:[#allocation25_spill] sm:$0xff]  ;;  %v7178_v18 = vld [vmem:[#allocation30_spill] sm:$0xff] }
 0x9c8   :  { %2719 = vmatpush1.msra.mxu1 %v5880_v53  ;;  %2790 = vmatpush1.msra.mxu0 %v5882_v0 }
 0x9c9   :  { %2720 = vmatprep.subr.mxu1 %v5886_v63  ;;  %2791 = vmatprep.subr.mxu0 %v5888_v26 }
 0x9ca   :  { %2721 = vmatpush1.msra.mxu1 %v5892_v24  ;;  %2792 = vmatpush1.msra.mxu0 %v5894_v57 }
 0x9cb   :  { %2722 = vmatprep.subr.mxu1 %v5898_v12  ;;  %2793 = vmatprep.subr.mxu0 %v5900_v20 }
 0x9cc   :  { %2723 = vmatpush1.msra.mxu1 %v5904_v62  ;;  %2794 = vmatpush1.msra.mxu0 %v5906_v1 }
 0x9cd   :  { %2724 = vmatprep.subr.mxu1 %v5910_v5  ;;  %2795 = vmatprep.subr.mxu0 %v5912_v9 }
 0x9ce   :  { %2725 = vmatpush1.msra.mxu1 %v5916_v11  ;;  %2796 = vmatpush1.msra.mxu0 %v5918_v40 }
 0x9cf   :  { %2726 = vmatprep.subr.mxu1 %v5922_v23  ;;  %2797 = vmatprep.subr.mxu0 %v5924_v21 }
 0x9d0   :  { %2727 = vmatpush1.msra.mxu1 %v5926_v35  ;;  %2798 = vmatpush1.msra.mxu0 %v5930_v37 }
 0x9d1   :  { %2728 = vmatprep.subr.mxu1 %v5932_v7  ;;  %2799 = vmatprep.subr.mxu0 %v5934_v34 }
 0x9d2   :  { %2729 = vmatpush1.msra.mxu1 %v5938_v39  ;;  %2800 = vmatpush1.msra.mxu0 %v5940_v30 }
 0x9d3   :  { %2730 = vmatprep.subr.mxu1 %v5942_v17  ;;  %2801 = vmatprep.subr.mxu0 %v5946_v6 }
 0x9d4   :  { %2731 = vmatpush1.msra.mxu1 %v5948_v28  ;;  %2802 = vmatpush1.msra.mxu0 %v5950_v27 }
 0x9d5   :  { %2732 = vmatprep.subr.mxu1 %v5954_v10  ;;  %2803 = vmatprep.subr.mxu0 %v5956_v13 }
 0x9d6   :  { %2733 = vmatpush1.msra.mxu1 %v5960_v15  ;;  %2804 = vmatpush1.msra.mxu0 %v5962_v8 }
 0x9d7   :  { %2734 = vmatprep.subr.mxu1 %v5966_v31  ;;  %2805 = vmatprep.subr.mxu0 %v5968_v14 }
 0x9d8   :  { %2735 = vmatpush1.msra.mxu1 %v5972_v22  ;;  %2806 = vmatpush1.msra.mxu0 %v5974_v58 }
 0x9d9   :  { %2736 = vmatprep.subr.mxu1 %v5978_v25  ;;  %2807 = vmatprep.subr.mxu0 %v7171_v19 }
 0x9da   :  { %2737 = vmatpush1.msra.mxu1 %v7172_v16  ;;  %2808 = vmatpush1.msra.mxu0 %v7173_v56 }
 0x9db   :  { %2738 = vmatprep.subr.mxu1 %v7174_v60  ;;  %2809 = vmatprep.subr.mxu0 %v7175_v4 }
 0x9dc   :  { %2739 = vmatpush1.msra.mxu1 %v7176_v3  ;;  %2810 = vmatpush1.msra.mxu0 %v7177_v47 }
 0x9dd   :  { %2740 = vmatprep.subr.mxu1 %v7178_v18  ;;  %2811 = vmatprep.subr.mxu0 %v7179_v44 }
 0x9de   :  { %2741 = vmatpush1.msra.mxu1 %v7180_v41  ;;  %2812 = vmatpush1.msra.mxu0 %v7181_v38 }
 0x9df   :  { %2742 = vmatprep.subr.mxu1 %v7182_v42  ;;  %2813 = vmatprep.subr.mxu0 %v7183_v61 }
 0x9e0   :  { %2743 = vmatpush1.msra.mxu1 %v7184_v49  ;;  %2814 = vmatpush1.msra.mxu0 %v7185_v45 }
 0x9e1   :  { %2744 = vmatprep.subr.mxu1 %v7186_v33  ;;  %2815 = vmatprep.subr.mxu0 %v7187_v36  ;;  %v7191_v33 = vld [vmem:[#allocation23_spill] sm:$0xff] }
 0x9e2   :  { %2745 = vmatpush1.msra.mxu1 %v7188_v29  ;;  %2778 = vmatprep.mubr.f32.mxu1 %v7189_v52 }
 0x9e3   :  { %2816 = vmatpush1.msra.mxu0 %v7190_v59  ;;  %2849 = vmatprep.mubr.f32.mxu0 %v7189_v52 }
 0xa83   :  { %v2533_v54 = vpop.f32.mrf.mxu1  ;;  %v2604_v48 = vpop.f32.mrf.mxu0 }
 0xa84   :  { %v2613_v46 = vrot.slane %v2533_v54, 7  ;;  %v2615_v61 = vrot.slane %v2604_v48, 7 }
 0xa85   :  { %v2535_v43 = vpop.f32.mrf.mxu1  ;;  %v2606_v29 = vpop.f32.mrf.mxu0 }
 0xa86   :  { %v2621_v2 = vadd.f32 %v2613_v46, %v6132_v55  ;;  %v2614_v49 = vrot.slane %v2535_v43, 7  ;;  %v2623_v38 = vadd.f32 %v2615_v61, %v6140_v32  ;;  %v2616_v59 = vrot.slane %v2606_v29, 7 }
 0xa88   :  { %v2625_v45 = vmul.f32 0.5, %v2621_v2  ;;  %v2622_v42 = vadd.f32 %v2614_v49, %v7191_v33  ;;  %v2624_v41 = vadd.f32 %v2616_v59, %v6145_v50  ;;  %v2639_v49 = vrot.slane %v6151_v51, 7  ;;  %v6228_v51 = vld [vmem:[#allocation9 + $0x1e8] sm:$0xff]  ;;  %v6236_v59 = vld [vmem:[#allocation9 + $0x1f0] sm:$0xff] }
 0xa89   :  { %7192 = vst [vmem:[#allocation44_spill] sm:$0xff] %v6228_v51  ;;  %2961 = vmatprep.subr.mxu1 %v6228_v51 }
 0xa8a   :  { %4451 = vtanh.f32 %v2625_v45  ;;  %v2629_v36 = vmul.f32 0.5, %v2622_v42  ;;  %v2634_v54 = vmul.f32 0.5, %v2624_v41 }
 0xa8c   :  { %4453 = vtanh.f32 %v2629_v36 }
 0xa8d   :  { %4455 = vtanh.f32 %v2623_v38 }
 0xa8e   :  { %4457 = vtanh.f32 %v2634_v54  ;;  %v6240_v54 = vld [vmem:[#allocation9 + $0x1c8] sm:$0xff] }
 0xa97   :  { %v4452_v44 = vpop.eup %4451 }
 0xa98   :  { %v2627_v18 = vadd.f32 1.0, %v4452_v44 }
 0xa99   :  { %v4454_v47 = vpop.eup %4453 }
 0xa9a   :  { %v2628_v46 = vmul.f32 0.5, %v2627_v18  ;;  %v2631_v43 = vadd.f32 1.0, %v4454_v47  ;;  %v4456_v45 = vpop.eup %4455  ;;  %v6230_v47 = vld [vmem:[#allocation9 + $0x1f8] sm:$0xff]  ;;  %v6234_v18 = vld [vmem:[#allocation9 + $0x1e0] sm:$0xff] }
 0xa9b   :  { %v4458_v38 = vpop.eup %4457  ;;  %7193 = vst [vmem:[#allocation41_spill] sm:$0xff] %v6230_v47  ;;  %3032 = vmatprep.subr.mxu0 %v6230_v47 }
 0xa9c   :  { %v2632_v48 = vmul.f32 0.5, %v2631_v43  ;;  %v2642_v2 = vmul.f32 %v4456_v45, %v2628_v46  ;;  %v2636_v61 = vadd.f32 1.0, %v4458_v38  ;;  %v6242_v46 = vld [vmem:[#allocation9 + $0x1d8] sm:$0xff]  ;;  %v6246_v43 = vld [vmem:[#allocation9 + $0x1c0] sm:$0xff] }
 0xa9d   :  { %v6254_v45 = vld [vmem:[#allocation9 + $0x1b8] sm:$0xff] }
 0xa9e   :  { %v2641_v42 = vmul.f32 %v2639_v49, %v2632_v48  ;;  %v2637_v36 = vmul.f32 0.5, %v2636_v61  ;;  %v6248_v48 = vld [vmem:[#allocation9 + $0x1d0] sm:$0xff]  ;;  %v6252_v49 = vld [vmem:[#allocation9 + $0x1a8] sm:$0xff] }
 0xaa0   :  { %v6223_v33 = vadd.f32 %v2642_v2, %v2641_v42 }
 0xaa2   :  { %4459 = vtanh.f32 %v6223_v33 }
 0xaaf   :  { %v4460_v41 = vpop.eup %4459 }
 0xab0   :  { %v2645_v29 = vmul.f32 %v4460_v41, %v2637_v36  ;;  %v6334_v41 = vld [vmem:[#allocation9 + $0x1b0] sm:$0xff] }
 0xab2   :  { %2646 = vst [vmem:[#allocation2] sm:$0x2] %v2645_v29  ;;  %v2712_v44 = vrot.slane %v2645_v29, 1  ;;  %v6338_v29 = vld [vmem:[#allocation9 + $0x188] sm:$0xff] }
 0xab4   :  { %2779 = vmatmul.mubr.f32.vlgmr.msra.gmra.mxu1 %v2712_v44  ;;  %2850 = vmatmul.mubr.f32.vlgmr.msra.gmra.mxu0 %v2712_v44  ;;  %v6340_v44 = vld [vmem:[#allocation9 + $0x198] sm:$0xff] }
 0xab5   :  { %3025 = vmatprep.mubr.f32.mxu1 %v7189_v52  ;;  %3096 = vmatprep.mubr.f32.mxu0 %v7189_v52 }
 0xab6   :  { %2962 = vmatpush1.msra.mxu1 %v6234_v18  ;;  %3033 = vmatpush1.msra.mxu0 %v6236_v59 }
 0xab7   :  { %2963 = vmatprep.subr.mxu1 %v6240_v54  ;;  %3034 = vmatprep.subr.mxu0 %v6242_v46 }
 0xab8   :  { %2964 = vmatpush1.msra.mxu1 %v6246_v43  ;;  %3035 = vmatpush1.msra.mxu0 %v6248_v48 }
 0xab9   :  { %2965 = vmatprep.subr.mxu1 %v6252_v49  ;;  %3036 = vmatprep.subr.mxu0 %v6254_v45 }
 0xaba   :  { %2966 = vmatpush1.msra.mxu1 %v5880_v53  ;;  %3037 = vmatpush1.msra.mxu0 %v5882_v0  ;;  %v7194_v53 = vld [vmem:[#allocation25_spill] sm:$0xff]  ;;  %v7195_v0 = vld [vmem:[#allocation30_spill] sm:$0xff] }
 0xabb   :  { %2967 = vmatprep.subr.mxu1 %v5886_v63  ;;  %3038 = vmatprep.subr.mxu0 %v5888_v26  ;;  %v7196_v63 = vld [vmem:[#allocation36_spill] sm:$0xff] }
 0xabc   :  { %2968 = vmatpush1.msra.mxu1 %v5892_v24  ;;  %3039 = vmatpush1.msra.mxu0 %v5894_v57  ;;  %v7197_v26 = vld [vmem:[#allocation20_spill] sm:$0xff]  ;;  %v7198_v24 = vld [vmem:[#allocation26_spill] sm:$0xff]  ;;  %v7199_v57 = vld [vmem:[#allocation31_spill] sm:$0xff] }
 0xabd   :  { %2969 = vmatprep.subr.mxu1 %v5898_v12  ;;  %3040 = vmatprep.subr.mxu0 %v5900_v20  ;;  %v7200_v12 = vld [vmem:[#allocation37_spill] sm:$0xff] }
 0xabe   :  { %2970 = vmatpush1.msra.mxu1 %v5904_v62  ;;  %3041 = vmatpush1.msra.mxu0 %v5906_v1  ;;  %v7201_v20 = vld [vmem:[#allocation21_spill] sm:$0xff]  ;;  %v7202_v62 = vld [vmem:[#allocation27_spill] sm:$0xff]  ;;  %v7203_v1 = vld [vmem:[#allocation32_spill] sm:$0xff] }
 0xabf   :  { %2971 = vmatprep.subr.mxu1 %v5910_v5  ;;  %3042 = vmatprep.subr.mxu0 %v5912_v9  ;;  %v7204_v5 = vld [vmem:[#allocation38_spill] sm:$0xff] }
 0xac0   :  { %2972 = vmatpush1.msra.mxu1 %v5916_v11  ;;  %3043 = vmatpush1.msra.mxu0 %v5918_v40  ;;  %v7205_v9 = vld [vmem:[#allocation22_spill] sm:$0xff]  ;;  %v7206_v11 = vld [vmem:[#allocation28_spill] sm:$0xff] }
 0xac1   :  { %2973 = vmatprep.subr.mxu1 %v5922_v23  ;;  %3044 = vmatprep.subr.mxu0 %v5924_v21 }
 0xac2   :  { %2974 = vmatpush1.msra.mxu1 %v5926_v35  ;;  %3045 = vmatpush1.msra.mxu0 %v5930_v37 }
 0xac3   :  { %2975 = vmatprep.subr.mxu1 %v5932_v7  ;;  %3046 = vmatprep.subr.mxu0 %v5934_v34 }
 0xac4   :  { %2976 = vmatpush1.msra.mxu1 %v5938_v39  ;;  %3047 = vmatpush1.msra.mxu0 %v5940_v30  ;;  %v7207_v30 = vld [vmem:[#allocation23_spill] sm:$0xff] }
 0xac5   :  { %2977 = vmatprep.subr.mxu1 %v5942_v17  ;;  %3048 = vmatprep.subr.mxu0 %v5946_v6 }
 0xac6   :  { %2978 = vmatpush1.msra.mxu1 %v5948_v28  ;;  %3049 = vmatpush1.msra.mxu0 %v5950_v27 }
 0xac7   :  { %2979 = vmatprep.subr.mxu1 %v5954_v10  ;;  %3050 = vmatprep.subr.mxu0 %v5956_v13 }
 0xac8   :  { %2980 = vmatpush1.msra.mxu1 %v5960_v15  ;;  %3051 = vmatpush1.msra.mxu0 %v5962_v8 }
 0xac9   :  { %2981 = vmatprep.subr.mxu1 %v5966_v31  ;;  %3052 = vmatprep.subr.mxu0 %v5968_v14 }
 0xaca   :  { %2982 = vmatpush1.msra.mxu1 %v5972_v22  ;;  %3053 = vmatpush1.msra.mxu0 %v5974_v58 }
 0xacb   :  { %2983 = vmatprep.subr.mxu1 %v5978_v25  ;;  %3054 = vmatprep.subr.mxu0 %v7171_v19  ;;  %v2886_v19 = vrot.slane %v6223_v33, 7  ;;  %v6332_v33 = vld [vmem:[#allocation9 + $0x1a0] sm:$0xff] }
 0xacc   :  { %2984 = vmatpush1.msra.mxu1 %v7172_v16  ;;  %3055 = vmatpush1.msra.mxu0 %v7173_v56 }
 0xacd   :  { %2985 = vmatprep.subr.mxu1 %v7174_v60  ;;  %3056 = vmatprep.subr.mxu0 %v7175_v4 }
 0xace   :  { %2986 = vmatpush1.msra.mxu1 %v7176_v3  ;;  %3057 = vmatpush1.msra.mxu0 %v7194_v53  ;;  %v6344_v53 = vld [vmem:[#allocation9 + $0x180] sm:$0xff] }
 0xacf   :  { %2987 = vmatprep.subr.mxu1 %v7195_v0  ;;  %3058 = vmatprep.subr.mxu0 %v7196_v63  ;;  %v6346_v0 = vld [vmem:[#allocation9 + $0x190] sm:$0xff]  ;;  %v6350_v63 = vld [vmem:[#allocation9 + $0x168] sm:$0xff] }
 0xad0   :  { %2988 = vmatpush1.msra.mxu1 %v7197_v26  ;;  %3059 = vmatpush1.msra.mxu0 %v7198_v24  ;;  %v6352_v26 = vld [vmem:[#allocation9 + $0x178] sm:$0xff]  ;;  %v6356_v24 = vld [vmem:[#allocation9 + $0x160] sm:$0xff] }
 0xad1   :  { %2989 = vmatprep.subr.mxu1 %v7199_v57  ;;  %3060 = vmatprep.subr.mxu0 %v7200_v12  ;;  %v6358_v57 = vld [vmem:[#allocation9 + $0x170] sm:$0xff]  ;;  %v6362_v12 = vld [vmem:[#allocation9 + $0x148] sm:$0xff] }
 0xad2   :  { %2990 = vmatpush1.msra.mxu1 %v7201_v20  ;;  %3061 = vmatpush1.msra.mxu0 %v7202_v62  ;;  %v6364_v20 = vld [vmem:[#allocation9 + $0x158] sm:$0xff]  ;;  %v6368_v62 = vld [vmem:[#allocation9 + $0x140] sm:$0xff] }
 0xad3   :  { %2991 = vmatprep.subr.mxu1 %v7203_v1  ;;  %3062 = vmatprep.subr.mxu0 %v7204_v5  ;;  %v6370_v1 = vld [vmem:[#allocation9 + $0x150] sm:$0xff]  ;;  %v6374_v5 = vld [vmem:[#allocation9 + $0x128] sm:$0xff] }
 0xad4   :  { %2992 = vmatpush1.msra.mxu1 %v7205_v9  ;;  %3063 = vmatpush1.msra.mxu0 %v7206_v11  ;;  %v6376_v9 = vld [vmem:[#allocation9 + $0x138] sm:$0xff]  ;;  %v6380_v11 = vld [vmem:[#allocation9 + $0x120] sm:$0xff] }
 0xad5   :  { %3208 = vmatprep.subr.mxu1 %v6228_v51  ;;  %3279 = vmatprep.subr.mxu0 %v6230_v47 }
 0xb74   :  { %v2780_v40 = vpop.f32.mrf.mxu1  ;;  %v2851_v21 = vpop.f32.mrf.mxu0 }
 0xb75   :  { %v2860_v23 = vrot.slane %v2780_v40, 6  ;;  %v2862_v39 = vrot.slane %v2851_v21, 6  ;;  %v6382_v40 = vld [vmem:[#allocation9 + $0x130] sm:$0xff]  ;;  %v6388_v21 = vld [vmem:[#allocation9 + $0x118] sm:$0xff] }
 0xb76   :  { %v2782_v35 = vpop.f32.mrf.mxu1  ;;  %v2853_v28 = vpop.f32.mrf.mxu0 }
 0xb77   :  { %v2868_v37 = vadd.f32 %v2860_v23, %v6132_v55  ;;  %v2861_v7 = vrot.slane %v2782_v35, 6  ;;  %v2870_v27 = vadd.f32 %v2862_v39, %v6140_v32  ;;  %v2863_v10 = vrot.slane %v2853_v28, 6  ;;  %v6386_v23 = vld [vmem:[#allocation9 + $0x108] sm:$0xff]  ;;  %v6390_v35 = vld [vmem:[#allocation9 + $0x100] sm:$0xff]  ;;  %v6410_v28 = vld [vmem:[#allocation9 + $0xd8] sm:$0xff] }
 0xb78   :  { %v6402_v39 = vld [vmem:[#allocation9 + $0xe0] sm:$0xff] }
 0xb79   :  { %v2872_v34 = vmul.f32 0.5, %v2868_v37  ;;  %v2869_v17 = vadd.f32 %v2861_v7, %v7207_v30  ;;  %v2871_v13 = vadd.f32 %v2863_v10, %v6145_v50  ;;  %v6394_v37 = vld [vmem:[#allocation9 + $0x110] sm:$0xff]  ;;  %v6396_v7 = vld [vmem:[#allocation9 + $0xe8] sm:$0xff] }
 0xb7a   :  { %v6414_v10 = vld [vmem:[#allocation9 + $0xd0] sm:$0xff] }
 0xb7b   :  { %4461 = vtanh.f32 %v2872_v34  ;;  %v2876_v6 = vmul.f32 0.5, %v2869_v17  ;;  %v2881_v15 = vmul.f32 0.5, %v2871_v13  ;;  %v6398_v34 = vld [vmem:[#allocation9 + $0xf8] sm:$0xff]  ;;  %v6404_v17 = vld [vmem:[#allocation9 + $0xf0] sm:$0xff]  ;;  %v6418_v13 = vld [vmem:[#allocation9 + $0xa8] sm:$0xff] }
 0xb7d   :  { %4463 = vtanh.f32 %v2876_v6  ;;  %v6406_v6 = vld [vmem:[#allocation9 + $0xc8] sm:$0xff] }
 0xb7e   :  { %4465 = vtanh.f32 %v2870_v27  ;;  %v6412_v27 = vld [vmem:[#allocation9 + $0xc0] sm:$0xff] }
 0xb7f   :  { %4467 = vtanh.f32 %v2881_v15  ;;  %v6420_v15 = vld [vmem:[#allocation9 + $0xb8] sm:$0xff] }
 0xb88   :  { %v4462_v8 = vpop.eup %4461 }
 0xb89   :  { %v2874_v31 = vadd.f32 1.0, %v4462_v8  ;;  %v6424_v8 = vld [vmem:[#allocation9 + $0xa0] sm:$0xff] }
 0xb8a   :  { %v4464_v14 = vpop.eup %4463 }
 0xb8b   :  { %v2875_v22 = vmul.f32 0.5, %v2874_v31  ;;  %v2878_v58 = vadd.f32 1.0, %v4464_v14  ;;  %v4466_v16 = vpop.eup %4465  ;;  %v6426_v31 = vld [vmem:[#allocation9 + $0xb0] sm:$0xff]  ;;  %v6430_v14 = vld [vmem:[#allocation9 + $0x88] sm:$0xff] }
 0xb8c   :  { %v4468_v3 = vpop.eup %4467  ;;  %7208 = vst [vmem:[#allocation19_spill] sm:$0xff] %v6430_v14 }
 0xb8d   :  { %v2879_v25 = vmul.f32 0.5, %v2878_v58  ;;  %v2889_v60 = vmul.f32 %v4466_v16, %v2875_v22  ;;  %v2883_v42 = vadd.f32 1.0, %v4468_v3  ;;  %v6432_v22 = vld [vmem:[#allocation9 + $0x98] sm:$0xff]  ;;  %v6436_v58 = vld [vmem:[#allocation9 + $0x80] sm:$0xff]  ;;  %v6454_v3 = vld [vmem:[#allocation9 + $0x48] sm:$0xff] }
 0xb8e   :  { %7209 = vst [vmem:[#allocation29_spill] sm:$0xff] %v6432_v22  ;;  %7210 = vst [vmem:[#allocation42_spill] sm:$0xff] %v6436_v58  ;;  %v6444_v16 = vld [vmem:[#allocation9 + $0x78] sm:$0xff] }
 0xb8f   :  { %v2888_v56 = vmul.f32 %v2886_v19, %v2879_v25  ;;  %v2884_v2 = vmul.f32 0.5, %v2883_v42  ;;  %v6438_v25 = vld [vmem:[#allocation9 + $0x90] sm:$0xff]  ;;  %v6442_v19 = vld [vmem:[#allocation9 + $0x68] sm:$0xff]  ;;  %7213 = vst [vmem:[#allocation18_spill] sm:$0xff] %v6444_v16  ;;  %7216 = vst [vmem:[#allocation35_spill] sm:$0xff] %v6454_v3 }
 0xb90   :  { %7211 = vst [vmem:[#allocation40_spill] sm:$0xff] %v6438_v25  ;;  %7212 = vst [vmem:[#allocation34_spill] sm:$0xff] %v6442_v19  ;;  %v6456_v42 = vld [vmem:[#allocation9 + $0x58] sm:$0xff] }
 0xb91   :  { %v6319_v4 = vadd.f32 %v2889_v60, %v2888_v56  ;;  %v6448_v56 = vld [vmem:[#allocation9 + $0x60] sm:$0xff]  ;;  %v6450_v60 = vld [vmem:[#allocation9 + $0x70] sm:$0xff]  ;;  %7217 = vst [vmem:[#allocation17_spill] sm:$0xff] %v6456_v42 }
 0xb92   :  { %7214 = vst [vmem:[#allocation24_spill] sm:$0xff] %v6448_v56  ;;  %7215 = vst [vmem:[#allocation43_spill] sm:$0xff] %v6450_v60 }
 0xb93   :  { %4469 = vtanh.f32 %v6319_v4 }
 0xba0   :  { %v4470_v38 = vpop.eup %4469 }
 0xba1   :  { %v2892_v61 = vmul.f32 %v4470_v38, %v2884_v2  ;;  %v6460_v2 = vld [vmem:[#allocation9 + $0x40] sm:$0xff]  ;;  %v6462_v38 = vld [vmem:[#allocation9 + $0x50] sm:$0xff] }
 0xba2   :  { %7218 = vst [vmem:[#allocation25_spill] sm:$0xff] %v6460_v2  ;;  %7219 = vst [vmem:[#allocation30_spill] sm:$0xff] %v6462_v38 }
 0xba3   :  { %2893 = vst [vmem:[#allocation2] sm:$0x4] %v2892_v61  ;;  %v2959_v36 = vrot.slane %v2892_v61, 2  ;;  %v6466_v61 = vld [vmem:[#allocation9 + $0x28] sm:$0xff] }
 0xba4   :  { %7220 = vst [vmem:[#allocation36_spill] sm:$0xff] %v6466_v61 }
 0xba5   :  { %3026 = vmatmul.mubr.f32.vlgmr.msra.gmra.mxu1 %v2959_v36  ;;  %3097 = vmatmul.mubr.f32.vlgmr.msra.gmra.mxu0 %v2959_v36  ;;  %v6468_v36 = vld [vmem:[#allocation9 + $0x38] sm:$0xff] }
 0xba6   :  { %3209 = vmatpush1.msra.mxu1 %v6234_v18  ;;  %3280 = vmatpush1.msra.mxu0 %v6236_v59  ;;  %7221 = vst [vmem:[#allocation20_spill] sm:$0xff] %v6468_v36 }
 0xba7   :  { %3210 = vmatprep.subr.mxu1 %v6240_v54  ;;  %3281 = vmatprep.subr.mxu0 %v6242_v46 }
 0xba8   :  { %3211 = vmatpush1.msra.mxu1 %v6246_v43  ;;  %3282 = vmatpush1.msra.mxu0 %v6248_v48 }
 0xba9   :  { %3212 = vmatprep.subr.mxu1 %v6252_v49  ;;  %3283 = vmatprep.subr.mxu0 %v6254_v45 }
 0xbaa   :  { %3272 = vmatprep.mubr.f32.mxu1 %v7189_v52  ;;  %3343 = vmatprep.mubr.f32.mxu0 %v7189_v52  ;;  %v6472_v52 = vld [vmem:[#allocation9 + $0x20] sm:$0xff] }
 0xbab   :  { %3213 = vmatpush1.msra.mxu1 %v6332_v33  ;;  %3284 = vmatpush1.msra.mxu0 %v6334_v41  ;;  %7222 = vst [vmem:[#allocation26_spill] sm:$0xff] %v6472_v52 }
 0xbac   :  { %3214 = vmatprep.subr.mxu1 %v6338_v29  ;;  %3285 = vmatprep.subr.mxu0 %v6340_v44 }
 0xbad   :  { %3215 = vmatpush1.msra.mxu1 %v6344_v53  ;;  %3286 = vmatpush1.msra.mxu0 %v6346_v0 }
 0xbae   :  { %3216 = vmatprep.subr.mxu1 %v6350_v63  ;;  %3287 = vmatprep.subr.mxu0 %v6352_v26 }
 0xbaf   :  { %3217 = vmatpush1.msra.mxu1 %v6356_v24  ;;  %3288 = vmatpush1.msra.mxu0 %v6358_v57 }
 0xbb0   :  { %3218 = vmatprep.subr.mxu1 %v6362_v12  ;;  %3289 = vmatprep.subr.mxu0 %v6364_v20 }
 0xbb1   :  { %3219 = vmatpush1.msra.mxu1 %v6368_v62  ;;  %3290 = vmatpush1.msra.mxu0 %v6370_v1 }
 0xbb2   :  { %3220 = vmatprep.subr.mxu1 %v6374_v5  ;;  %3291 = vmatprep.subr.mxu0 %v6376_v9 }
 0xbb3   :  { %3221 = vmatpush1.msra.mxu1 %v6380_v11  ;;  %3292 = vmatpush1.msra.mxu0 %v6382_v40 }
 0xbb4   :  { %3222 = vmatprep.subr.mxu1 %v6386_v23  ;;  %3293 = vmatprep.subr.mxu0 %v6388_v21 }
 0xbb5   :  { %3223 = vmatpush1.msra.mxu1 %v6390_v35  ;;  %3294 = vmatpush1.msra.mxu0 %v6394_v37 }
 0xbb6   :  { %3224 = vmatprep.subr.mxu1 %v6396_v7  ;;  %3295 = vmatprep.subr.mxu0 %v6398_v34 }
 0xbb7   :  { %3225 = vmatpush1.msra.mxu1 %v6402_v39  ;;  %3296 = vmatpush1.msra.mxu0 %v6404_v17 }
 0xbb8   :  { %3226 = vmatprep.subr.mxu1 %v6406_v6  ;;  %3297 = vmatprep.subr.mxu0 %v6410_v28 }
 0xbb9   :  { %3227 = vmatpush1.msra.mxu1 %v6412_v27  ;;  %3298 = vmatpush1.msra.mxu0 %v6414_v10 }
 0xbba   :  { %3228 = vmatprep.subr.mxu1 %v6418_v13  ;;  %3299 = vmatprep.subr.mxu0 %v6420_v15 }
 0xbbb   :  { %3229 = vmatpush1.msra.mxu1 %v6424_v8  ;;  %3300 = vmatpush1.msra.mxu0 %v6426_v31 }
 0xbbc   :  { %3230 = vmatprep.subr.mxu1 %v6430_v14  ;;  %3301 = vmatprep.subr.mxu0 %v6432_v22 }
 0xbbd   :  { %3231 = vmatpush1.msra.mxu1 %v6436_v58  ;;  %3302 = vmatpush1.msra.mxu0 %v6438_v25 }
 0xbbe   :  { %3232 = vmatprep.subr.mxu1 %v6442_v19  ;;  %3303 = vmatprep.subr.mxu0 %v6444_v16  ;;  %v6474_v19 = vld [vmem:[#allocation9 + $0x30] sm:$0xff]  ;;  %v6478_v16 = vld [vmem:[#allocation9 + $0x8] sm:$0xff] }
 0xbbf   :  { %3233 = vmatpush1.msra.mxu1 %v6448_v56  ;;  %3304 = vmatpush1.msra.mxu0 %v6450_v60  ;;  %7223 = vst [vmem:[#allocation31_spill] sm:$0xff] %v6474_v19  ;;  %7224 = vst [vmem:[#allocation37_spill] sm:$0xff] %v6478_v16  ;;  %v6480_v56 = vld [vmem:[#allocation9 + $0x18] sm:$0xff]  ;;  %v6484_v60 = vld [vmem:[#allocation9] sm:$0xff] }
 0xbc0   :  { %3234 = vmatprep.subr.mxu1 %v6454_v3  ;;  %3305 = vmatprep.subr.mxu0 %v6456_v42  ;;  %7225 = vst [vmem:[#allocation21_spill] sm:$0xff] %v6480_v56  ;;  %7226 = vst [vmem:[#allocation27_spill] sm:$0xff] %v6484_v60  ;;  %v6486_v3 = vld [vmem:[#allocation9 + $0x10] sm:$0xff] }
 0xbc1   :  { %3235 = vmatpush1.msra.mxu1 %v6460_v2  ;;  %3306 = vmatpush1.msra.mxu0 %v6462_v38  ;;  %7227 = vst [vmem:[#allocation32_spill] sm:$0xff] %v6486_v3 }
 0xbc2   :  { %3236 = vmatprep.subr.mxu1 %v6466_v61  ;;  %3307 = vmatprep.subr.mxu0 %v6468_v36 }
 0xbc3   :  { %3237 = vmatpush1.msra.mxu1 %v6472_v52  ;;  %3308 = vmatpush1.msra.mxu0 %v6474_v19 }
 0xbc4   :  { %3238 = vmatprep.subr.mxu1 %v6478_v16  ;;  %3309 = vmatprep.subr.mxu0 %v6480_v56 }
 0xbc5   :  { %3239 = vmatpush1.msra.mxu1 %v6484_v60  ;;  %3310 = vmatpush1.msra.mxu0 %v6486_v3 }
 0xbc6   :  { %3455 = vmatprep.subr.mxu1 %v6228_v51  ;;  %3526 = vmatprep.subr.mxu0 %v6230_v47 }
 0xc65   :  { %v3027_v36 = vpop.f32.mrf.mxu1  ;;  %v3098_v38 = vpop.f32.mrf.mxu0 }
 0xc66   :  { %v3107_v61 = vrot.slane %v3027_v36, 5  ;;  %v3109_v25 = vrot.slane %v3098_v38, 5 }
 0xc67   :  { %v3029_v2 = vpop.f32.mrf.mxu1  ;;  %v3100_v60 = vpop.f32.mrf.mxu0 }
 0xc68   :  { %v3115_v52 = vadd.f32 %v3107_v61, %v6132_v55  ;;  %v3108_v42 = vrot.slane %v3029_v2, 5  ;;  %v3117_v3 = vadd.f32 %v3109_v25, %v6140_v32  ;;  %v3110_v51 = vrot.slane %v3100_v60, 5 }
 0xc6a   :  { %v3119_v19 = vmul.f32 0.5, %v3115_v52  ;;  %v3116_v16 = vadd.f32 %v3108_v42, %v7207_v30  ;;  %v3118_v47 = vadd.f32 %v3110_v51, %v6145_v50  ;;  %v3133_v42 = vrot.slane %v6319_v4, 7  ;;  %v7228_v4 = vld [vmem:[#allocation19_spill] sm:$0xff] }
 0xc6c   :  { %4471 = vtanh.f32 %v3119_v19  ;;  %v3123_v56 = vmul.f32 0.5, %v3116_v16  ;;  %v3128_v36 = vmul.f32 0.5, %v3118_v47 }
 0xc6e   :  { %4473 = vtanh.f32 %v3123_v56 }
 0xc6f   :  { %4475 = vtanh.f32 %v3117_v3  ;;  %v7231_v3 = vld [vmem:[#allocation40_spill] sm:$0xff] }
 0xc70   :  { %4477 = vtanh.f32 %v3128_v36  ;;  %v7232_v36 = vld [vmem:[#allocation34_spill] sm:$0xff] }
 0xc79   :  { %v4472_v58 = vpop.eup %4471 }
 0xc7a   :  { %v3121_v22 = vadd.f32 1.0, %v4472_v58 }
 0xc7b   :  { %v4474_v14 = vpop.eup %4473 }
 0xc7c   :  { %v3122_v61 = vmul.f32 0.5, %v3121_v22  ;;  %v3125_v2 = vadd.f32 1.0, %v4474_v14  ;;  %v4476_v19 = vpop.eup %4475  ;;  %v7229_v14 = vld [vmem:[#allocation29_spill] sm:$0xff]  ;;  %v7230_v22 = vld [vmem:[#allocation42_spill] sm:$0xff] }
 0xc7d   :  { %v4478_v25 = vpop.eup %4477 }
 0xc7e   :  { %v3126_v52 = vmul.f32 0.5, %v3125_v2  ;;  %v3136_v38 = vmul.f32 %v4476_v19, %v3122_v61  ;;  %v3130_v56 = vadd.f32 1.0, %v4478_v25  ;;  %v7233_v61 = vld [vmem:[#allocation18_spill] sm:$0xff]  ;;  %v7234_v2 = vld [vmem:[#allocation24_spill] sm:$0xff]  ;;  %v7237_v19 = vld [vmem:[#allocation17_spill] sm:$0xff] }
 0xc7f   :  { %v7240_v25 = vld [vmem:[#allocation36_spill] sm:$0xff] }
 0xc80   :  { %v3135_v16 = vmul.f32 %v3133_v42, %v3126_v52  ;;  %v3131_v51 = vmul.f32 0.5, %v3130_v56  ;;  %v7235_v52 = vld [vmem:[#allocation43_spill] sm:$0xff]  ;;  %v7241_v56 = vld [vmem:[#allocation20_spill] sm:$0xff] }
 0xc81   :  { %v7236_v42 = vld [vmem:[#allocation35_spill] sm:$0xff] }
 0xc82   :  { %v6501_v30 = vadd.f32 %v3136_v38, %v3135_v16  ;;  %v7238_v16 = vld [vmem:[#allocation25_spill] sm:$0xff]  ;;  %v7239_v38 = vld [vmem:[#allocation30_spill] sm:$0xff] }
 0xc84   :  { %4479 = vtanh.f32 %v6501_v30 }
 0xc91   :  { %v4480_v47 = vpop.eup %4479 }
 0xc92   :  { %v3139_v60 = vmul.f32 %v4480_v47, %v3131_v51  ;;  %v7242_v51 = vld [vmem:[#allocation26_spill] sm:$0xff]  ;;  %v7243_v47 = vld [vmem:[#allocation31_spill] sm:$0xff] }
 0xc94   :  { %3140 = vst [vmem:[#allocation2] sm:$0x8] %v3139_v60  ;;  %v3206_v58 = vrot.slane %v3139_v60, 3  ;;  %v7244_v60 = vld [vmem:[#allocation37_spill] sm:$0xff] }
 0xc96   :  { %3273 = vmatmul.mubr.f32.vlgmr.msra.gmra.mxu1 %v3206_v58  ;;  %3344 = vmatmul.mubr.f32.vlgmr.msra.gmra.mxu0 %v3206_v58  ;;  %v7245_v58 = vld [vmem:[#allocation21_spill] sm:$0xff] }
 0xc97   :  { %3456 = vmatpush1.msra.mxu1 %v6234_v18  ;;  %3527 = vmatpush1.msra.mxu0 %v6236_v59 }
 0xc98   :  { %3457 = vmatprep.subr.mxu1 %v6240_v54  ;;  %3528 = vmatprep.subr.mxu0 %v6242_v46 }
 0xc99   :  { %3458 = vmatpush1.msra.mxu1 %v6246_v43  ;;  %3529 = vmatpush1.msra.mxu0 %v6248_v48 }
 0xc9a   :  { %3459 = vmatprep.subr.mxu1 %v6252_v49  ;;  %3530 = vmatprep.subr.mxu0 %v6254_v45 }
 0xc9b   :  { %3460 = vmatpush1.msra.mxu1 %v6332_v33  ;;  %3531 = vmatpush1.msra.mxu0 %v6334_v41 }
 0xc9c   :  { %3461 = vmatprep.subr.mxu1 %v6338_v29  ;;  %3532 = vmatprep.subr.mxu0 %v6340_v44 }
 0xc9d   :  { %3462 = vmatpush1.msra.mxu1 %v6344_v53  ;;  %3533 = vmatpush1.msra.mxu0 %v6346_v0 }
 0xc9e   :  { %3463 = vmatprep.subr.mxu1 %v6350_v63  ;;  %3534 = vmatprep.subr.mxu0 %v6352_v26 }
 0xc9f   :  { %3464 = vmatpush1.msra.mxu1 %v6356_v24  ;;  %3535 = vmatpush1.msra.mxu0 %v6358_v57 }
 0xca0   :  { %3465 = vmatprep.subr.mxu1 %v6362_v12  ;;  %3536 = vmatprep.subr.mxu0 %v6364_v20 }
 0xca1   :  { %3466 = vmatpush1.msra.mxu1 %v6368_v62  ;;  %3537 = vmatpush1.msra.mxu0 %v6370_v1 }
 0xca2   :  { %3467 = vmatprep.subr.mxu1 %v6374_v5  ;;  %3538 = vmatprep.subr.mxu0 %v6376_v9 }
 0xca3   :  { %3468 = vmatpush1.msra.mxu1 %v6380_v11  ;;  %3539 = vmatpush1.msra.mxu0 %v6382_v40 }
 0xca4   :  { %3469 = vmatprep.subr.mxu1 %v6386_v23  ;;  %3540 = vmatprep.subr.mxu0 %v6388_v21 }
 0xca5   :  { %3470 = vmatpush1.msra.mxu1 %v6390_v35  ;;  %3541 = vmatpush1.msra.mxu0 %v6394_v37 }
 0xca6   :  { %3471 = vmatprep.subr.mxu1 %v6396_v7  ;;  %3542 = vmatprep.subr.mxu0 %v6398_v34 }
 0xca7   :  { %3472 = vmatpush1.msra.mxu1 %v6402_v39  ;;  %3543 = vmatpush1.msra.mxu0 %v6404_v17 }
 0xca8   :  { %3473 = vmatprep.subr.mxu1 %v6406_v6  ;;  %3544 = vmatprep.subr.mxu0 %v6410_v28 }
 0xca9   :  { %3474 = vmatpush1.msra.mxu1 %v6412_v27  ;;  %3545 = vmatpush1.msra.mxu0 %v6414_v10 }
 0xcaa   :  { %3475 = vmatprep.subr.mxu1 %v6418_v13  ;;  %3546 = vmatprep.subr.mxu0 %v6420_v15 }
 0xcab   :  { %3476 = vmatpush1.msra.mxu1 %v6424_v8  ;;  %3547 = vmatpush1.msra.mxu0 %v6426_v31 }
 0xcac   :  { %3477 = vmatprep.subr.mxu1 %v7228_v4  ;;  %3548 = vmatprep.subr.mxu0 %v7229_v14 }
 0xcad   :  { %3478 = vmatpush1.msra.mxu1 %v7230_v22  ;;  %3549 = vmatpush1.msra.mxu0 %v7231_v3 }
 0xcae   :  { %3479 = vmatprep.subr.mxu1 %v7232_v36  ;;  %3550 = vmatprep.subr.mxu0 %v7233_v61 }
 0xcaf   :  { %3480 = vmatpush1.msra.mxu1 %v7234_v2  ;;  %3551 = vmatpush1.msra.mxu0 %v7235_v52  ;;  %v7246_v52 = vld [vmem:[#allocation27_spill] sm:$0xff] }
 0xcb0   :  { %3481 = vmatprep.subr.mxu1 %v7236_v42  ;;  %3552 = vmatprep.subr.mxu0 %v7237_v19  ;;  %v7247_v42 = vmov 0.0   ;;  %v7248_v19 = vld [vmem:[#allocation32_spill] sm:$0xff] }
 0xcb1   :  { %3482 = vmatpush1.msra.mxu1 %v7238_v16  ;;  %3553 = vmatpush1.msra.mxu0 %v7239_v38  ;;  %v7249_v38 = vld [vmem:[#allocation44_spill] sm:$0xff] }
 0xcb2   :  { %3483 = vmatprep.subr.mxu1 %v7240_v25  ;;  %3554 = vmatprep.subr.mxu0 %v7241_v56  ;;  %v7250_v25 = vld [vmem:[#allocation41_spill] sm:$0xff] }
 0xcb3   :  { %3484 = vmatpush1.msra.mxu1 %v7242_v51  ;;  %3555 = vmatpush1.msra.mxu0 %v7243_v47 }
 0xcb4   :  { %3485 = vmatprep.subr.mxu1 %v7244_v60  ;;  %3556 = vmatprep.subr.mxu0 %v7245_v58 }
 0xcb5   :  { %3486 = vmatpush1.msra.mxu1 %v7246_v52  ;;  %3519 = vmatprep.mubr.f32.mxu1 %v7247_v42  ;;  %v7251_v52 = vld [vmem:[#allocation23_spill] sm:$0xff] }
 0xcb6   :  { %3557 = vmatpush1.msra.mxu0 %v7248_v19  ;;  %3590 = vmatprep.mubr.f32.mxu0 %v7247_v42 }
 0xcb7   :  { %3702 = vmatprep.subr.mxu1 %v7249_v38  ;;  %3773 = vmatprep.subr.mxu0 %v7250_v25 }
 0xd56   :  { %v3274_v56 = vpop.f32.mrf.mxu1  ;;  %v3345_v16 = vpop.f32.mrf.mxu0 }
 0xd57   :  { %v3354_v51 = vrot.slane %v3274_v56, 4  ;;  %v3356_v61 = vrot.slane %v3345_v16, 4 }
 0xd58   :  { %v3276_v47 = vpop.f32.mrf.mxu1  ;;  %v3347_v19 = vpop.f32.mrf.mxu0 }
 0xd59   :  { %v3362_v60 = vadd.f32 %v3354_v51, %v6132_v55  ;;  %v3355_v2 = vrot.slane %v3276_v47, 4  ;;  %v3364_v42 = vadd.f32 %v3356_v61, %v6140_v32  ;;  %v3357_v38 = vrot.slane %v3347_v19, 4 }
 0xd5b   :  { %v3366_v58 = vmul.f32 0.5, %v3362_v60  ;;  %v3363_v36 = vadd.f32 %v3355_v2, %v7251_v52  ;;  %v3365_v25 = vadd.f32 %v3357_v38, %v6145_v50  ;;  %v3380_v2 = vrot.slane %v6501_v30, 7  ;;  %v7260_v30 = vld [vmem:[#allocation35_spill] sm:$0xff] }
 0xd5d   :  { %4481 = vtanh.f32 %v3366_v58  ;;  %v3370_v3 = vmul.f32 0.5, %v3363_v36  ;;  %v3375_v56 = vmul.f32 0.5, %v3365_v25  ;;  %v7263_v25 = vld [vmem:[#allocation30_spill] sm:$0xff] }
 0xd5f   :  { %4483 = vtanh.f32 %v3370_v3 }
 0xd60   :  { %4485 = vtanh.f32 %v3364_v42 }
 0xd61   :  { %4487 = vtanh.f32 %v3375_v56  ;;  %v7264_v56 = vld [vmem:[#allocation36_spill] sm:$0xff] }
 0xd6a   :  { %v4482_v22 = vpop.eup %4481 }
 0xd6b   :  { %v3368_v14 = vadd.f32 1.0, %v4482_v22 }
 0xd6c   :  { %v4484_v4 = vpop.eup %4483 }
 0xd6d   :  { %v3369_v51 = vmul.f32 0.5, %v3368_v14  ;;  %v3372_v47 = vadd.f32 1.0, %v4484_v4  ;;  %v4486_v60 = vpop.eup %4485  ;;  %v7261_v4 = vld [vmem:[#allocation17_spill] sm:$0xff] }
 0xd6e   :  { %v4488_v3 = vpop.eup %4487  ;;  %v7262_v14 = vld [vmem:[#allocation25_spill] sm:$0xff] }
 0xd6f   :  { %v3373_v16 = vmul.f32 0.5, %v3372_v47  ;;  %v3383_v58 = vmul.f32 %v4486_v60, %v3369_v51  ;;  %v3377_v61 = vadd.f32 1.0, %v4488_v3  ;;  %v7265_v51 = vld [vmem:[#allocation20_spill] sm:$0xff]  ;;  %v7266_v47 = vld [vmem:[#allocation26_spill] sm:$0xff]  ;;  %v7269_v60 = vld [vmem:[#allocation21_spill] sm:$0xff] }
 0xd70   :  { %v7272_v3 = vld [vmem:[#allocation32_spill] sm:$0xff] }
 0xd71   :  { %v3382_v36 = vmul.f32 %v3380_v2, %v3373_v16  ;;  %v3378_v42 = vmul.f32 0.5, %v3377_v61  ;;  %v7267_v16 = vld [vmem:[#allocation31_spill] sm:$0xff]  ;;  %v7268_v2 = vld [vmem:[#allocation37_spill] sm:$0xff] }
 0xd73   :  { %v6575_v52 = vadd.f32 %v3383_v58, %v3382_v36  ;;  %v7270_v36 = vld [vmem:[#allocation27_spill] sm:$0xff]  ;;  %v7271_v58 = vmov 0.0  }
 0xd75   :  { %4489 = vtanh.f32 %v6575_v52 }
 0xd82   :  { %v4490_v19 = vpop.eup %4489 }
 0xd83   :  { %v3386_v38 = vmul.f32 %v4490_v19, %v3378_v42 }
 0xd85   :  { %3387 = vst [vmem:[#allocation2] sm:$0x10] %v3386_v38  ;;  %v3453_v22 = vrot.slane %v3386_v38, 4 }
 0xd87   :  { %3520 = vmatmul.mubr.f32.vlgmr.msra.gmra.mxu1 %v3453_v22  ;;  %3591 = vmatmul.mubr.f32.vlgmr.msra.gmra.mxu0 %v3453_v22 }
 0xd88   :  { %3703 = vmatpush1.msra.mxu1 %v6234_v18  ;;  %3774 = vmatpush1.msra.mxu0 %v6236_v59  ;;  %v7252_v18 = vld [vmem:[#allocation19_spill] sm:$0xff]  ;;  %v7253_v59 = vld [vmem:[#allocation29_spill] sm:$0xff] }
 0xd89   :  { %3704 = vmatprep.subr.mxu1 %v6240_v54  ;;  %3775 = vmatprep.subr.mxu0 %v6242_v46  ;;  %v7254_v54 = vld [vmem:[#allocation42_spill] sm:$0xff]  ;;  %v7255_v46 = vld [vmem:[#allocation40_spill] sm:$0xff] }
 0xd8a   :  { %3705 = vmatpush1.msra.mxu1 %v6246_v43  ;;  %3776 = vmatpush1.msra.mxu0 %v6248_v48  ;;  %v7256_v43 = vld [vmem:[#allocation34_spill] sm:$0xff] }
 0xd8b   :  { %3706 = vmatprep.subr.mxu1 %v6252_v49  ;;  %3777 = vmatprep.subr.mxu0 %v6254_v45  ;;  %v7257_v48 = vld [vmem:[#allocation18_spill] sm:$0xff]  ;;  %v7258_v49 = vld [vmem:[#allocation24_spill] sm:$0xff]  ;;  %v7259_v45 = vld [vmem:[#allocation43_spill] sm:$0xff] }
 0xd8c   :  { %3707 = vmatpush1.msra.mxu1 %v6332_v33  ;;  %3778 = vmatpush1.msra.mxu0 %v6334_v41 }
 0xd8d   :  { %3708 = vmatprep.subr.mxu1 %v6338_v29  ;;  %3779 = vmatprep.subr.mxu0 %v6340_v44 }
 0xd8e   :  { %3709 = vmatpush1.msra.mxu1 %v6344_v53  ;;  %3780 = vmatpush1.msra.mxu0 %v6346_v0 }
 0xd8f   :  { %3710 = vmatprep.subr.mxu1 %v6350_v63  ;;  %3781 = vmatprep.subr.mxu0 %v6352_v26 }
 0xd90   :  { %3711 = vmatpush1.msra.mxu1 %v6356_v24  ;;  %3782 = vmatpush1.msra.mxu0 %v6358_v57 }
 0xd91   :  { %3712 = vmatprep.subr.mxu1 %v6362_v12  ;;  %3783 = vmatprep.subr.mxu0 %v6364_v20 }
 0xd92   :  { %3713 = vmatpush1.msra.mxu1 %v6368_v62  ;;  %3784 = vmatpush1.msra.mxu0 %v6370_v1 }
 0xd93   :  { %3714 = vmatprep.subr.mxu1 %v6374_v5  ;;  %3785 = vmatprep.subr.mxu0 %v6376_v9 }
 0xd94   :  { %3715 = vmatpush1.msra.mxu1 %v6380_v11  ;;  %3786 = vmatpush1.msra.mxu0 %v6382_v40 }
 0xd95   :  { %3716 = vmatprep.subr.mxu1 %v6386_v23  ;;  %3787 = vmatprep.subr.mxu0 %v6388_v21 }
 0xd96   :  { %3717 = vmatpush1.msra.mxu1 %v6390_v35  ;;  %3788 = vmatpush1.msra.mxu0 %v6394_v37 }
 0xd97   :  { %3718 = vmatprep.subr.mxu1 %v6396_v7  ;;  %3789 = vmatprep.subr.mxu0 %v6398_v34 }
 0xd98   :  { %3719 = vmatpush1.msra.mxu1 %v6402_v39  ;;  %3790 = vmatpush1.msra.mxu0 %v6404_v17 }
 0xd99   :  { %3720 = vmatprep.subr.mxu1 %v6406_v6  ;;  %3791 = vmatprep.subr.mxu0 %v6410_v28 }
 0xd9a   :  { %3721 = vmatpush1.msra.mxu1 %v6412_v27  ;;  %3792 = vmatpush1.msra.mxu0 %v6414_v10 }
 0xd9b   :  { %3722 = vmatprep.subr.mxu1 %v6418_v13  ;;  %3793 = vmatprep.subr.mxu0 %v6420_v15 }
 0xd9c   :  { %3723 = vmatpush1.msra.mxu1 %v6424_v8  ;;  %3794 = vmatpush1.msra.mxu0 %v6426_v31 }
 0xd9d   :  { %3724 = vmatprep.subr.mxu1 %v7252_v18  ;;  %3795 = vmatprep.subr.mxu0 %v7253_v59 }
 0xd9e   :  { %3725 = vmatpush1.msra.mxu1 %v7254_v54  ;;  %3796 = vmatpush1.msra.mxu0 %v7255_v46 }
 0xd9f   :  { %3726 = vmatprep.subr.mxu1 %v7256_v43  ;;  %3797 = vmatprep.subr.mxu0 %v7257_v48 }
 0xda0   :  { %3727 = vmatpush1.msra.mxu1 %v7258_v49  ;;  %3798 = vmatpush1.msra.mxu0 %v7259_v45 }
 0xda1   :  { %3728 = vmatprep.subr.mxu1 %v7260_v30  ;;  %3799 = vmatprep.subr.mxu0 %v7261_v4 }
 0xda2   :  { %3729 = vmatpush1.msra.mxu1 %v7262_v14  ;;  %3800 = vmatpush1.msra.mxu0 %v7263_v25 }
 0xda3   :  { %3730 = vmatprep.subr.mxu1 %v7264_v56  ;;  %3801 = vmatprep.subr.mxu0 %v7265_v51 }
 0xda4   :  { %3731 = vmatpush1.msra.mxu1 %v7266_v47  ;;  %3802 = vmatpush1.msra.mxu0 %v7267_v16 }
 0xda5   :  { %3732 = vmatprep.subr.mxu1 %v7268_v2  ;;  %3803 = vmatprep.subr.mxu0 %v7269_v60  ;;  %v7273_v2 = vld [vmem:[#allocation23_spill] sm:$0xff] }
 0xda6   :  { %3733 = vmatpush1.msra.mxu1 %v7270_v36  ;;  %3766 = vmatprep.mubr.f32.mxu1 %v7271_v58 }
 0xda7   :  { %3804 = vmatpush1.msra.mxu0 %v7272_v3  ;;  %3837 = vmatprep.mubr.f32.mxu0 %v7271_v58 }
 0xe47   :  { %v3521_v61 = vpop.f32.mrf.mxu1  ;;  %v3592_v19 = vpop.f32.mrf.mxu0 }
 0xe48   :  { %v3601_v42 = vrot.slane %v3521_v61, 3  ;;  %v3603_v51 = vrot.slane %v3592_v19, 3 }
 0xe49   :  { %v3523_v38 = vpop.f32.mrf.mxu1  ;;  %v3594_v36 = vpop.f32.mrf.mxu0 }
 0xe4a   :  { %v3609_v22 = vadd.f32 %v3601_v42, %v6132_v55  ;;  %v3602_v47 = vrot.slane %v3523_v38, 3  ;;  %v3611_v25 = vadd.f32 %v3603_v51, %v6140_v32  ;;  %v3604_v3 = vrot.slane %v3594_v36, 3 }
 0xe4c   :  { %v3613_v16 = vmul.f32 0.5, %v3609_v22  ;;  %v3610_v56 = vadd.f32 %v3602_v47, %v7273_v2  ;;  %v3612_v14 = vadd.f32 %v3604_v3, %v6145_v50  ;;  %v3627_v47 = vrot.slane %v6575_v52, 7  ;;  %v3943_v52 = vld [vmem:[#allocation9 + $0x1e8] sm:$0xff]  ;;  %v3944_v3 = vld [vmem:[#allocation9 + $0x1f0] sm:$0xff] }
 0xe4d   :  { %3949 = vmatprep.subr.mxu1 %v3943_v52  ;;  %v4142_v52 = vld [vmem:[#allocation11 + $0x58] sm:$0xff] }
 0xe4e   :  { %4491 = vtanh.f32 %v3613_v16  ;;  %v3617_v60 = vmul.f32 0.5, %v3610_v56  ;;  %v3622_v61 = vmul.f32 0.5, %v3612_v14 }
 0xe50   :  { %4493 = vtanh.f32 %v3617_v60 }
 0xe51   :  { %4495 = vtanh.f32 %v3611_v25 }
 0xe52   :  { %4497 = vtanh.f32 %v3622_v61  ;;  %v3939_v61 = vld [vmem:[#allocation9 + $0x1c8] sm:$0xff] }
 0xe5b   :  { %v4492_v4 = vpop.eup %4491 }
 0xe5c   :  { %v3615_v30 = vadd.f32 1.0, %v4492_v4 }
 0xe5d   :  { %v4494_v45 = vpop.eup %4493 }
 0xe5e   :  { %v3616_v42 = vmul.f32 0.5, %v3615_v30  ;;  %v3619_v38 = vadd.f32 1.0, %v4494_v45  ;;  %v4496_v16 = vpop.eup %4495  ;;  %v3945_v45 = vld [vmem:[#allocation9 + $0x1f8] sm:$0xff]  ;;  %v3942_v30 = vld [vmem:[#allocation9 + $0x1e0] sm:$0xff] }
 0xe5f   :  { %v4498_v25 = vpop.eup %4497  ;;  %4020 = vmatprep.subr.mxu0 %v3945_v45  ;;  %v4141_v45 = vld [vmem:[#allocation11 + $0x50] sm:$0xff] }
 0xe60   :  { %v3620_v19 = vmul.f32 0.5, %v3619_v38  ;;  %v3630_v22 = vmul.f32 %v4496_v16, %v3616_v42  ;;  %v3624_v51 = vadd.f32 1.0, %v4498_v25  ;;  %v3941_v42 = vld [vmem:[#allocation9 + $0x1d8] sm:$0xff]  ;;  %v3938_v38 = vld [vmem:[#allocation9 + $0x1c0] sm:$0xff] }
 0xe61   :  { %v3937_v16 = vld [vmem:[#allocation9 + $0x1b8] sm:$0xff] }
 0xe62   :  { %v3629_v56 = vmul.f32 %v3627_v47, %v3620_v19  ;;  %v3625_v60 = vmul.f32 0.5, %v3624_v51  ;;  %v3940_v19 = vld [vmem:[#allocation9 + $0x1d0] sm:$0xff]  ;;  %v3935_v47 = vld [vmem:[#allocation9 + $0x1a8] sm:$0xff] }
 0xe64   :  { %v6647_v2 = vadd.f32 %v3630_v22, %v3629_v56 }
 0xe66   :  { %4499 = vtanh.f32 %v6647_v2 }
 0xe73   :  { %v4500_v14 = vpop.eup %4499 }
 0xe74   :  { %v3633_v36 = vmul.f32 %v4500_v14, %v3625_v60  ;;  %v4146_v14 = vld [vmem:[#allocation11 + $0x78] sm:$0xff] }
 0xe76   :  { %3634 = vst [vmem:[#allocation2] sm:$0x20] %v3633_v36  ;;  %v3700_v4 = vrot.slane %v3633_v36, 5  ;;  %v4144_v36 = vld [vmem:[#allocation11 + $0x68] sm:$0xff] }
 0xe78   :  { %3767 = vmatmul.mubr.f32.vlgmr.msra.gmra.mxu1 %v3700_v4  ;;  %3838 = vmatmul.mubr.f32.vlgmr.msra.gmra.mxu0 %v3700_v4  ;;  %v4143_v4 = vld [vmem:[#allocation11 + $0x60] sm:$0xff] }
 0xe79   :  { %4013 = vmatprep.mubr.f32.mxu1 %v7271_v58  ;;  %4084 = vmatprep.mubr.f32.mxu0 %v7271_v58 }
 0xe7a   :  { %3950 = vmatpush1.msra.mxu1 %v3942_v30  ;;  %4021 = vmatpush1.msra.mxu0 %v3944_v3  ;;  %v4140_v30 = vld [vmem:[#allocation11 + $0x48] sm:$0xff]  ;;  %v4139_v3 = vld [vmem:[#allocation11 + $0x40] sm:$0xff] }
 0xe7b   :  { %3951 = vmatprep.subr.mxu1 %v3939_v61  ;;  %4022 = vmatprep.subr.mxu0 %v3941_v42  ;;  %v4138_v61 = vld [vmem:[#allocation11 + $0x38] sm:$0xff]  ;;  %v4137_v42 = vld [vmem:[#allocation11 + $0x30] sm:$0xff] }
 0xe7c   :  { %3952 = vmatpush1.msra.mxu1 %v3938_v38  ;;  %4023 = vmatpush1.msra.mxu0 %v3940_v19  ;;  %v4136_v38 = vld [vmem:[#allocation11 + $0x28] sm:$0xff]  ;;  %v4135_v19 = vld [vmem:[#allocation11 + $0x20] sm:$0xff] }
 0xe7d   :  { %3953 = vmatprep.subr.mxu1 %v3935_v47  ;;  %4024 = vmatprep.subr.mxu0 %v3937_v16  ;;  %v4134_v47 = vld [vmem:[#allocation11 + $0x18] sm:$0xff]  ;;  %v4133_v16 = vld [vmem:[#allocation11 + $0x10] sm:$0xff] }
 0xe7e   :  { %3954 = vmatpush1.msra.mxu1 %v6332_v33  ;;  %4025 = vmatpush1.msra.mxu0 %v6334_v41  ;;  %v7274_v33 = vld [vmem:[#allocation43_spill] sm:$0xff] }
 0xe7f   :  { %3955 = vmatprep.subr.mxu1 %v6338_v29  ;;  %4026 = vmatprep.subr.mxu0 %v6340_v44  ;;  %v7275_v41 = vld [vmem:[#allocation35_spill] sm:$0xff]  ;;  %v7276_v29 = vld [vmem:[#allocation17_spill] sm:$0xff] }
 0xe80   :  { %3956 = vmatpush1.msra.mxu1 %v6344_v53  ;;  %4027 = vmatpush1.msra.mxu0 %v6346_v0  ;;  %v7277_v44 = vld [vmem:[#allocation25_spill] sm:$0xff]  ;;  %v7278_v53 = vld [vmem:[#allocation30_spill] sm:$0xff]  ;;  %v7279_v0 = vld [vmem:[#allocation36_spill] sm:$0xff] }
 0xe81   :  { %3957 = vmatprep.subr.mxu1 %v6350_v63  ;;  %4028 = vmatprep.subr.mxu0 %v6352_v26  ;;  %v7280_v63 = vld [vmem:[#allocation20_spill] sm:$0xff]  ;;  %v7281_v26 = vld [vmem:[#allocation26_spill] sm:$0xff] }
 0xe82   :  { %3958 = vmatpush1.msra.mxu1 %v6356_v24  ;;  %4029 = vmatpush1.msra.mxu0 %v6358_v57  ;;  %v7282_v24 = vld [vmem:[#allocation31_spill] sm:$0xff]  ;;  %v7283_v57 = vld [vmem:[#allocation37_spill] sm:$0xff] }
 0xe83   :  { %3959 = vmatprep.subr.mxu1 %v6362_v12  ;;  %4030 = vmatprep.subr.mxu0 %v6364_v20  ;;  %v7284_v12 = vld [vmem:[#allocation21_spill] sm:$0xff]  ;;  %v7285_v20 = vld [vmem:[#allocation27_spill] sm:$0xff] }
 0xe84   :  { %3960 = vmatpush1.msra.mxu1 %v6368_v62  ;;  %4031 = vmatpush1.msra.mxu0 %v6370_v1  ;;  %v7286_v62 = vld [vmem:[#allocation32_spill] sm:$0xff] }
 0xe85   :  { %3961 = vmatprep.subr.mxu1 %v6374_v5  ;;  %4032 = vmatprep.subr.mxu0 %v6376_v9 }
 0xe86   :  { %3962 = vmatpush1.msra.mxu1 %v6380_v11  ;;  %4033 = vmatpush1.msra.mxu0 %v6382_v40 }
 0xe87   :  { %3963 = vmatprep.subr.mxu1 %v6386_v23  ;;  %4034 = vmatprep.subr.mxu0 %v6388_v21 }
 0xe88   :  { %3964 = vmatpush1.msra.mxu1 %v6390_v35  ;;  %4035 = vmatpush1.msra.mxu0 %v6394_v37  ;;  %v7287_v37 = vld [vmem:[#allocation23_spill] sm:$0xff] }
 0xe89   :  { %3965 = vmatprep.subr.mxu1 %v6396_v7  ;;  %4036 = vmatprep.subr.mxu0 %v6398_v34 }
 0xe8a   :  { %3966 = vmatpush1.msra.mxu1 %v6402_v39  ;;  %4037 = vmatpush1.msra.mxu0 %v6404_v17 }
 0xe8b   :  { %3967 = vmatprep.subr.mxu1 %v6406_v6  ;;  %4038 = vmatprep.subr.mxu0 %v6410_v28 }
 0xe8c   :  { %3968 = vmatpush1.msra.mxu1 %v6412_v27  ;;  %4039 = vmatpush1.msra.mxu0 %v6414_v10 }
 0xe8d   :  { %3969 = vmatprep.subr.mxu1 %v6418_v13  ;;  %4040 = vmatprep.subr.mxu0 %v6420_v15 }
 0xe8e   :  { %3970 = vmatpush1.msra.mxu1 %v6424_v8  ;;  %4041 = vmatpush1.msra.mxu0 %v6426_v31 }
 0xe8f   :  { %3971 = vmatprep.subr.mxu1 %v7252_v18  ;;  %4042 = vmatprep.subr.mxu0 %v7253_v59  ;;  %v3874_v59 = vrot.slane %v6647_v2, 7  ;;  %v4145_v2 = vld [vmem:[#allocation11 + $0x70] sm:$0xff] }
 0xe90   :  { %3972 = vmatpush1.msra.mxu1 %v7254_v54  ;;  %4043 = vmatpush1.msra.mxu0 %v7255_v46 }
 0xe91   :  { %3973 = vmatprep.subr.mxu1 %v7256_v43  ;;  %4044 = vmatprep.subr.mxu0 %v7257_v48 }
 0xe92   :  { %3974 = vmatpush1.msra.mxu1 %v7258_v49  ;;  %4045 = vmatpush1.msra.mxu0 %v7274_v33  ;;  %v4132_v33 = vld [vmem:[#allocation11 + $0x8] sm:$0xff] }
 0xe93   :  { %3975 = vmatprep.subr.mxu1 %v7275_v41  ;;  %4046 = vmatprep.subr.mxu0 %v7276_v29  ;;  %v4131_v41 = vld [vmem:[#allocation11] sm:$0xff] }
 0xe94   :  { %3976 = vmatpush1.msra.mxu1 %v7277_v44  ;;  %4047 = vmatpush1.msra.mxu0 %v7278_v53 }
 0xe95   :  { %3977 = vmatprep.subr.mxu1 %v7279_v0  ;;  %4048 = vmatprep.subr.mxu0 %v7280_v63 }
 0xe96   :  { %3978 = vmatpush1.msra.mxu1 %v7281_v26  ;;  %4049 = vmatpush1.msra.mxu0 %v7282_v24 }
 0xe97   :  { %3979 = vmatprep.subr.mxu1 %v7283_v57  ;;  %4050 = vmatprep.subr.mxu0 %v7284_v12 }
 0xe98   :  { %3980 = vmatpush1.msra.mxu1 %v7285_v20  ;;  %4051 = vmatpush1.msra.mxu0 %v7286_v62 }
 0xe99   :  { %4301 = vmatprep.subr.mxu1 %v7271_v58 }
 0xf38   :  { %v3768_v1 = vpop.f32.mrf.mxu1  ;;  %v3839_v9 = vpop.f32.mrf.mxu0 }
 0xf39   :  { %v3848_v5 = vrot.slane %v3768_v1, 2  ;;  %v3850_v35 = vrot.slane %v3839_v9, 2 }
 0xf3a   :  { %v3770_v11 = vpop.f32.mrf.mxu1  ;;  %v3841_v39 = vpop.f32.mrf.mxu0 }
 0xf3b   :  { %v3856_v40 = vadd.f32 %v3848_v5, %v6132_v55  ;;  %v3849_v23 = vrot.slane %v3770_v11, 2  ;;  %v3858_v17 = vadd.f32 %v3850_v35, %v6140_v32  ;;  %v3851_v6 = vrot.slane %v3841_v39, 2 }
 0xf3d   :  { %v3860_v21 = vmul.f32 0.5, %v3856_v40  ;;  %v3857_v7 = vadd.f32 %v3849_v23, %v7287_v37  ;;  %v3859_v28 = vadd.f32 %v3851_v6, %v6145_v50 }
 0xf3f   :  { %4501 = vtanh.f32 %v3860_v21  ;;  %v3864_v34 = vmul.f32 0.5, %v3857_v7  ;;  %v3869_v27 = vmul.f32 0.5, %v3859_v28 }
 0xf41   :  { %4503 = vtanh.f32 %v3864_v34 }
 0xf42   :  { %4505 = vtanh.f32 %v3858_v17 }
 0xf43   :  { %4507 = vtanh.f32 %v3869_v27 }
 0xf4c   :  { %v4502_v10 = vpop.eup %4501 }
 0xf4d   :  { %v3862_v13 = vadd.f32 1.0, %v4502_v10 }
 0xf4e   :  { %v4504_v15 = vpop.eup %4503 }
 0xf4f   :  { %v3863_v8 = vmul.f32 0.5, %v3862_v13  ;;  %v3866_v31 = vadd.f32 1.0, %v4504_v15  ;;  %v4506_v54 = vpop.eup %4505  ;;  %v4283_v15 = vld [vmem:[%s6783_s17] ss:$0 sm:$0xff] }
 0xf50   :  { %v4508_v49 = vpop.eup %4507 }
 0xf51   :  { %v3867_v18 = vmul.f32 0.5, %v3866_v31  ;;  %v3877_v43 = vmul.f32 %v4506_v54, %v3863_v8  ;;  %v3871_v56 = vadd.f32 1.0, %v4508_v49  ;;  %v7288_v31 = vlaneseq }
 0xf53   :  { %v3876_v46 = vmul.f32 %v3874_v59, %v3867_v18  ;;  %v3872_v22 = vmul.f32 0.5, %v3871_v56  ;;  %v6740_v18 = vand.u32 127, %v7288_v31 }
 0xf55   :  { %v6712_v48 = vadd.f32 %v3877_v43, %v3876_v46  ;;  %v7289_v46 = vld [vmem:[#allocation39_spill] sm:$0xff]  ;;  %vm1942_vm3 = vcmp.lt.s32.totalorder %v6740_v18, 16 }
 0xf56   :  { %v1943_v43 = vmul.f32 %v7289_v46, %v7289_v46 }
 0xf57   :  { %4509 = vtanh.f32 %v6712_v48 }
 0xf58   :  { %v1945_v56 = vsel %vm1944_vm2, %v1943_v43, 0.0 }
 0xf64   :  { %v4510_v25 = vpop.eup %4509 }
 0xf65   :  { %v3880_v51 = vmul.f32 %v4510_v25, %v3872_v22 }
 0xf67   :  { %3881 = vst [vmem:[#allocation2] sm:$0x40] %v3880_v51  ;;  %v3947_v60 = vrot.slane %v3880_v51, 6  ;;  %v4730_v51 = vmov 0  }
 0xf68   :  { %4357 = vset.pattern.permute.xlu1 %v4730_v51  ;;  %4358 = vset.pattern.permute.xlu0 %v4730_v51 }
 0xf69   :  { %4014 = vmatmul.mubr.f32.vlgmr.msra.gmra.mxu1 %v3947_v60  ;;  %4085 = vmatmul.mubr.f32.vlgmr.msra.gmra.mxu0 %v3947_v60 }
 0xf6a   :  { %4302 = vmatpush3.msra.mxu1 %v4146_v14  ;;  %4333 = vmatprep.mubr.msk.f32.mxu1 %vm4729_vm1, %v7271_v58 }
 0xf6b   :  { %4303 = vmatprep.subr.mxu1 %v7271_v58 }
 0xf6c   :  { %4304 = vmatpush3.msra.mxu1 %v4145_v2 }
 0xf6d   :  { %4305 = vmatprep.subr.mxu1 %v7271_v58 }
 0xf6e   :  { %4306 = vmatpush3.msra.mxu1 %v4144_v36 }
 0xf6f   :  { %4307 = vmatprep.subr.mxu1 %v7271_v58 }
 0xf70   :  { %4308 = vmatpush3.msra.mxu1 %v4143_v4 }
 0xf71   :  { %4309 = vmatprep.subr.mxu1 %v7271_v58 }
 0xf72   :  { %4310 = vmatpush3.msra.mxu1 %v4142_v52 }
 0xf73   :  { %4311 = vmatprep.subr.mxu1 %v7271_v58 }
 0xf74   :  { %4312 = vmatpush3.msra.mxu1 %v4141_v45 }
 0xf75   :  { %4313 = vmatprep.subr.mxu1 %v7271_v58 }
 0xf76   :  { %4314 = vmatpush3.msra.mxu1 %v4140_v30 }
 0xf77   :  { %4315 = vmatprep.subr.mxu1 %v7271_v58 }
 0xf78   :  { %4316 = vmatpush3.msra.mxu1 %v4139_v3 }
 0xf79   :  { %4317 = vmatprep.subr.mxu1 %v7271_v58 }
 0xf7a   :  { %4318 = vmatpush3.msra.mxu1 %v4138_v61 }
 0xf7b   :  { %4319 = vmatprep.subr.mxu1 %v7271_v58 }
 0xf7c   :  { %4320 = vmatpush3.msra.mxu1 %v4137_v42 }
 0xf7d   :  { %4321 = vmatprep.subr.mxu1 %v7271_v58 }
 0xf7e   :  { %4322 = vmatpush3.msra.mxu1 %v4136_v38 }
 0xf7f   :  { %4323 = vmatprep.subr.mxu1 %v7271_v58 }
 0xf80   :  { %4324 = vmatpush3.msra.mxu1 %v4135_v19 }
 0xf81   :  { %4325 = vmatprep.subr.mxu1 %v7271_v58 }
 0xf82   :  { %4326 = vmatpush3.msra.mxu1 %v4134_v47 }
 0xf83   :  { %4327 = vmatprep.subr.mxu1 %v7271_v58 }
 0xf84   :  { %4328 = vmatpush3.msra.mxu1 %v4133_v16 }
 0xf85   :  { %4329 = vmatprep.subr.mxu1 %v7271_v58 }
 0xf86   :  { %4330 = vmatpush3.msra.mxu1 %v4132_v33 }
 0xf87   :  { %4331 = vmatprep.subr.mxu1 %v7271_v58 }
 0xf88   :  { %4332 = vmatpush3.msra.mxu1 %v4131_v41 }
0x1029   :  { %v4015_v29 = vpop.f32.mrf.mxu1  ;;  %v4086_v53 = vpop.f32.mrf.mxu0 }
0x102a   :  { %v4095_v44 = vrot.slane %v4015_v29, 1  ;;  %v4097_v57 = vrot.slane %v4086_v53, 1 }
0x102b   :  { %v4017_v0 = vpop.f32.mrf.mxu1  ;;  %v4088_v62 = vpop.f32.mrf.mxu0 }
0x102c   :  { %v4103_v63 = vadd.f32 %v4095_v44, %v6132_v55  ;;  %v4096_v26 = vrot.slane %v4017_v0, 1  ;;  %v4105_v1 = vadd.f32 %v4097_v57, %v6140_v32  ;;  %v4098_v5 = vrot.slane %v4088_v62, 1  ;;  %v4235_v44 = vld [vmem:[%s6773_s7] sm:$0xff]  ;;  %s4731_s7 = smov [#allocation12]  }
0x102d   :  { %s4264_s22 = sshll.u32 %s4731_s7, 4  ;;  %s4265_s22 = int_to_ptr.vmem [resolvable:$true] %s4264_s22 }
0x102e   :  { %v4107_v24 = vmul.f32 0.5, %v4103_v63  ;;  %v4104_v12 = vadd.f32 %v4096_v26, %v7287_v37  ;;  %v4106_v58 = vadd.f32 %v4098_v5, %v6145_v50  ;;  %v4121_v37 = vrot.slane %v6712_v48, 7  ;;  %v7290_v48 = vld [vmem:[#allocation33_spill] sm:$0xff]  ;;  %s4691_s2 = scalar_lea.vmem %s4265_s22, 128  ;;  %p4696_p12 = scmp.lt.s32.totalorder %s4265_s22, %s4265_s22 }
0x102f   :  { %v1955_v49 = vadd.f32 1.0, %v7290_v48  ;;  %v1969_v53 = vmul.f32 1.442695, %v7290_v48  ;;  %p4692_p11 = scmp.ne.s32.totalorder %s4265_s22, %s4691_s2  ;;  %p4697_p13 = scmp.lt.s32.totalorder %s4691_s2, %s4691_s2 }
0x1030   :  { %4511 = vtanh.f32 %v4107_v24  ;;  %v4111_v20 = vmul.f32 0.5, %v4104_v12  ;;  %v4116_v9 = vmul.f32 0.5, %v4106_v58 }
0x1031   :  { %v1956_v22 = vsel %vm1942_vm3, %v1955_v49, 0.0  ;;  %p4698_p0 = por %p4697_p13, %p4696_p12 }
0x1032   :  { %4513 = vtanh.f32 %v4111_v20  ;;  %v1957_v25 = vsel %vm1944_vm2, %v1956_v22, 0.0 }
0x1033   :  { %4515 = vtanh.f32 %v4105_v1  ;;  %p4699_p1 = pnand %p4698_p0, %p4692_p11 }
0x1034   :  { %4517 = vtanh.f32 %v4116_v9 }
0x103d   :  { %v4512_v11 = vpop.eup %4511 }
0x103e   :  { %v4109_v40 = vadd.f32 1.0, %v4512_v11 }
0x103f   :  { %v4514_v23 = vpop.eup %4513 }
0x1040   :  { %v4110_v55 = vmul.f32 0.5, %v4109_v40  ;;  %v4113_v21 = vadd.f32 1.0, %v4514_v23  ;;  %v4516_v7 = vpop.eup %4515 }
0x1041   :  { %v4518_v32 = vpop.eup %4517 }
0x1042   :  { %v4114_v35 = vmul.f32 0.5, %v4113_v21  ;;  %v4124_v39 = vmul.f32 %v4516_v7, %v4110_v55  ;;  %v4118_v6 = vadd.f32 1.0, %v4518_v32 }
0x1044   :  { %v4123_v34 = vmul.f32 %v4121_v37, %v4114_v35  ;;  %v4119_v28 = vmul.f32 0.5, %v4118_v6 }
0x1046   :  { %v4125_v17 = vadd.f32 %v4124_v39, %v4123_v34 }
0x1048   :  { %4519 = vtanh.f32 %v4125_v17 }
0x1055   :  { %v4520_v27 = vpop.eup %4519 }
0x1056   :  { %v4127_v50 = vmul.f32 %v4520_v27, %v4119_v28 }
0x1058   :  { %4128 = vst [vmem:[#allocation2] sm:$0x80] %v4127_v50 }
0x105f   :  { %v4129_v10 = vld [vmem:[#allocation2] sm:$0xff] }
0x1060   :  { %v4130_v13 = vmax.f32 %v4129_v10, 0.0 }
0x1062   :  { %4334 = vmatmul.mubr.f32.vlgmr.msra.gmra.mxu1 %v4130_v13 }
0x1122   :  { %v4220_v8 = vpop.f32.mrf.mxu1 }
0x1123   :  { %v4221_v59 = vadd.f32 %v4283_v15, %v4220_v8 }
0x1124   :  { %v4335_v54 = vpop.f32.mrf.mxu1 }
0x1125   :  { %4224 = vmax.xlane.f32.xlu0 %v4221_v59 }
0x1129   :  { %1946 = vadd.xlane.f32.xlu0 %v1945_v56 }
0x112d   :  { %1958 = vadd.xlane.f32.xlu0 %v1957_v25 }
0x11ae   :  { %v4225_v60 = vpop.xlane.xlu0 %4224 }
0x11af   :  { %v4226_v14 = vsub.f32 %v4221_v59, %v4225_v60 }
0x11b1   :  { %v4227_v2 = vmul.f32 1.442695, %v4226_v14 }
0x11b2   :  { %v1947_v36 = vpop.xlane.xlu0 %1946 }
0x11b3   :  { %v1948_v4 = vrot.slane %v1947_v36, 4  ;;  %4521 = vpow2.f32 %v4227_v2 }
0x11b4   :  { %4523 = vpow2.f32 %v1969_v53 }
0x11b5   :  { %v1949_v52 = vadd.f32 %v1948_v4, %v1947_v36 }
0x11b6   :  { %v1959_v45 = vpop.xlane.xlu0 %1958 }
0x11b7   :  { %v1950_v30 = vrot.slane %v1949_v52, 2  ;;  %v1960_v3 = vrot.slane %v1959_v45, 4 }
0x11b9   :  { %v1961_v61 = vadd.f32 %v1960_v3, %v1959_v45  ;;  %v1951_v42 = vadd.f32 %v1950_v30, %v1949_v52 }
0x11bb   :  { %v1962_v38 = vrot.slane %v1961_v61, 2  ;;  %v1952_v19 = vrot.slane %v1951_v42, 1 }
0x11bd   :  { %v1953_v47 = vadd.f32 %v1952_v19, %v1951_v42  ;;  %v1963_v16 = vadd.f32 %v1962_v38, %v1961_v61 }
0x11bf   :  { %4336 = vpush %v1953_v47  ;;  %v1964_v33 = vrot.slane %v1963_v16, 1 }
0x11c0   :  { %v4522_v41 = vpop.eup %4521 }
0x11c1   :  { %4229 = vadd.xlane.f32.xlu1 %v4522_v41  ;;  %v1965_v29 = vadd.f32 %v1964_v33, %v1963_v16  ;;  %v4524_v0 = vpop.eup %4523 }
0x11c3   :  { %4338 = vpush %v1965_v29 }
0x11d2   :  { %4237 = vperm.xlu1 %4357, %v4235_v44  }
0x11f0   :  { %s4337_s16 = spop %4336 }
0x11f1   :  { %v1971_v63 = vstv %s4337_s16 }
0x11f2   :  { %v1972_v26 = vadd.f32 %v4524_v0, %v1971_v63 }
0x11f4   :  { %v1973_v24 = vsel %vm1942_vm3, %v1972_v26, 0.0 }
0x11f5   :  { %v1974_v57 = vsel %vm1944_vm2, %v1973_v24, 0.0 }
0x11f6   :  { %1975 = vadd.xlane.f32.xlu0 %v1974_v57 }
0x124a   :  { %v4230_v12 = vpop.xlane.xlu1 %4229 }
0x124b   :  { %4525 = vlog2.f32 %v4230_v12 }
0x124e   :  { %v4238_v20 = vpop.permute.xlu1 %4237 }
0x124f   :  { %vm4239_vm4 = vcmp.eq.s32.totalorder %v6740_v18, %v4238_v20 }
0x1258   :  { %v4526_v62 = vpop.eup %4525 }
0x1259   :  { %v4232_v1 = vmul.f32 0.6931472, %v4526_v62 }
0x125b   :  { %v4233_v5 = vsub.f32 %v4226_v14, %v4232_v1 }
0x125d   :  { %v4240_v58 = vsel %vm4239_vm4, %v4233_v5, 0.0  ;;  %4234 = vst [vmem:[#allocation12] sm:$0xff] %v4233_v5 }
0x125e   :  { %4241 = vadd.xlane.f32.xlu0 %v4240_v58 }
0x127f   :  { %v1976_v9 = vpop.xlane.xlu0 %1975 }
0x1280   :  { %v1977_v11 = vrot.slane %v1976_v9, 4 }
0x1282   :  { %v1978_v40 = vadd.f32 %v1977_v11, %v1976_v9 }
0x1284   :  { %v1979_v23 = vrot.slane %v1978_v40, 2 }
0x1286   :  { %v1980_v55 = vadd.f32 %v1979_v23, %v1978_v40 }
0x1288   :  { %v1981_v21 = vrot.slane %v1980_v55, 1 }
0x128a   :  { %v1982_v35 = vadd.f32 %v1981_v21, %v1980_v55 }
0x128c   :  { %4340 = vpush %v1982_v35 }
0x128d   :  { %4702 = shalt.err (!%p4699_p1)
}
0x128e   :  { %4267 = dma.vmem_to_hbm [thread:$0]  %s4265_s22, 128, %s6784_s18, [#allocation5]   ;;  %vm4252_vm5 = vcmp.eq.s32.totalorder %v6740_v18, 0  ;;  %vm4254_vm6 = vcmp.eq.s32.totalorder %v6740_v18, 1 }
0x128f   :  { %s4339_s0 = spop %4338 }
0x1290   :  { %v1967_v28 = vstv %s4339_s0 }
0x1291   :  { %v1968_v50 = vsub.f32 0.0, %v1967_v28 }
0x12bd   :  { %s4341_s9 = spop %4340 }
0x12be   :  { %v1984_v27 = vstv %s4341_s9 }
0x12bf   :  { %v1985_v10 = vadd.f32 %v1984_v27, %v1968_v50 }
0x12c1   :  { %v1986_v13 = vmul.f32 0.5, %v1985_v10 }
0x12c3   :  { %v4253_v31 = vsel %vm4252_vm5, %v1986_v13, 0.0 }
0x12e7   :  { %v4242_v37 = vpop.xlane.xlu0 %4241 }
0x12e8   :  { %v4243_v7 = vrot.slane %v4242_v37, 4 }
0x12ea   :  { %v4244_v34 = vadd.f32 %v4243_v7, %v4242_v37 }
0x12ec   :  { %v4245_v39 = vrot.slane %v4244_v34, 2 }
0x12ee   :  { %v4246_v17 = vadd.f32 %v4245_v39, %v4244_v34 }
0x12f0   :  { %v4247_v32 = vrot.slane %v4246_v17, 1 }
0x12f2   :  { %v4248_v6 = vadd.f32 %v4247_v32, %v4246_v17 }
0x12f4   :  { %4342 = vpush %v4248_v6 }
0x1325   :  { %s4343_s10 = spop %4342 }
0x1326   :  { %v4250_v15 = vstv %s4343_s10 }
0x1327   :  { %v4251_v8 = vsub.f32 0.0, %v4250_v15 }
0x1329   :  { %v4255_v59 = vsel %vm4254_vm6, %v4251_v8, 0.0 }
0x132a   :  { %v4256_v54 = vadd.f32 %v4255_v59, %v4253_v31 }
0x132c   :  { %4257 = vst [vmem:[%s6785_s19] sm:$0x1] %v4256_v54 }
0x132d   :  { %4717 = dma.done.wait [#allocation5], 128  }
0x132e   :  { %4718 = vsyncadd [#allocation5], 4294967168 }
0x132f   :  { %4275 = vsyncpa [#allocation4], 1 }
0x1330   :  { %4276 = vsyncpa [#allocation7], 1 }
0x1331   :  { %4277 = vsyncpa [#allocation10], 1 }
0x1332   :  { %4278 = vsyncpa [#allocation5], 1 }

</bundles_post_ra>
